<compile_context>
chip_gen: v5e
topology: v5e:2x2
jax: 0.10.0
libtpu: 0.0.40
codegen_flags: <defaults>
</compile_context>

<pallas_src>
import functools

import jax
import jax.numpy as jnp
import numpy as np
from jax.experimental import pallas as pl
from jax.experimental.pallas import tpu as pltpu


RD_PAD = 128     # lane-dense padded readout hidden width (64 + 4 = 68 -> 128)


def _round_up(x, m):
    return (x + m - 1) // m * m


def _pick_edge_blk():
    # v6e / v7x MXUs are 256 wide: 256-edge tiles fill the systolic rows and
    # halve the number of grid steps.  v5e (128-wide MXU) keeps 128.
    try:
        kind = jax.devices()[0].device_kind.lower()
    except Exception:
        return 128
    return 256 if ("v6" in kind or "v7" in kind) else 128


EDGE_BLK = _pick_edge_blk()


# ---------------------------------------------------------------------------
# Fully fused kernel: all passes + readout
# ---------------------------------------------------------------------------
def _gnn_fused_kernel(idx_ref, h0_ref, feat_ref,
                      mw1_ref, mb1_ref, mw2_ref, mb2_ref,
                      uw1_ref, ub1_ref, uw2_ref, ub2_ref,
                      rw1a_ref, rw1b_ref, rb1_ref, rw2_ref, rb2_ref,
                      nodes_out_ref,
                      h_ref, hbf_ref, acc_ref):
    p = pl.program_id(0)                  # message pass (outer, "arbitrary")
    k = pl.program_id(1)                  # edge tile    (inner, "arbitrary")
    n_passes = pl.num_programs(0)
    n_tiles = pl.num_programs(1)
    n_nodes = h_ref.shape[0]
    two_e = idx_ref.shape[2]
    e_blk = two_e // 2

    # ---- pass prologue ------------------------------------------------------
    @pl.when(jnp.logical_and(p == 0, k == 0))
    def _():
        h_ref[...] = h0_ref[...]          # pull h into the resident scratch

    @pl.when(k == 0)
    def _():
        # hoisted once-per-pass bf16 copy of h + accumulator init
        hbf_ref[...] = h_ref[...].astype(jnp.bfloat16)
        acc_ref[...] = jnp.zeros_like(acc_ref)

    # ---- edge tile: gather -> pairwise product -> message MLP -> scatter ----
    idx = idx_ref[0]                                        # (1, 2*E_blk) lanes
    node_sub = jax.lax.broadcasted_iota(jnp.int32, (n_nodes, two_e), 0)
    # One (N, 2*E_blk) one-hot serves both gathers AND the scatter.  Padded
    # edges carry index == n_nodes -> all-zero columns -> gather 0, scatter 0.
    oh = jnp.where(node_sub == idx, 1.0, 0.0).astype(jnp.bfloat16)

    # gather h[src] and h[dst] with one full-height MXU push:
    # (2E, D) = oh^T @ h_bf  (contraction over the node axis; transposed LHS
    # lands on the otherwise-idle XLU if a layout change is needed).
    h_both = jax.lax.dot_general(
        oh, hbf_ref[...],
        dimension_numbers=(((0,), (0,)), ((), ())),
        preferred_element_type=jnp.float32)
    prod = h_both[:e_blk] * h_both[e_blk:]                  # (E, D) f32

    # message MLP (bf16 operands, f32 accumulation)
    z = jnp.dot(prod.astype(jnp.bfloat16), mw1_ref[...],
                preferred_element_type=jnp.float32) + mb1_ref[...]
    z = jnp.maximum(z, 0.0)
    msgs = jnp.dot(z.astype(jnp.bfloat16), mw2_ref[...],
                   preferred_element_type=jnp.float32) + mb2_ref[...]

    # scatter-add into the resident node accumulator: reuse the src half of
    # the gather one-hot as a plain (N, E) @ (E, D) dot (no third one-hot).
    acc_ref[...] += jnp.dot(oh[:, :e_blk], msgs.astype(jnp.bfloat16),
                            preferred_element_type=jnp.float32)

    # ---- pass epilogue: update MLP + residual back into resident h ----------
    @pl.when(k == n_tiles - 1)
    def _():
        u = jnp.dot(acc_ref[...].astype(jnp.bfloat16), uw1_ref[...],
                    preferred_element_type=jnp.float32) + ub1_ref[...]
        u = jnp.maximum(u, 0.0)
        u = jnp.dot(u.astype(jnp.bfloat16), uw2_ref[...],
                    preferred_element_type=jnp.float32) + ub2_ref[...]
        h_ref[...] = h_ref[...] + u                         # residual in f32

    # ---- last grid step: fused readout (h never returns to HBM) -------------
    # NOTE: nodes_out_ref has a CONSTANT index_map, so Pallas copies it to HBM
    # exactly once, after the final grid step; writing it only under this
    # guard is therefore safe.  Do not make the out index_map grid-dependent.
    @pl.when(jnp.logical_and(p == n_passes - 1, k == n_tiles - 1))
    def _():
        hf = h_ref[...]
        zr = jnp.dot(hf.astype(jnp.bfloat16), rw1a_ref[...],
                     preferred_element_type=jnp.float32)
        zr = zr + jnp.dot(feat_ref[...].astype(jnp.bfloat16), rw1b_ref[...],
                          preferred_element_type=jnp.float32)
        zr = jnp.maximum(zr + rb1_ref[...], 0.0)
        # 1-wide second layer -> VPU/XLU row reduction, not a 1-column matmul.
        nodes_out_ref[...] = (jnp.sum(zr * rw2_ref[...], axis=-1,
                                      keepdims=True) + rb2_ref[...])


def gnn_fused_call(h0, feat, idx_tiles, params, padded_ro, *, num_passes):
    n_nodes, d = h0.shape
    f_dim = feat.shape[1]
    n_tiles, _, two_e = idx_tiles.shape
    rw1a, rw1b, rb1, rw2, rb2 = padded_ro

    def const(shape):
        return pl.BlockSpec(shape, lambda p, k: (0,) * len(shape))

    return pl.pallas_call(
        _gnn_fused_kernel,
        out_shape=jax.ShapeDtypeStruct((n_nodes, 1), jnp.float32),
        grid=(num_passes, n_tiles),
        in_specs=[
            pl.BlockSpec((1, 1, two_e), lambda p, k: (k, 0, 0)),  # [src|dst]
            const((n_nodes, d)),                                  # h0 (embed)
            const((n_nodes, f_dim)),                              # other feats
            const((d, d)), const((1, d)), const((d, d)), const((1, d)),  # msg
            const((d, d)), const((1, d)), const((d, d)), const((1, d)),  # upd
            const((d, RD_PAD)), const((f_dim, RD_PAD)),           # ro W1 split
            const((1, RD_PAD)), const((1, RD_PAD)), const((1, 1)),
        ],
        out_specs=const((n_nodes, 1)),
        scratch_shapes=[
            pltpu.VMEM((n_nodes, d), jnp.float32),    # resident h
            pltpu.VMEM((n_nodes, d), jnp.bfloat16),   # per-pass bf16 copy of h
            pltpu.VMEM((n_nodes, d), jnp.float32),    # message accumulator
        ],
        compiler_params=pltpu.CompilerParams(
            dimension_semantics=("arbitrary", "arbitrary")),
    )(idx_tiles, h0, feat,
      params["msg_w1"], params["msg_b1"], params["msg_w2"], params["msg_b2"],
      params["upd_w1"], params["upd_b1"], params["upd_w2"], params["upd_b2"],
      rw1a, rw1b, rb1, rw2, rb2)


# ---------------------------------------------------------------------------
# Parameters + forward
# ---------------------------------------------------------------------------
def init_params(key, other_features_dim, num_embed=100, embed_dim=64):
    keys = jax.random.split(key, 8)
    rd = embed_dim + other_features_dim

    def lin(k, din, dout, w_dtype=jnp.bfloat16):
        kw, kb = jax.random.split(k)
        w = (0.1 * jax.random.normal(kw, (din, dout), jnp.float32)).astype(w_dtype)
        b = 0.1 * jax.random.normal(kb, (1, dout), jnp.float32)
        return w, b

    p = {}
    p["embed"] = 0.1 * jax.random.normal(keys[0], (num_embed, embed_dim),
                                         jnp.float32)
    p["msg_w1"], p["msg_b1"] = lin(keys[1], embed_dim, embed_dim)
    p["msg_w2"], p["msg_b2"] = lin(keys[2], embed_dim, embed_dim)
    p["upd_w1"], p["upd_b1"] = lin(keys[3], embed_dim, embed_dim)
    p["upd_w2"], p["upd_b2"] = lin(keys[4], embed_dim, embed_dim)
    p["ro_w1"], p["ro_b1"] = lin(keys[5], rd, rd)
    p["ro_w2"], p["ro_b2"] = lin(keys[6], rd, 1, w_dtype=jnp.float32)
    return p


@functools.partial(jax.jit, static_argnames=("natoms", "num_passes"))
def gnn_forward(params, encoded_atoms, edges, other_features, *,
                natoms, num_passes=3):
    # TODO(synk): embedding row gather and per-molecule segment-sum stay as
    # tiny XLA glue (an (N,)-scalar scatter has no sensible MXU mapping).
    h0 = params["embed"][encoded_atoms]
    n_nodes, d = h0.shape
    f_dim = other_features.shape[1]
    rd = d + f_dim

    # --- edge indices -> lane-dense [src | dst] tiles ------------------------
    src = edges[0].astype(jnp.int32)
    dst = edges[1].astype(jnp.int32)
    n_edges = src.shape[0]
    e_pad = _round_up(n_edges, EDGE_BLK)
    if e_pad != n_edges:
        sentinel = jnp.full((e_pad - n_edges,), n_nodes, jnp.int32)  # no match
        src = jnp.concatenate([src, sentinel])
        dst = jnp.concatenate([dst, sentinel])
    n_tiles = e_pad // EDGE_BLK
    idx_tiles = jnp.concatenate(
        [src.reshape(n_tiles, EDGE_BLK), dst.reshape(n_tiles, EDGE_BLK)],
        axis=1).reshape(n_tiles, 1, 2 * EDGE_BLK)

    # --- readout weights: split by input (h vs. other_features) and padded to
    #     a lane-dense 128-wide hidden; no concat/pad of node features --------
    rw1a = jnp.zeros((d, RD_PAD), jnp.bfloat16).at[:, :rd].set(
        params["ro_w1"][:d, :])
    rw1b = jnp.zeros((f_dim, RD_PAD), jnp.bfloat16).at[:, :rd].set(
        params["ro_w1"][d:, :])
    rb1 = jnp.zeros((1, RD_PAD), jnp.float32).at[:, :rd].set(params["ro_b1"])
    rw2 = jnp.zeros((1, RD_PAD), jnp.float32).at[:, :rd].set(
        params["ro_w2"][:, 0])

    nodes_out = gnn_fused_call(
        h0, other_features, idx_tiles, params,
        (rw1a, rw1b, rb1, rw2, params["ro_b2"]),
        num_passes=num_passes)[:, 0]

    # --- per-molecule sum: tiny reduction, plain segment_sum glue ------------
    mol_ids = jnp.asarray(np.repeat(np.arange(len(natoms)), np.asarray(natoms)),
                          dtype=jnp.int32)
    return jax.ops.segment_sum(nodes_out, mol_ids, num_segments=len(natoms))


# ---------------------------------------------------------------------------
# Pure-JAX reference with the SAME bf16-operand / f32-accumulation recipe,
# used to validate the kernel (reduction order is the only difference).
# ---------------------------------------------------------------------------
def gnn_reference(params, encoded_atoms, edges, natoms, other_features,
                  num_passes=3):
    bf16, f32 = jnp.bfloat16, jnp.float32

    def mm(a, w):
        return jnp.dot(a.astype(bf16), w.astype(bf16),
                       preferred_element_type=f32)

    h = params["embed"][encoded_atoms]
    src, dst = edges[0], edges[1]
    n_nodes = h.shape[0]
    for _ in range(num_passes):
        hb = h.astype(bf16).astype(f32)
        prod = hb[src] * hb[dst]
        z = jnp.maximum(mm(prod, params["msg_w1"]) + params["msg_b1"], 0.0)
        msgs = mm(z, params["msg_w2"]) + params["msg_b2"]
        node_msgs = jax.ops.segment_sum(msgs.astype(bf16).astype(f32), src,
                                        num_segments=n_nodes)
        z = jnp.maximum(mm(node_msgs, params["upd_w1"]) + params["upd_b1"], 0.0)
        h = h + mm(z, params["upd_w2"]) + params["upd_b2"]

    x = jnp.concatenate([h, other_features], axis=1)
    z = jnp.maximum(mm(x, params["ro_w1"]) + params["ro_b1"], 0.0)
    nodes_out = jnp.dot(z, params["ro_w2"].astype(f32),
                        preferred_element_type=f32) + params["ro_b2"]
    mol_ids = jnp.asarray(np.repeat(np.arange(len(natoms)), np.asarray(natoms)),
                          dtype=jnp.int32)
    return jax.ops.segment_sum(nodes_out[:, 0], mol_ids,
                               num_segments=len(natoms))


if __name__ == "__main__":
    key = jax.random.PRNGKey(0)
    k_par, k_atoms, k_edges, k_feat = jax.random.split(key, 4)

    other_features_dim = 4
    embed_dim = 64
    num_embed = 100
    natoms = (150, 106)                # two molecules, 256 nodes total
    n_nodes = sum(natoms)
    n_edges = 700                      # pads to 768 (3 or 6 edge tiles)

    params = init_params(k_par, other_features_dim, num_embed, embed_dim)
    encoded_atoms = jax.random.randint(k_atoms, (n_nodes,), 0, num_embed,
                                       dtype=jnp.int32)
    edges = jax.random.randint(k_edges, (2, n_edges), 0, n_nodes,
                               dtype=jnp.int32)
    other_features = jax.random.normal(k_feat, (n_nodes, other_features_dim),
                                       jnp.float32)

    out = gnn_forward(params, encoded_atoms, edges, other_features,
                      natoms=natoms, num_passes=3)
    out = jax.block_until_ready(out)

    ref = gnn_reference(params, encoded_atoms, edges, natoms, other_features,
                        num_passes=3)
    ref = jax.block_until_ready(ref)

    assert out.shape == (len(natoms),)
    # bf16 matmul operands on both sides; differences are reduction-order only.
    assert jnp.allclose(out, ref, rtol=2e-2, atol=2e-2), (out, ref)

    print("KERNEL_OK")
</pallas_src>

<mosaic_0001>
module attributes {stable_mosaic.version = 11 : i64} {
  func.func @_gnn_fused_kernel(%arg0: i32, %arg1: i32, %arg2: memref<1x1x256xi32, #tpu.memory_space<vmem>>, %arg3: memref<256x64xf32, #tpu.memory_space<vmem>>, %arg4: memref<256x4xf32, #tpu.memory_space<vmem>>, %arg5: memref<64x64xbf16, #tpu.memory_space<vmem>>, %arg6: memref<1x64xf32, #tpu.memory_space<vmem>>, %arg7: memref<64x64xbf16, #tpu.memory_space<vmem>>, %arg8: memref<1x64xf32, #tpu.memory_space<vmem>>, %arg9: memref<64x64xbf16, #tpu.memory_space<vmem>>, %arg10: memref<1x64xf32, #tpu.memory_space<vmem>>, %arg11: memref<64x64xbf16, #tpu.memory_space<vmem>>, %arg12: memref<1x64xf32, #tpu.memory_space<vmem>>, %arg13: memref<64x128xbf16, #tpu.memory_space<vmem>>, %arg14: memref<4x128xbf16, #tpu.memory_space<vmem>>, %arg15: memref<1x128xf32, #tpu.memory_space<vmem>>, %arg16: memref<1x128xf32, #tpu.memory_space<vmem>>, %arg17: memref<1x1xf32, #tpu.memory_space<vmem>>, %arg18: memref<256x1xf32, #tpu.memory_space<vmem>>, %arg19: memref<256x64xf32, #tpu.memory_space<vmem>>, %arg20: memref<256x64xbf16, #tpu.memory_space<vmem>>, %arg21: memref<256x64xf32, #tpu.memory_space<vmem>>) attributes {dimension_semantics = [#tpu.dimension_semantics<arbitrary>, #tpu.dimension_semantics<arbitrary>], iteration_bounds = array<i64: 3, 6>, scalar_prefetch = 0 : i64, scratch_operands = 3 : i64, tpu.core_type = #tpu.core_type<tc>, window_params = [{transform_indices = @transform_0, window_bounds = array<i64: 1, 1, 256>}, {pipeline_mode = #tpu.pipeline_mode<synchronous>, transform_indices = @transform_1, window_bounds = array<i64: 256, 64>}, {pipeline_mode = #tpu.pipeline_mode<synchronous>, transform_indices = @transform_2, window_bounds = array<i64: 256, 4>}, {pipeline_mode = #tpu.pipeline_mode<synchronous>, transform_indices = @transform_3, window_bounds = array<i64: 64, 64>}, {pipeline_mode = #tpu.pipeline_mode<synchronous>, transform_indices = @transform_4, window_bounds = array<i64: 1, 64>}, {pipeline_mode = #tpu.pipeline_mode<synchronous>, transform_indices = @transform_5, window_bounds = array<i64: 64, 64>}, {pipeline_mode = #tpu.pipeline_mode<synchronous>, transform_indices = @transform_6, window_bounds = array<i64: 1, 64>}, {pipeline_mode = #tpu.pipeline_mode<synchronous>, transform_indices = @transform_7, window_bounds = array<i64: 64, 64>}, {pipeline_mode = #tpu.pipeline_mode<synchronous>, transform_indices = @transform_8, window_bounds = array<i64: 1, 64>}, {pipeline_mode = #tpu.pipeline_mode<synchronous>, transform_indices = @transform_9, window_bounds = array<i64: 64, 64>}, {pipeline_mode = #tpu.pipeline_mode<synchronous>, transform_indices = @transform_10, window_bounds = array<i64: 1, 64>}, {pipeline_mode = #tpu.pipeline_mode<synchronous>, transform_indices = @transform_11, window_bounds = array<i64: 64, 128>}, {pipeline_mode = #tpu.pipeline_mode<synchronous>, transform_indices = @transform_12, window_bounds = array<i64: 4, 128>}, {pipeline_mode = #tpu.pipeline_mode<synchronous>, transform_indices = @transform_13, window_bounds = array<i64: 1, 128>}, {pipeline_mode = #tpu.pipeline_mode<synchronous>, transform_indices = @transform_14, window_bounds = array<i64: 1, 128>}, {pipeline_mode = #tpu.pipeline_mode<synchronous>, transform_indices = @transform_15, window_bounds = array<i64: 1, 1>}, {pipeline_mode = #tpu.pipeline_mode<synchronous>, transform_indices = @transform_16, window_bounds = array<i64: 256, 1>}]} {
    %c0_i32 = arith.constant 0 : i32
    %0 = arith.cmpi eq, %arg0, %c0_i32 : i32
    %c0_i32_0 = arith.constant 0 : i32
    %1 = arith.cmpi eq, %arg1, %c0_i32_0 : i32
    %2 = arith.andi %0, %1 : i1
    %3 = arith.extui %2 : i1 to i32
    %c0_i32_1 = arith.constant 0 : i32
    %4 = arith.cmpi ne, %3, %c0_i32_1 : i32
    scf.if %4 {
      %c0_29 = arith.constant 0 : index
      %c0_30 = arith.constant 0 : index
      %50 = vector.load %arg3[%c0_29, %c0_30] : memref<256x64xf32, #tpu.memory_space<vmem>>, vector<256x64xf32>
      %c0_31 = arith.constant 0 : index
      %c0_32 = arith.constant 0 : index
      %51 = vector.load %arg19[%c0_31, %c0_32] : memref<256x64xf32, #tpu.memory_space<vmem>>, vector<256x64xf32>
      tpu.vector_store %arg19[%c0_31, %c0_32], %50 {strides = array<i32>} : memref<256x64xf32, #tpu.memory_space<vmem>>, vector<256x64xf32>,
    } else {
    }
    %c0_i32_2 = arith.constant 0 : i32
    %5 = arith.cmpi eq, %arg1, %c0_i32_2 : i32
    %6 = arith.extui %5 : i1 to i32
    %c0_i32_3 = arith.constant 0 : i32
    %7 = arith.cmpi ne, %6, %c0_i32_3 : i32
    scf.if %7 {
      %c0_29 = arith.constant 0 : index
      %c0_30 = arith.constant 0 : index
      %50 = vector.load %arg19[%c0_29, %c0_30] : memref<256x64xf32, #tpu.memory_space<vmem>>, vector<256x64xf32>
      %51 = arith.truncf %50 : vector<256x64xf32> to vector<256x64xbf16>
      %c0_31 = arith.constant 0 : index
      %c0_32 = arith.constant 0 : index
      %52 = vector.load %arg20[%c0_31, %c0_32] : memref<256x64xbf16, #tpu.memory_space<vmem>>, vector<256x64xbf16>
      tpu.vector_store %arg20[%c0_31, %c0_32], %51 {strides = array<i32>} : memref<256x64xbf16, #tpu.memory_space<vmem>>, vector<256x64xbf16>,
      %cst_33 = arith.constant 0.000000e+00 : f32
      %53 = vector.broadcast %cst_33 : f32 to vector<256x64xf32>
      %c0_34 = arith.constant 0 : index
      %c0_35 = arith.constant 0 : index
      %54 = vector.load %arg21[%c0_34, %c0_35] : memref<256x64xf32, #tpu.memory_space<vmem>>, vector<256x64xf32>
      tpu.vector_store %arg21[%c0_34, %c0_35], %53 {strides = array<i32>} : memref<256x64xf32, #tpu.memory_space<vmem>>, vector<256x64xf32>,
    } else {
    }
    %c0 = arith.constant 0 : index
    %c0_4 = arith.constant 0 : index
    %c0_5 = arith.constant 0 : index
    %8 = vector.load %arg2[%c0, %c0_4, %c0_5] : memref<1x1x256xi32, #tpu.memory_space<vmem>>, vector<1x1x256xi32>
    %9 = vector.shape_cast %8 : vector<1x1x256xi32> to vector<1x256xi32>
    %10 = tpu.iota {dimensions = array<i32: 0>} : vector<256x256xi32>
    %11 = vector.broadcast %9 : vector<1x256xi32> to vector<256x256xi32>
    %12 = arith.cmpi eq, %10, %11 : vector<256x256xi32>
    %cst = arith.constant 1.000000e+00 : f32
    %cst_6 = arith.constant 0.000000e+00 : f32
    %13 = vector.broadcast %cst : f32 to vector<256x256xf32>
    %14 = vector.broadcast %cst_6 : f32 to vector<256x256xf32>
    %15 = arith.select %12, %13, %14 : vector<256x256xi1>, vector<256x256xf32>
    %16 = arith.truncf %15 : vector<256x256xf32> to vector<256x256xbf16>
    %c0_7 = arith.constant 0 : index
    %c0_8 = arith.constant 0 : index
    %17 = vector.load %arg20[%c0_7, %c0_8] : memref<256x64xbf16, #tpu.memory_space<vmem>>, vector<256x64xbf16>
    %cst_9 = arith.constant dense<0.000000e+00> : vector<256x64xf32>
    %18 = tpu.matmul %16, %17, %cst_9 {dimension_numbers = #tpu.dot_dimension_numbers<[0], [0], [1], [1], [0, 1, 1, 1], [], []>} : vector<256x256xbf16>, vector<256x64xbf16>, vector<256x64xf32> -> vector<256x64xf32>
    %19 = vector.extract_strided_slice %18 {offsets = [0, 0], sizes = [128, 64], strides = [1, 1]} : vector<256x64xf32> to vector<128x64xf32>
    %20 = vector.extract_strided_slice %18 {offsets = [128, 0], sizes = [128, 64], strides = [1, 1]} : vector<256x64xf32> to vector<128x64xf32>
    %21 = arith.mulf %19, %20 : vector<128x64xf32>
    %22 = arith.truncf %21 : vector<128x64xf32> to vector<128x64xbf16>
    %c0_10 = arith.constant 0 : index
    %c0_11 = arith.constant 0 : index
    %23 = vector.load %arg5[%c0_10, %c0_11] : memref<64x64xbf16, #tpu.memory_space<vmem>>, vector<64x64xbf16>
    %cst_12 = arith.constant dense<0.000000e+00> : vector<128x64xf32>
    %24 = tpu.matmul %22, %23, %cst_12 {dimension_numbers = #tpu.dot_dimension_numbers<[1], [0], [0], [1], [0, 0, 1, 1], [], []>} : vector<128x64xbf16>, vector<64x64xbf16>, vector<128x64xf32> -> vector<128x64xf32>
    %c0_13 = arith.constant 0 : index
    %c0_14 = arith.constant 0 : index
    %25 = vector.load %arg6[%c0_13, %c0_14] : memref<1x64xf32, #tpu.memory_space<vmem>>, vector<1x64xf32>
    %26 = vector.broadcast %25 : vector<1x64xf32> to vector<128x64xf32>
    %27 = arith.addf %24, %26 : vector<128x64xf32>
    %cst_15 = arith.constant 0.000000e+00 : f32
    %28 = vector.broadcast %cst_15 : f32 to vector<128x64xf32>
    %29 = arith.maximumf %27, %28 : vector<128x64xf32>
    %30 = arith.truncf %29 : vector<128x64xf32> to vector<128x64xbf16>
    %c0_16 = arith.constant 0 : index
    %c0_17 = arith.constant 0 : index
    %31 = vector.load %arg7[%c0_16, %c0_17] : memref<64x64xbf16, #tpu.memory_space<vmem>>, vector<64x64xbf16>
    %cst_18 = arith.constant dense<0.000000e+00> : vector<128x64xf32>
    %32 = tpu.matmul %30, %31, %cst_18 {dimension_numbers = #tpu.dot_dimension_numbers<[1], [0], [0], [1], [0, 0, 1, 1], [], []>} : vector<128x64xbf16>, vector<64x64xbf16>, vector<128x64xf32> -> vector<128x64xf32>
    %c0_19 = arith.constant 0 : index
    %c0_20 = arith.constant 0 : index
    %33 = vector.load %arg8[%c0_19, %c0_20] : memref<1x64xf32, #tpu.memory_space<vmem>>, vector<1x64xf32>
    %34 = vector.broadcast %33 : vector<1x64xf32> to vector<128x64xf32>
    %35 = arith.addf %32, %34 : vector<128x64xf32>
    %c0_21 = arith.constant 0 : index
    %c0_22 = arith.constant 0 : index
    %36 = vector.load %arg21[%c0_21, %c0_22] : memref<256x64xf32, #tpu.memory_space<vmem>>, vector<256x64xf32>
    %37 = vector.extract_strided_slice %16 {offsets = [0, 0], sizes = [256, 128], strides = [1, 1]} : vector<256x256xbf16> to vector<256x128xbf16>
    %38 = arith.truncf %35 : vector<128x64xf32> to vector<128x64xbf16>
    %cst_23 = arith.constant dense<0.000000e+00> : vector<256x64xf32>
    %39 = tpu.matmul %37, %38, %cst_23 {dimension_numbers = #tpu.dot_dimension_numbers<[1], [0], [0], [1], [0, 0, 1, 1], [], []>} : vector<256x128xbf16>, vector<128x64xbf16>, vector<256x64xf32> -> vector<256x64xf32>
    %40 = arith.addf %36, %39 : vector<256x64xf32>
    %c0_24 = arith.constant 0 : index
    %c0_25 = arith.constant 0 : index
    %41 = vector.load %arg21[%c0_24, %c0_25] : memref<256x64xf32, #tpu.memory_space<vmem>>, vector<256x64xf32>
    tpu.vector_store %arg21[%c0_24, %c0_25], %40 {strides = array<i32>} : memref<256x64xf32, #tpu.memory_space<vmem>>, vector<256x64xf32>,
    %c5_i32 = arith.constant 5 : i32
    %42 = arith.cmpi eq, %arg1, %c5_i32 : i32
    %43 = arith.extui %42 : i1 to i32
    %c0_i32_26 = arith.constant 0 : i32
    %44 = arith.cmpi ne, %43, %c0_i32_26 : i32
    scf.if %44 {
      %c0_29 = arith.constant 0 : index
      %c0_30 = arith.constant 0 : index
      %50 = vector.load %arg21[%c0_29, %c0_30] : memref<256x64xf32, #tpu.memory_space<vmem>>, vector<256x64xf32>
      %51 = arith.truncf %50 : vector<256x64xf32> to vector<256x64xbf16>
      %c0_31 = arith.constant 0 : index
      %c0_32 = arith.constant 0 : index
      %52 = vector.load %arg9[%c0_31, %c0_32] : memref<64x64xbf16, #tpu.memory_space<vmem>>, vector<64x64xbf16>
      %cst_33 = arith.constant dense<0.000000e+00> : vector<256x64xf32>
      %53 = tpu.matmul %51, %52, %cst_33 {dimension_numbers = #tpu.dot_dimension_numbers<[1], [0], [0], [1], [0, 0, 1, 1], [], []>} : vector<256x64xbf16>, vector<64x64xbf16>, vector<256x64xf32> -> vector<256x64xf32>
      %c0_34 = arith.constant 0 : index
      %c0_35 = arith.constant 0 : index
      %54 = vector.load %arg10[%c0_34, %c0_35] : memref<1x64xf32, #tpu.memory_space<vmem>>, vector<1x64xf32>
      %55 = vector.broadcast %54 : vector<1x64xf32> to vector<256x64xf32>
      %56 = arith.addf %53, %55 : vector<256x64xf32>
      %cst_36 = arith.constant 0.000000e+00 : f32
      %57 = vector.broadcast %cst_36 : f32 to vector<256x64xf32>
      %58 = arith.maximumf %56, %57 : vector<256x64xf32>
      %59 = arith.truncf %58 : vector<256x64xf32> to vector<256x64xbf16>
      %c0_37 = arith.constant 0 : index
      %c0_38 = arith.constant 0 : index
      %60 = vector.load %arg11[%c0_37, %c0_38] : memref<64x64xbf16, #tpu.memory_space<vmem>>, vector<64x64xbf16>
      %cst_39 = arith.constant dense<0.000000e+00> : vector<256x64xf32>
      %61 = tpu.matmul %59, %60, %cst_39 {dimension_numbers = #tpu.dot_dimension_numbers<[1], [0], [0], [1], [0, 0, 1, 1], [], []>} : vector<256x64xbf16>, vector<64x64xbf16>, vector<256x64xf32> -> vector<256x64xf32>
      %c0_40 = arith.constant 0 : index
      %c0_41 = arith.constant 0 : index
      %62 = vector.load %arg12[%c0_40, %c0_41] : memref<1x64xf32, #tpu.memory_space<vmem>>, vector<1x64xf32>
      %63 = vector.broadcast %62 : vector<1x64xf32> to vector<256x64xf32>
      %64 = arith.addf %61, %63 : vector<256x64xf32>
      %c0_42 = arith.constant 0 : index
      %c0_43 = arith.constant 0 : index
      %65 = vector.load %arg19[%c0_42, %c0_43] : memref<256x64xf32, #tpu.memory_space<vmem>>, vector<256x64xf32>
      %66 = arith.addf %65, %64 : vector<256x64xf32>
      %c0_44 = arith.constant 0 : index
      %c0_45 = arith.constant 0 : index
      %67 = vector.load %arg19[%c0_44, %c0_45] : memref<256x64xf32, #tpu.memory_space<vmem>>, vector<256x64xf32>
      tpu.vector_store %arg19[%c0_44, %c0_45], %66 {strides = array<i32>} : memref<256x64xf32, #tpu.memory_space<vmem>>, vector<256x64xf32>,
    } else {
    }
    %c2_i32 = arith.constant 2 : i32
    %45 = arith.cmpi eq, %arg0, %c2_i32 : i32
    %c5_i32_27 = arith.constant 5 : i32
    %46 = arith.cmpi eq, %arg1, %c5_i32_27 : i32
    %47 = arith.andi %45, %46 : i1
    %48 = arith.extui %47 : i1 to i32
    %c0_i32_28 = arith.constant 0 : i32
    %49 = arith.cmpi ne, %48, %c0_i32_28 : i32
    scf.if %49 {
      %c0_29 = arith.constant 0 : index
      %c0_30 = arith.constant 0 : index
      %50 = vector.load %arg19[%c0_29, %c0_30] : memref<256x64xf32, #tpu.memory_space<vmem>>, vector<256x64xf32>
      %51 = arith.truncf %50 : vector<256x64xf32> to vector<256x64xbf16>
      %c0_31 = arith.constant 0 : index
      %c0_32 = arith.constant 0 : index
      %52 = vector.load %arg13[%c0_31, %c0_32] : memref<64x128xbf16, #tpu.memory_space<vmem>>, vector<64x128xbf16>
      %cst_33 = arith.constant dense<0.000000e+00> : vector<256x128xf32>
      %53 = tpu.matmul %51, %52, %cst_33 {dimension_numbers = #tpu.dot_dimension_numbers<[1], [0], [0], [1], [0, 0, 1, 1], [], []>} : vector<256x64xbf16>, vector<64x128xbf16>, vector<256x128xf32> -> vector<256x128xf32>
      %c0_34 = arith.constant 0 : index
      %c0_35 = arith.constant 0 : index
      %54 = vector.load %arg4[%c0_34, %c0_35] : memref<256x4xf32, #tpu.memory_space<vmem>>, vector<256x4xf32>
      %55 = arith.truncf %54 : vector<256x4xf32> to vector<256x4xbf16>
      %c0_36 = arith.constant 0 : index
      %c0_37 = arith.constant 0 : index
      %56 = vector.load %arg14[%c0_36, %c0_37] : memref<4x128xbf16, #tpu.memory_space<vmem>>, vector<4x128xbf16>
      %cst_38 = arith.constant dense<0.000000e+00> : vector<256x128xf32>
      %57 = tpu.matmul %55, %56, %cst_38 {dimension_numbers = #tpu.dot_dimension_numbers<[1], [0], [0], [1], [0, 0, 1, 1], [], []>} : vector<256x4xbf16>, vector<4x128xbf16>, vector<256x128xf32> -> vector<256x128xf32>
      %58 = arith.addf %53, %57 : vector<256x128xf32>
      %c0_39 = arith.constant 0 : index
      %c0_40 = arith.constant 0 : index
      %59 = vector.load %arg15[%c0_39, %c0_40] : memref<1x128xf32, #tpu.memory_space<vmem>>, vector<1x128xf32>
      %60 = vector.broadcast %59 : vector<1x128xf32> to vector<256x128xf32>
      %61 = arith.addf %58, %60 : vector<256x128xf32>
      %cst_41 = arith.constant 0.000000e+00 : f32
      %62 = vector.broadcast %cst_41 : f32 to vector<256x128xf32>
      %63 = arith.maximumf %61, %62 : vector<256x128xf32>
      %c0_42 = arith.constant 0 : index
      %c0_43 = arith.constant 0 : index
      %64 = vector.load %arg16[%c0_42, %c0_43] : memref<1x128xf32, #tpu.memory_space<vmem>>, vector<1x128xf32>
      %65 = vector.broadcast %64 : vector<1x128xf32> to vector<256x128xf32>
      %66 = arith.mulf %63, %65 : vector<256x128xf32>
      %cst_44 = arith.constant dense<0.000000e+00> : vector<256xf32>
      %67 = vector.multi_reduction <add>, %66, %cst_44 [1] : vector<256x128xf32> to vector<256xf32>
      %68 = vector.shape_cast %67 : vector<256xf32> to vector<256x1xf32>
      %c0_45 = arith.constant 0 : index
      %c0_46 = arith.constant 0 : index
      %69 = vector.load %arg17[%c0_45, %c0_46] : memref<1x1xf32, #tpu.memory_space<vmem>>, vector<1x1xf32>
      %70 = vector.broadcast %69 : vector<1x1xf32> to vector<256x1xf32>
      %71 = arith.addf %68, %70 : vector<256x1xf32>
      %c0_47 = arith.constant 0 : index
      %c0_48 = arith.constant 0 : index
      %72 = vector.load %arg18[%c0_47, %c0_48] : memref<256x1xf32, #tpu.memory_space<vmem>>, vector<256x1xf32>
      tpu.vector_store %arg18[%c0_47, %c0_48], %71 {strides = array<i32>} : memref<256x1xf32, #tpu.memory_space<vmem>>, vector<256x1xf32>,
    } else {
    }
    return
  }
  func.func @transform_0(%arg0: i32, %arg1: i32) -> (i32, i32, i32) {
    %c0_i32 = arith.constant 0 : i32
    %c0_i32_0 = arith.constant 0 : i32
    %c0_i32_1 = arith.constant 0 : i32
    return %arg1, %c0_i32, %c0_i32_0 : i32, i32, i32
  }
  func.func @transform_1(%arg0: i32, %arg1: i32) -> (i32, i32) {
    %c0_i32 = arith.constant 0 : i32
    %c0_i32_0 = arith.constant 0 : i32
    %c0_i32_1 = arith.constant 0 : i32
    return %c0_i32, %c0_i32_0 : i32, i32
  }
  func.func @transform_2(%arg0: i32, %arg1: i32) -> (i32, i32) {
    %c0_i32 = arith.constant 0 : i32
    %c0_i32_0 = arith.constant 0 : i32
    %c0_i32_1 = arith.constant 0 : i32
    return %c0_i32, %c0_i32_0 : i32, i32
  }
  func.func @transform_3(%arg0: i32, %arg1: i32) -> (i32, i32) {
    %c0_i32 = arith.constant 0 : i32
    %c0_i32_0 = arith.constant 0 : i32
    %c0_i32_1 = arith.constant 0 : i32
    return %c0_i32, %c0_i32_0 : i32, i32
  }
  func.func @transform_4(%arg0: i32, %arg1: i32) -> (i32, i32) {
    %c0_i32 = arith.constant 0 : i32
    %c0_i32_0 = arith.constant 0 : i32
    %c0_i32_1 = arith.constant 0 : i32
    return %c0_i32, %c0_i32_0 : i32, i32
  }
  func.func @transform_5(%arg0: i32, %arg1: i32) -> (i32, i32) {
    %c0_i32 = arith.constant 0 : i32
    %c0_i32_0 = arith.constant 0 : i32
    %c0_i32_1 = arith.constant 0 : i32
    return %c0_i32, %c0_i32_0 : i32, i32
  }
  func.func @transform_6(%arg0: i32, %arg1: i32) -> (i32, i32) {
    %c0_i32 = arith.constant 0 : i32
    %c0_i32_0 = arith.constant 0 : i32
    %c0_i32_1 = arith.constant 0 : i32
    return %c0_i32, %c0_i32_0 : i32, i32
  }
  func.func @transform_7(%arg0: i32, %arg1: i32) -> (i32, i32) {
    %c0_i32 = arith.constant 0 : i32
    %c0_i32_0 = arith.constant 0 : i32
    %c0_i32_1 = arith.constant 0 : i32
    return %c0_i32, %c0_i32_0 : i32, i32
  }
  func.func @transform_8(%arg0: i32, %arg1: i32) -> (i32, i32) {
    %c0_i32 = arith.constant 0 : i32
    %c0_i32_0 = arith.constant 0 : i32
    %c0_i32_1 = arith.constant 0 : i32
    return %c0_i32, %c0_i32_0 : i32, i32
  }
  func.func @transform_9(%arg0: i32, %arg1: i32) -> (i32, i32) {
    %c0_i32 = arith.constant 0 : i32
    %c0_i32_0 = arith.constant 0 : i32
    %c0_i32_1 = arith.constant 0 : i32
    return %c0_i32, %c0_i32_0 : i32, i32
  }
  func.func @transform_10(%arg0: i32, %arg1: i32) -> (i32, i32) {
    %c0_i32 = arith.constant 0 : i32
    %c0_i32_0 = arith.constant 0 : i32
    %c0_i32_1 = arith.constant 0 : i32
    return %c0_i32, %c0_i32_0 : i32, i32
  }
  func.func @transform_11(%arg0: i32, %arg1: i32) -> (i32, i32) {
    %c0_i32 = arith.constant 0 : i32
    %c0_i32_0 = arith.constant 0 : i32
    %c0_i32_1 = arith.constant 0 : i32
    return %c0_i32, %c0_i32_0 : i32, i32
  }
  func.func @transform_12(%arg0: i32, %arg1: i32) -> (i32, i32) {
    %c0_i32 = arith.constant 0 : i32
    %c0_i32_0 = arith.constant 0 : i32
    %c0_i32_1 = arith.constant 0 : i32
    return %c0_i32, %c0_i32_0 : i32, i32
  }
  func.func @transform_13(%arg0: i32, %arg1: i32) -> (i32, i32) {
    %c0_i32 = arith.constant 0 : i32
    %c0_i32_0 = arith.constant 0 : i32
    %c0_i32_1 = arith.constant 0 : i32
    return %c0_i32, %c0_i32_0 : i32, i32
  }
  func.func @transform_14(%arg0: i32, %arg1: i32) -> (i32, i32) {
    %c0_i32 = arith.constant 0 : i32
    %c0_i32_0 = arith.constant 0 : i32
    %c0_i32_1 = arith.constant 0 : i32
    return %c0_i32, %c0_i32_0 : i32, i32
  }
  func.func @transform_15(%arg0: i32, %arg1: i32) -> (i32, i32) {
    %c0_i32 = arith.constant 0 : i32
    %c0_i32_0 = arith.constant 0 : i32
    %c0_i32_1 = arith.constant 0 : i32
    return %c0_i32, %c0_i32_0 : i32, i32
  }
  func.func @transform_16(%arg0: i32, %arg1: i32) -> (i32, i32) {
    %c0_i32 = arith.constant 0 : i32
    %c0_i32_0 = arith.constant 0 : i32
    %c0_i32_1 = arith.constant 0 : i32
    return %c0_i32, %c0_i32_0 : i32, i32
  }
}

</mosaic_0001>

<bundles_post_ra>
// kernel: gnn_forward.1
= control target key start
LH: loop header
LB: loop body
LE: loop exit
PB: predicated region body
PF: predicated region fallthrough
CT: control target
= control target key end

     0   :  { %s3585_s23 = smov 0   ;;  %s3587_s24 = smov 0   ;;  %s4749_s0 = inlined_call_operand.vmem [shape: s32[6,1,256], index: 0, kind: input, shape index: {}]   ;;  %s4750_s1 = inlined_call_operand.vmem [shape: f32[256,64], index: 1, kind: input, shape index: {}]   ;;  %s4751_s2 = inlined_call_operand.vmem [shape: f32[256,4], index: 2, kind: input, shape index: {}]   ;;  %s4752_s3 = inlined_call_operand.vmem [shape: bf16[64,64], index: 3, kind: input, shape index: {}]   ;;  %s4753_s4 = inlined_call_operand.vmem [shape: f32[1,64], index: 4, kind: input, shape index: {}]   ;;  %s4754_s5 = inlined_call_operand.vmem [shape: bf16[64,64], index: 5, kind: input, shape index: {}]   ;;  %s4755_s6 = inlined_call_operand.vmem [shape: f32[1,64], index: 6, kind: input, shape index: {}]   ;;  %s4756_s7 = inlined_call_operand.vmem [shape: bf16[64,64], index: 7, kind: input, shape index: {}]   ;;  %s4757_s8 = inlined_call_operand.vmem [shape: f32[1,64], index: 8, kind: input, shape index: {}]   ;;  %s4758_s9 = inlined_call_operand.vmem [shape: bf16[64,64], index: 9, kind: input, shape index: {}]   ;;  %s4759_s10 = inlined_call_operand.vmem [shape: f32[1,64], index: 10, kind: input, shape index: {}]   ;;  %s4760_s11 = inlined_call_operand.vmem [shape: bf16[64,128], index: 11, kind: input, shape index: {}]   ;;  %s4761_s12 = inlined_call_operand.vmem [shape: bf16[4,128], index: 12, kind: input, shape index: {}]   ;;  %s4762_s13 = inlined_call_operand.vmem [shape: f32[1,128], index: 13, kind: input, shape index: {}]   ;;  %s4763_s14 = inlined_call_operand.vmem [shape: f32[1,128], index: 14, kind: input, shape index: {}]   ;;  %s4764_s15 = inlined_call_operand.<no memory space> [shape: f32[1,1], index: 15, kind: input, shape index: {}]   ;;  %s4765_s16 = inlined_call_operand.vmem [shape: f32[256,1], index: 16, kind: output, shape index: {}]  }
   0x1   :  { %4767 = sst [smem:[#allocation9_spill]] %s4749_s0  ;;  %v21_v0 = vstv %s4764_s15  ;;  %s3589_s25 = smov 0  }
   0x2   :  { %22 = vst [vmem:[#allocation5] sm:$0x1] %v21_v0  ;;  %s3591_s26 = smov 0   ;;  %s3593_s27 = smov 0  }
   0x3 LB: > { %4768 = sst [smem:[#allocation6_spill]] %s3489_s26  ;;  %s37_s15 = sadd.s32 1, %s3485_s25  ;;  %s3493_s27 = sphi %s3593_s27, %s28_s27   ;;  %s3489_s26 = sphi %s3591_s26, %s4774_s26   ;;  %s3485_s25 = sphi %s3589_s25, %s4776_s25   ;;  %s3481_s24 = sphi %s3587_s24, %s4772_s24   ;;  %s3477_s23 = sphi %s3585_s23, %s4775_s23  }
   0x4   : > { %s40_s28 = sadd.s32 1, %s3489_s26  ;;  %p38_p0 = scmp.ge.s32.totalorder %s37_s15, 6 }
   0x5   : > { %p3127_p1 = scmp.ge.s32.totalorder %s3493_s27, 1  ;;  %p470_p2 = scmp.lt.s32.totalorder %s3493_s27, 19 }
   0x6   : > { %s4778_s15 = smov (%p38_p0, %s37_s15), 0  ;;  %s4780_s28 = smov (!%p38_p0, %s40_s28), %s3489_s26 }
   0x7   : > { %4769 = sst [smem:[#allocation7_spill]] %s4778_s15  ;;  %p471_p3 = pnand %p3127_p1, %p470_p2 }
   0x8   : > { %p42_p4 = scmp.ge.s32.totalorder %s4780_s28, 3  ;;  %p514_p5 = scmp.lt.s32.totalorder (!%p471_p3), %s3477_s23, 5 }
   0x9   : > { %474 = sbr.rel (%p471_p3) target bundleno = 2230 (0x8b6), region = 84  ;;  %p519_p6 = scmp.eq.s32.totalorder (!%p471_p3), %s3481_s24, 0 }
   0xa   : > { %s4782_s28 = smov (%p42_p4, %s4780_s28), 0  ;;  %p520_p7 = scmp.eq.s32.totalorder (!%p471_p3), %s3477_s23, 0 }
   0xb   : > { %4770 = sst [smem:[#allocation8_spill]] %s4782_s28 }
   0xc   : > { %p521_p8 = pnand (!%p471_p3), %p520_p7, %p519_p6  ;;  %s4771_s18 = sld [smem:[#allocation9_spill]] (!%p471_p3) }
   0xe   : > { %s515_s29 = scalar_select %p514_p5, %s3477_s23, 5 }
   0xf   : > { %524 = sbr.rel (%p521_p8) target bundleno = 53 (0x35), region = 88 }
  0x10   : > { %s3128_s30 = sshll.u32 %s515_s29, 1 }
  0x12   : > { %s3626_s19 = scalar_lea.vmem %s4771_s18, %s3128_s30 }
  0x14   : > { %v525_v1 = vld [vmem:[%s4750_s1] sm:$0xff]  ;;  %vm557_vm0 = vcmask 523264   ;;  %v526_v2 = vld [vmem:[%s4750_s1 + $0x8] sm:$0xff]  ;;  %v527_v3 = vld [vmem:[%s4750_s1 + $0x10] sm:$0xff] }
  0x15   : > { %558 = vst.msk [vmem:[#allocation2] sm:$0xff] %vm557_vm0, %v525_v1  ;;  %v528_v4 = vld [vmem:[%s4750_s1 + $0x18] sm:$0xff]  ;;  %v529_v5 = vld [vmem:[%s4750_s1 + $0x20] sm:$0xff]  ;;  %v530_v6 = vld [vmem:[%s4750_s1 + $0x28] sm:$0xff] }
  0x16   : > { %559 = vst.msk [vmem:[#allocation2 + $0x8] sm:$0xff] %vm557_vm0, %v526_v2  ;;  %v531_v7 = vld [vmem:[%s4750_s1 + $0x30] sm:$0xff]  ;;  %v532_v8 = vld [vmem:[%s4750_s1 + $0x38] sm:$0xff]  ;;  %v533_v9 = vld [vmem:[%s4750_s1 + $0x40] sm:$0xff] }
  0x17   : > { %560 = vst.msk [vmem:[#allocation2 + $0x10] sm:$0xff] %vm557_vm0, %v527_v3  ;;  %v534_v10 = vld [vmem:[%s4750_s1 + $0x48] sm:$0xff]  ;;  %v535_v11 = vld [vmem:[%s4750_s1 + $0x50] sm:$0xff]  ;;  %v536_v12 = vld [vmem:[%s4750_s1 + $0x58] sm:$0xff] }
  0x18   : > { %561 = vst.msk [vmem:[#allocation2 + $0x18] sm:$0xff] %vm557_vm0, %v528_v4  ;;  %v537_v13 = vld [vmem:[%s4750_s1 + $0x60] sm:$0xff]  ;;  %v538_v14 = vld [vmem:[%s4750_s1 + $0x68] sm:$0xff]  ;;  %v539_v15 = vld [vmem:[%s4750_s1 + $0x70] sm:$0xff] }
  0x19   : > { %562 = vst.msk [vmem:[#allocation2 + $0x20] sm:$0xff] %vm557_vm0, %v529_v5  ;;  %v540_v16 = vld [vmem:[%s4750_s1 + $0x78] sm:$0xff]  ;;  %v541_v17 = vld [vmem:[%s4750_s1 + $0x80] sm:$0xff]  ;;  %v542_v18 = vld [vmem:[%s4750_s1 + $0x88] sm:$0xff] }
  0x1a   : > { %563 = vst.msk [vmem:[#allocation2 + $0x28] sm:$0xff] %vm557_vm0, %v530_v6  ;;  %v543_v19 = vld [vmem:[%s4750_s1 + $0x90] sm:$0xff]  ;;  %v544_v20 = vld [vmem:[%s4750_s1 + $0x98] sm:$0xff]  ;;  %v545_v21 = vld [vmem:[%s4750_s1 + $0xa0] sm:$0xff] }
  0x1b   : > { %564 = vst.msk [vmem:[#allocation2 + $0x30] sm:$0xff] %vm557_vm0, %v531_v7  ;;  %v546_v22 = vld [vmem:[%s4750_s1 + $0xa8] sm:$0xff]  ;;  %v547_v23 = vld [vmem:[%s4750_s1 + $0xb0] sm:$0xff]  ;;  %v548_v24 = vld [vmem:[%s4750_s1 + $0xb8] sm:$0xff] }
  0x1c   : > { %565 = vst.msk [vmem:[#allocation2 + $0x38] sm:$0xff] %vm557_vm0, %v532_v8  ;;  %v549_v25 = vld [vmem:[%s4750_s1 + $0xc0] sm:$0xff]  ;;  %v550_v26 = vld [vmem:[%s4750_s1 + $0xc8] sm:$0xff]  ;;  %v551_v27 = vld [vmem:[%s4750_s1 + $0xd0] sm:$0xff] }
  0x1d   : > { %566 = vst.msk [vmem:[#allocation2 + $0x40] sm:$0xff] %vm557_vm0, %v533_v9  ;;  %v552_v28 = vld [vmem:[%s4750_s1 + $0xd8] sm:$0xff]  ;;  %v553_v29 = vld [vmem:[%s4750_s1 + $0xe0] sm:$0xff]  ;;  %v554_v30 = vld [vmem:[%s4750_s1 + $0xe8] sm:$0xff] }
  0x1e   : > { %567 = vst.msk [vmem:[#allocation2 + $0x48] sm:$0xff] %vm557_vm0, %v534_v10  ;;  %v555_v31 = vld [vmem:[%s4750_s1 + $0xf0] sm:$0xff]  ;;  %v556_v32 = vld [vmem:[%s4750_s1 + $0xf8] sm:$0xff] }
  0x1f   : > { %568 = vst.msk [vmem:[#allocation2 + $0x50] sm:$0xff] %vm557_vm0, %v535_v11 }
  0x20   : > { %569 = vst.msk [vmem:[#allocation2 + $0x58] sm:$0xff] %vm557_vm0, %v536_v12 }
  0x21   : > { %570 = vst.msk [vmem:[#allocation2 + $0x60] sm:$0xff] %vm557_vm0, %v537_v13 }
  0x22   : > { %571 = vst.msk [vmem:[#allocation2 + $0x68] sm:$0xff] %vm557_vm0, %v538_v14 }
  0x23   : > { %572 = vst.msk [vmem:[#allocation2 + $0x70] sm:$0xff] %vm557_vm0, %v539_v15 }
  0x24   : > { %573 = vst.msk [vmem:[#allocation2 + $0x78] sm:$0xff] %vm557_vm0, %v540_v16 }
  0x25   : > { %574 = vst.msk [vmem:[#allocation2 + $0x80] sm:$0xff] %vm557_vm0, %v541_v17 }
  0x26   : > { %575 = vst.msk [vmem:[#allocation2 + $0x88] sm:$0xff] %vm557_vm0, %v542_v18 }
  0x27   : > { %576 = vst.msk [vmem:[#allocation2 + $0x90] sm:$0xff] %vm557_vm0, %v543_v19 }
  0x28   : > { %577 = vst.msk [vmem:[#allocation2 + $0x98] sm:$0xff] %vm557_vm0, %v544_v20 }
  0x29   : > { %578 = vst.msk [vmem:[#allocation2 + $0xa0] sm:$0xff] %vm557_vm0, %v545_v21 }
  0x2a   : > { %579 = vst.msk [vmem:[#allocation2 + $0xa8] sm:$0xff] %vm557_vm0, %v546_v22 }
  0x2b   : > { %580 = vst.msk [vmem:[#allocation2 + $0xb0] sm:$0xff] %vm557_vm0, %v547_v23 }
  0x2c   : > { %581 = vst.msk [vmem:[#allocation2 + $0xb8] sm:$0xff] %vm557_vm0, %v548_v24 }
  0x2d   : > { %582 = vst.msk [vmem:[#allocation2 + $0xc0] sm:$0xff] %vm557_vm0, %v549_v25 }
  0x2e   : > { %583 = vst.msk [vmem:[#allocation2 + $0xc8] sm:$0xff] %vm557_vm0, %v550_v26 }
  0x2f   : > { %584 = vst.msk [vmem:[#allocation2 + $0xd0] sm:$0xff] %vm557_vm0, %v551_v27 }
  0x30   : > { %585 = vst.msk [vmem:[#allocation2 + $0xd8] sm:$0xff] %vm557_vm0, %v552_v28 }
  0x31   : > { %586 = vst.msk [vmem:[#allocation2 + $0xe0] sm:$0xff] %vm557_vm0, %v553_v29 }
  0x32   : > { %587 = vst.msk [vmem:[#allocation2 + $0xe8] sm:$0xff] %vm557_vm0, %v554_v30 }
  0x33   : > { %588 = vst.msk [vmem:[#allocation2 + $0xf0] sm:$0xff] %vm557_vm0, %v555_v31 }
  0x34   : > { %589 = vst.msk [vmem:[#allocation2 + $0xf8] sm:$0xff] %vm557_vm0, %v556_v32 }
  0x35 PF: > { %p3129_p9 = scmp.ne.s32.totalorder %s3477_s23, 0 }
  0x37   : > { %592 = sbr.rel (%p3129_p9) target bundleno = 126 (0x7e), region = 92 }
  0x3c   : > { %v593_v33 = vld [vmem:[#allocation2] sm:$0xff]  ;;  %vm657_vm1 = vcmask 519168   ;;  %v594_v34 = vld [vmem:[#allocation2 + $0x8] sm:$0xff]  ;;  %v595_v35 = vld [vmem:[#allocation2 + $0x10] sm:$0xff]  ;;  %vm690_vm2 = vcmask 523264  }
  0x3d   : > { %v625_v36 = vpack.c.bf16 %v593_v33, %v593_v33  ;;  %v626_v37 = vpack.c.bf16 %v594_v34, %v594_v34  ;;  %v627_v38 = vpack.c.bf16 %v595_v35, %v595_v35  ;;  %v596_v39 = vld [vmem:[#allocation2 + $0x18] sm:$0xff]  ;;  %v597_v40 = vld [vmem:[#allocation2 + $0x20] sm:$0xff]  ;;  %v598_v41 = vld [vmem:[#allocation2 + $0x28] sm:$0xff]  ;;  %v3495_v33 = vmov 0.0  }
  0x3e   : > { %v628_v42 = vpack.c.bf16 %v596_v39, %v596_v39  ;;  %v599_v43 = vld [vmem:[#allocation2 + $0x30] sm:$0xff]  ;;  %v629_v44 = vpack.c.bf16 %v597_v40, %v597_v40  ;;  %v600_v45 = vld [vmem:[#allocation2 + $0x38] sm:$0xff]  ;;  %v630_v46 = vpack.c.bf16 %v598_v41, %v598_v41  ;;  %v601_v47 = vld [vmem:[#allocation2 + $0x40] sm:$0xff]  ;;  %691 = vst.msk [vmem:[#allocation4] sm:$0xff] %vm690_vm2, %v3495_v33 }
  0x3f   : > { %658 = vst.msk [vmem:[#allocation3] sm:$0xf] %vm657_vm1, %v625_v36  ;;  %v631_v48 = vpack.c.bf16 %v599_v43, %v599_v43  ;;  %v602_v49 = vld [vmem:[#allocation2 + $0x48] sm:$0xff]  ;;  %v632_v50 = vpack.c.bf16 %v600_v45, %v600_v45  ;;  %v603_v51 = vld [vmem:[#allocation2 + $0x50] sm:$0xff]  ;;  %v633_v52 = vpack.c.bf16 %v601_v47, %v601_v47  ;;  %v604_v53 = vld [vmem:[#allocation2 + $0x58] sm:$0xff] }
  0x40   : > { %659 = vst.msk [vmem:[#allocation3 + $0x4] sm:$0xf] %vm657_vm1, %v626_v37  ;;  %v634_v54 = vpack.c.bf16 %v602_v49, %v602_v49  ;;  %v605_v55 = vld [vmem:[#allocation2 + $0x60] sm:$0xff]  ;;  %v635_v56 = vpack.c.bf16 %v603_v51, %v603_v51  ;;  %v606_v57 = vld [vmem:[#allocation2 + $0x68] sm:$0xff]  ;;  %v636_v58 = vpack.c.bf16 %v604_v53, %v604_v53  ;;  %v607_v59 = vld [vmem:[#allocation2 + $0x70] sm:$0xff] }
  0x41   : > { %660 = vst.msk [vmem:[#allocation3 + $0x8] sm:$0xf] %vm657_vm1, %v627_v38  ;;  %v637_v60 = vpack.c.bf16 %v605_v55, %v605_v55  ;;  %v608_v61 = vld [vmem:[#allocation2 + $0x78] sm:$0xff]  ;;  %v638_v62 = vpack.c.bf16 %v606_v57, %v606_v57  ;;  %v609_v63 = vld [vmem:[#allocation2 + $0x80] sm:$0xff]  ;;  %v639_v0 = vpack.c.bf16 %v607_v59, %v607_v59  ;;  %v610_v1 = vld [vmem:[#allocation2 + $0x88] sm:$0xff] }
  0x42   : > { %661 = vst.msk [vmem:[#allocation3 + $0xc] sm:$0xf] %vm657_vm1, %v628_v42  ;;  %v640_v2 = vpack.c.bf16 %v608_v61, %v608_v61  ;;  %v611_v3 = vld [vmem:[#allocation2 + $0x90] sm:$0xff]  ;;  %v641_v4 = vpack.c.bf16 %v609_v63, %v609_v63  ;;  %v612_v5 = vld [vmem:[#allocation2 + $0x98] sm:$0xff]  ;;  %v642_v6 = vpack.c.bf16 %v610_v1, %v610_v1  ;;  %v613_v7 = vld [vmem:[#allocation2 + $0xa0] sm:$0xff] }
  0x43   : > { %662 = vst.msk [vmem:[#allocation3 + $0x10] sm:$0xf] %vm657_vm1, %v629_v44  ;;  %v643_v8 = vpack.c.bf16 %v611_v3, %v611_v3  ;;  %v614_v9 = vld [vmem:[#allocation2 + $0xa8] sm:$0xff]  ;;  %v644_v10 = vpack.c.bf16 %v612_v5, %v612_v5  ;;  %v615_v11 = vld [vmem:[#allocation2 + $0xb0] sm:$0xff]  ;;  %v645_v12 = vpack.c.bf16 %v613_v7, %v613_v7  ;;  %v616_v13 = vld [vmem:[#allocation2 + $0xb8] sm:$0xff] }
  0x44   : > { %663 = vst.msk [vmem:[#allocation3 + $0x14] sm:$0xf] %vm657_vm1, %v630_v46  ;;  %v646_v14 = vpack.c.bf16 %v614_v9, %v614_v9  ;;  %v617_v15 = vld [vmem:[#allocation2 + $0xc0] sm:$0xff]  ;;  %v647_v16 = vpack.c.bf16 %v615_v11, %v615_v11  ;;  %v618_v17 = vld [vmem:[#allocation2 + $0xc8] sm:$0xff]  ;;  %v648_v18 = vpack.c.bf16 %v616_v13, %v616_v13  ;;  %v619_v19 = vld [vmem:[#allocation2 + $0xd0] sm:$0xff] }
  0x45   : > { %664 = vst.msk [vmem:[#allocation3 + $0x18] sm:$0xf] %vm657_vm1, %v631_v48  ;;  %v649_v20 = vpack.c.bf16 %v617_v15, %v617_v15  ;;  %v620_v21 = vld [vmem:[#allocation2 + $0xd8] sm:$0xff]  ;;  %v650_v22 = vpack.c.bf16 %v618_v17, %v618_v17  ;;  %v621_v23 = vld [vmem:[#allocation2 + $0xe0] sm:$0xff]  ;;  %v651_v24 = vpack.c.bf16 %v619_v19, %v619_v19  ;;  %v622_v25 = vld [vmem:[#allocation2 + $0xe8] sm:$0xff] }
  0x46   : > { %665 = vst.msk [vmem:[#allocation3 + $0x1c] sm:$0xf] %vm657_vm1, %v632_v50  ;;  %v652_v26 = vpack.c.bf16 %v620_v21, %v620_v21  ;;  %v623_v27 = vld [vmem:[#allocation2 + $0xf0] sm:$0xff]  ;;  %v653_v28 = vpack.c.bf16 %v621_v23, %v621_v23  ;;  %v624_v29 = vld [vmem:[#allocation2 + $0xf8] sm:$0xff]  ;;  %v654_v30 = vpack.c.bf16 %v622_v25, %v622_v25 }
  0x47   : > { %666 = vst.msk [vmem:[#allocation3 + $0x20] sm:$0xf] %vm657_vm1, %v633_v52  ;;  %v655_v31 = vpack.c.bf16 %v623_v27, %v623_v27  ;;  %v656_v32 = vpack.c.bf16 %v624_v29, %v624_v29 }
  0x48   : > { %667 = vst.msk [vmem:[#allocation3 + $0x24] sm:$0xf] %vm657_vm1, %v634_v54 }
  0x49   : > { %668 = vst.msk [vmem:[#allocation3 + $0x28] sm:$0xf] %vm657_vm1, %v635_v56 }
  0x4a   : > { %669 = vst.msk [vmem:[#allocation3 + $0x2c] sm:$0xf] %vm657_vm1, %v636_v58 }
  0x4b   : > { %670 = vst.msk [vmem:[#allocation3 + $0x30] sm:$0xf] %vm657_vm1, %v637_v60 }
  0x4c   : > { %671 = vst.msk [vmem:[#allocation3 + $0x34] sm:$0xf] %vm657_vm1, %v638_v62 }
  0x4d   : > { %672 = vst.msk [vmem:[#allocation3 + $0x38] sm:$0xf] %vm657_vm1, %v639_v0 }
  0x4e   : > { %673 = vst.msk [vmem:[#allocation3 + $0x3c] sm:$0xf] %vm657_vm1, %v640_v2 }
  0x4f   : > { %674 = vst.msk [vmem:[#allocation3 + $0x40] sm:$0xf] %vm657_vm1, %v641_v4 }
  0x50   : > { %675 = vst.msk [vmem:[#allocation3 + $0x44] sm:$0xf] %vm657_vm1, %v642_v6 }
  0x51   : > { %676 = vst.msk [vmem:[#allocation3 + $0x48] sm:$0xf] %vm657_vm1, %v643_v8 }
  0x52   : > { %677 = vst.msk [vmem:[#allocation3 + $0x4c] sm:$0xf] %vm657_vm1, %v644_v10 }
  0x53   : > { %678 = vst.msk [vmem:[#allocation3 + $0x50] sm:$0xf] %vm657_vm1, %v645_v12 }
  0x54   : > { %679 = vst.msk [vmem:[#allocation3 + $0x54] sm:$0xf] %vm657_vm1, %v646_v14 }
  0x55   : > { %680 = vst.msk [vmem:[#allocation3 + $0x58] sm:$0xf] %vm657_vm1, %v647_v16 }
  0x56   : > { %681 = vst.msk [vmem:[#allocation3 + $0x5c] sm:$0xf] %vm657_vm1, %v648_v18 }
  0x57   : > { %682 = vst.msk [vmem:[#allocation3 + $0x60] sm:$0xf] %vm657_vm1, %v649_v20 }
  0x58   : > { %683 = vst.msk [vmem:[#allocation3 + $0x64] sm:$0xf] %vm657_vm1, %v650_v22 }
  0x59   : > { %684 = vst.msk [vmem:[#allocation3 + $0x68] sm:$0xf] %vm657_vm1, %v651_v24 }
  0x5a   : > { %685 = vst.msk [vmem:[#allocation3 + $0x6c] sm:$0xf] %vm657_vm1, %v652_v26 }
  0x5b   : > { %686 = vst.msk [vmem:[#allocation3 + $0x70] sm:$0xf] %vm657_vm1, %v653_v28 }
  0x5c   : > { %687 = vst.msk [vmem:[#allocation3 + $0x74] sm:$0xf] %vm657_vm1, %v654_v30 }
  0x5d   : > { %688 = vst.msk [vmem:[#allocation3 + $0x78] sm:$0xf] %vm657_vm1, %v655_v31 }
  0x5e   : > { %689 = vst.msk [vmem:[#allocation3 + $0x7c] sm:$0xf] %vm657_vm1, %v656_v32 }
  0x5f   : > { %692 = vst.msk [vmem:[#allocation4 + $0x8] sm:$0xff] %vm690_vm2, %v3495_v33 }
  0x60   : > { %693 = vst.msk [vmem:[#allocation4 + $0x10] sm:$0xff] %vm690_vm2, %v3495_v33 }
  0x61   : > { %694 = vst.msk [vmem:[#allocation4 + $0x18] sm:$0xff] %vm690_vm2, %v3495_v33 }
  0x62   : > { %695 = vst.msk [vmem:[#allocation4 + $0x20] sm:$0xff] %vm690_vm2, %v3495_v33 }
  0x63   : > { %696 = vst.msk [vmem:[#allocation4 + $0x28] sm:$0xff] %vm690_vm2, %v3495_v33 }
  0x64   : > { %697 = vst.msk [vmem:[#allocation4 + $0x30] sm:$0xff] %vm690_vm2, %v3495_v33 }
  0x65   : > { %698 = vst.msk [vmem:[#allocation4 + $0x38] sm:$0xff] %vm690_vm2, %v3495_v33 }
  0x66   : > { %699 = vst.msk [vmem:[#allocation4 + $0x40] sm:$0xff] %vm690_vm2, %v3495_v33 }
  0x67   : > { %700 = vst.msk [vmem:[#allocation4 + $0x48] sm:$0xff] %vm690_vm2, %v3495_v33 }
  0x68   : > { %701 = vst.msk [vmem:[#allocation4 + $0x50] sm:$0xff] %vm690_vm2, %v3495_v33 }
  0x69   : > { %702 = vst.msk [vmem:[#allocation4 + $0x58] sm:$0xff] %vm690_vm2, %v3495_v33 }
  0x6a   : > { %703 = vst.msk [vmem:[#allocation4 + $0x60] sm:$0xff] %vm690_vm2, %v3495_v33 }
  0x6b   : > { %704 = vst.msk [vmem:[#allocation4 + $0x68] sm:$0xff] %vm690_vm2, %v3495_v33 }
  0x6c   : > { %705 = vst.msk [vmem:[#allocation4 + $0x70] sm:$0xff] %vm690_vm2, %v3495_v33 }
  0x6d   : > { %706 = vst.msk [vmem:[#allocation4 + $0x78] sm:$0xff] %vm690_vm2, %v3495_v33 }
  0x6e   : > { %707 = vst.msk [vmem:[#allocation4 + $0x80] sm:$0xff] %vm690_vm2, %v3495_v33 }
  0x6f   : > { %708 = vst.msk [vmem:[#allocation4 + $0x88] sm:$0xff] %vm690_vm2, %v3495_v33 }
  0x70   : > { %709 = vst.msk [vmem:[#allocation4 + $0x90] sm:$0xff] %vm690_vm2, %v3495_v33 }
  0x71   : > { %710 = vst.msk [vmem:[#allocation4 + $0x98] sm:$0xff] %vm690_vm2, %v3495_v33 }
  0x72   : > { %711 = vst.msk [vmem:[#allocation4 + $0xa0] sm:$0xff] %vm690_vm2, %v3495_v33 }
  0x73   : > { %712 = vst.msk [vmem:[#allocation4 + $0xa8] sm:$0xff] %vm690_vm2, %v3495_v33 }
  0x74   : > { %713 = vst.msk [vmem:[#allocation4 + $0xb0] sm:$0xff] %vm690_vm2, %v3495_v33 }
  0x75   : > { %714 = vst.msk [vmem:[#allocation4 + $0xb8] sm:$0xff] %vm690_vm2, %v3495_v33 }
  0x76   : > { %715 = vst.msk [vmem:[#allocation4 + $0xc0] sm:$0xff] %vm690_vm2, %v3495_v33 }
  0x77   : > { %716 = vst.msk [vmem:[#allocation4 + $0xc8] sm:$0xff] %vm690_vm2, %v3495_v33 }
  0x78   : > { %717 = vst.msk [vmem:[#allocation4 + $0xd0] sm:$0xff] %vm690_vm2, %v3495_v33 }
  0x79   : > { %718 = vst.msk [vmem:[#allocation4 + $0xd8] sm:$0xff] %vm690_vm2, %v3495_v33 }
  0x7a   : > { %719 = vst.msk [vmem:[#allocation4 + $0xe0] sm:$0xff] %vm690_vm2, %v3495_v33 }
  0x7b   : > { %720 = vst.msk [vmem:[#allocation4 + $0xe8] sm:$0xff] %vm690_vm2, %v3495_v33 }
  0x7c   : > { %721 = vst.msk [vmem:[#allocation4 + $0xf0] sm:$0xff] %vm690_vm2, %v3495_v33 }
  0x7d   : > { %722 = vst.msk [vmem:[#allocation4 + $0xf8] sm:$0xff] %vm690_vm2, %v3495_v33 }
  0x7e PF: > { %v723_v34 = vld [vmem:[%s3626_s19] sm:$0x3]  ;;  %v724_v35 = vlaneseq  ;;  %v3496_v42 = vmov 0.0   ;;  %p1893_p10 = scmp.eq.s32.totalorder %s3477_s23, 5  ;;  %p3242_p11 = scmp.ne.s32.totalorder %s3477_s23, 5 }
  0x7f   : > { %v3822_v36 = vperm.slane %v723_v34, 0  ;;  %v3824_v37 = vperm.slane %v723_v34, 1 }
  0x80   : > { %v3826_v38 = vshrl.u32 %v724_v35, 7 }
  0x82   : > { %v741_v39 = vadd.s32 128, %v3826_v38  ;;  %v742_v40 = vadd.s32 136, %v3826_v38  ;;  %v726_v41 = vadd.s32 8, %v3826_v38  ;;  %vm759_vm3 = vcmp.eq.s32.totalorder %v3826_v38, %v3822_v36 }
  0x83   : > { %vm760_vm4 = vcmp.eq.s32.totalorder %v3826_v38, %v3824_v37  ;;  %v823_v43 = vsel %vm759_vm3, 1.0, %v3496_v42  ;;  %v743_v44 = vadd.s32 144, %v3826_v38  ;;  %v744_v45 = vadd.s32 152, %v3826_v38 }
  0x84   : > { %vm791_vm5 = vcmp.eq.s32.totalorder %v741_v39, %v3822_v36  ;;  %vm792_vm6 = vcmp.eq.s32.totalorder %v741_v39, %v3824_v37  ;;  %vm793_vm7 = vcmp.eq.s32.totalorder %v742_v40, %v3822_v36  ;;  %vm794_vm8 = vcmp.eq.s32.totalorder %v742_v40, %v3824_v37 }
  0x85   : > { %v855_v46 = vsel %vm791_vm5, 1.0, %v3496_v42  ;;  %v856_v47 = vsel %vm792_vm6, 1.0, %v3496_v42  ;;  %v857_v48 = vsel %vm793_vm7, 1.0, %v3496_v42  ;;  %v858_v49 = vsel %vm794_vm8, 1.0, %v3496_v42 }
  0x86   : > { %v903_v50 = vpack.c.bf16 %v856_v47, %v855_v46  ;;  %v904_v51 = vpack.c.bf16 %v858_v49, %v857_v48  ;;  %vm761_vm9 = vcmp.eq.s32.totalorder %v726_v41, %v3822_v36  ;;  %vm762_vm10 = vcmp.eq.s32.totalorder %v726_v41, %v3824_v37 }
  0x87   : > { %v824_v52 = vsel %vm760_vm4, 1.0, %v3496_v42  ;;  %v825_v53 = vsel %vm761_vm9, 1.0, %v3496_v42  ;;  %v826_v54 = vsel %vm762_vm10, 1.0, %v3496_v42  ;;  %vm795_vm11 = vcmp.eq.s32.totalorder %v743_v44, %v3822_v36 }
  0x88   : > { %v1015_v55 = vunpack.c.l.b16 %v903_v50  ;;  %v1016_v56 = vunpack.c.h.b16 %v903_v50  ;;  %v1017_v57 = vunpack.c.l.b16 %v904_v51  ;;  %v1018_v58 = vunpack.c.h.b16 %v904_v51 }
  0x89   : > { %v887_v59 = vpack.c.bf16 %v824_v52, %v823_v43  ;;  %v888_v60 = vpack.c.bf16 %v826_v54, %v825_v53  ;;  %vm796_vm12 = vcmp.eq.s32.totalorder %v743_v44, %v3824_v37  ;;  %vm797_vm13 = vcmp.eq.s32.totalorder %v744_v45, %v3822_v36 }
  0x8a   : > { %v3857_v61 = vpack.c.b16 %v1017_v57, %v1015_v55  ;;  %v1064_v62 = vpack.c.b16 %v1018_v58, %v1016_v56  ;;  %vm798_vm14 = vcmp.eq.s32.totalorder %v744_v45, %v3824_v37  ;;  %v859_v63 = vsel %vm795_vm11, 1.0, %v3496_v42 }
  0x8b   : > { %v983_v0 = vunpack.c.l.b16 %v887_v59  ;;  %v984_v1 = vunpack.c.h.b16 %v887_v59  ;;  %v985_v2 = vunpack.c.l.b16 %v888_v60  ;;  %v986_v3 = vunpack.c.h.b16 %v888_v60 }
  0x8c   : > { %1135 = vxpose.binary.xlu1.c.b16.start [1/16] %v1064_v62, %v3857_v61, 128  ;;  %v860_v4 = vsel %vm796_vm12, 1.0, %v3496_v42  ;;  %v861_v5 = vsel %vm797_vm13, 1.0, %v3496_v42  ;;  %v862_v6 = vsel %vm798_vm14, 1.0, %v3496_v42  ;;  %v727_v7 = vadd.s32 16, %v3826_v38 }
  0x8d   : > { %v3866_v8 = vpack.c.b16 %v985_v2, %v983_v0  ;;  %v1048_v9 = vpack.c.b16 %v986_v3, %v984_v1  ;;  %v728_v10 = vadd.s32 24, %v3826_v38  ;;  %v905_v11 = vpack.c.bf16 %v860_v4, %v859_v63 }
  0x8e   : > { %vm763_vm15 = vcmp.eq.s32.totalorder %v727_v7, %v3822_v36  ;;  %vm764_vm0 = vcmp.eq.s32.totalorder %v727_v7, %v3824_v37  ;;  %v906_v12 = vpack.c.bf16 %v862_v6, %v861_v5  ;;  %v745_v19 = vadd.s32 160, %v3826_v38 }
  0x8f   : > { %1111 = vxpose.binary.xlu0.c.b16.start [1/16] %v1048_v9, %v3866_v8, 128  ;;  %vm765_vm1 = vcmp.eq.s32.totalorder %v728_v10, %v3822_v36  ;;  %vm766_vm2 = vcmp.eq.s32.totalorder %v728_v10, %v3824_v37  ;;  %v827_v13 = vsel %vm763_vm15, 1.0, %v3496_v42  ;;  %v828_v14 = vsel %vm764_vm0, 1.0, %v3496_v42 }
  0x90   : > { %v829_v15 = vsel %vm765_vm1, 1.0, %v3496_v42  ;;  %v830_v16 = vsel %vm766_vm2, 1.0, %v3496_v42  ;;  %v889_v17 = vpack.c.bf16 %v828_v14, %v827_v13  ;;  %v1019_v20 = vunpack.c.l.b16 %v905_v11 }
  0x91   : > { %v890_v18 = vpack.c.bf16 %v830_v16, %v829_v15  ;;  %v1020_v21 = vunpack.c.h.b16 %v905_v11  ;;  %v1021_v22 = vunpack.c.l.b16 %v906_v12  ;;  %v1022_v23 = vunpack.c.h.b16 %v906_v12 }
  0x92   : > { %v746_v24 = vadd.s32 168, %v3826_v38  ;;  %v987_v25 = vunpack.c.l.b16 %v889_v17  ;;  %v988_v26 = vunpack.c.h.b16 %v889_v17  ;;  %vm799_vm3 = vcmp.eq.s32.totalorder %v745_v19, %v3822_v36 }
  0x93   : > { %v989_v27 = vunpack.c.l.b16 %v890_v18  ;;  %v990_v28 = vunpack.c.h.b16 %v890_v18  ;;  %v3880_v29 = vpack.c.b16 %v1021_v22, %v1019_v20  ;;  %v1066_v30 = vpack.c.b16 %v1022_v23, %v1020_v21 }
  0x94   : > { %vm800_vm4 = vcmp.eq.s32.totalorder %v745_v19, %v3824_v37  ;;  %vm801_vm5 = vcmp.eq.s32.totalorder %v746_v24, %v3822_v36  ;;  %vm802_vm6 = vcmp.eq.s32.totalorder %v746_v24, %v3824_v37  ;;  %v729_v31 = vadd.s32 32, %v3826_v38 }
  0x95   : > { %v730_v32 = vadd.s32 40, %v3826_v38  ;;  %v3888_v33 = vpack.c.b16 %v989_v27, %v987_v25  ;;  %v1050_v34 = vpack.c.b16 %v990_v28, %v988_v26  ;;  %v863_v35 = vsel %vm799_vm3, 1.0, %v3496_v42 }
  0x96   : > { %v864_v39 = vsel %vm800_vm4, 1.0, %v3496_v42  ;;  %v865_v40 = vsel %vm801_vm5, 1.0, %v3496_v42  ;;  %v866_v41 = vsel %vm802_vm6, 1.0, %v3496_v42  ;;  %vm767_vm7 = vcmp.eq.s32.totalorder %v729_v31, %v3822_v36 }
  0x97   : > { %vm768_vm8 = vcmp.eq.s32.totalorder %v729_v31, %v3824_v37  ;;  %vm769_vm9 = vcmp.eq.s32.totalorder %v730_v32, %v3822_v36  ;;  %vm770_vm10 = vcmp.eq.s32.totalorder %v730_v32, %v3824_v37  ;;  %v907_v43 = vpack.c.bf16 %v864_v39, %v863_v35 }
  0x98   : > { %v908_v44 = vpack.c.bf16 %v866_v41, %v865_v40  ;;  %v831_v45 = vsel %vm767_vm7, 1.0, %v3496_v42  ;;  %v832_v46 = vsel %vm768_vm8, 1.0, %v3496_v42  ;;  %v833_v47 = vsel %vm769_vm9, 1.0, %v3496_v42 }
  0x99   : > { %v834_v48 = vsel %vm770_vm10, 1.0, %v3496_v42  ;;  %v1023_v49 = vunpack.c.l.b16 %v907_v43  ;;  %v891_v50 = vpack.c.bf16 %v832_v46, %v831_v45  ;;  %v1024_v52 = vunpack.c.h.b16 %v907_v43 }
  0x9a   : > { %v892_v51 = vpack.c.bf16 %v834_v48, %v833_v47  ;;  %v1025_v53 = vunpack.c.l.b16 %v908_v44  ;;  %v1026_v54 = vunpack.c.h.b16 %v908_v44  ;;  %v747_v55 = vadd.s32 176, %v3826_v38 }
  0x9b   : > { %v748_v56 = vadd.s32 184, %v3826_v38  ;;  %v991_v57 = vunpack.c.l.b16 %v891_v50  ;;  %v992_v58 = vunpack.c.h.b16 %v891_v50  ;;  %v731_v0 = vadd.s32 48, %v3826_v38 }
  0x9c   : > { %1136 = vxpose.binary.xlu1.c.b16.cont [2/16] %v1066_v30, %v3880_v29, 128  ;;  %v993_v59 = vunpack.c.l.b16 %v892_v51  ;;  %v994_v60 = vunpack.c.h.b16 %v892_v51  ;;  %v3906_v62 = vpack.c.b16 %v1025_v53, %v1023_v49  ;;  %v1068_v63 = vpack.c.b16 %v1026_v54, %v1024_v52 }
  0x9d   : > { %vm803_vm11 = vcmp.eq.s32.totalorder %v747_v55, %v3822_v36  ;;  %vm804_vm12 = vcmp.eq.s32.totalorder %v747_v55, %v3824_v37  ;;  %vm805_vm13 = vcmp.eq.s32.totalorder %v748_v56, %v3822_v36  ;;  %vm806_vm14 = vcmp.eq.s32.totalorder %v748_v56, %v3824_v37 }
  0x9e   : > { %v732_v1 = vadd.s32 56, %v3826_v38  ;;  %v3914_v2 = vpack.c.b16 %v993_v59, %v991_v57  ;;  %v1052_v3 = vpack.c.b16 %v994_v60, %v992_v58  ;;  %v867_v4 = vsel %vm803_vm11, 1.0, %v3496_v42 }
  0x9f   : > { %1112 = vxpose.binary.xlu0.c.b16.cont [2/16] %v1050_v34, %v3888_v33, 128  ;;  %v868_v5 = vsel %vm804_vm12, 1.0, %v3496_v42  ;;  %v869_v6 = vsel %vm805_vm13, 1.0, %v3496_v42  ;;  %v870_v7 = vsel %vm806_vm14, 1.0, %v3496_v42  ;;  %vm771_vm15 = vcmp.eq.s32.totalorder %v731_v0, %v3822_v36 }
  0xa0   : > { %vm772_vm0 = vcmp.eq.s32.totalorder %v731_v0, %v3824_v37  ;;  %vm773_vm1 = vcmp.eq.s32.totalorder %v732_v1, %v3822_v36  ;;  %vm774_vm2 = vcmp.eq.s32.totalorder %v732_v1, %v3824_v37  ;;  %v909_v9 = vpack.c.bf16 %v868_v5, %v867_v4 }
  0xa1   : > { %v910_v10 = vpack.c.bf16 %v870_v7, %v869_v6  ;;  %v835_v11 = vsel %vm771_vm15, 1.0, %v3496_v42  ;;  %v836_v12 = vsel %vm772_vm0, 1.0, %v3496_v42  ;;  %v837_v13 = vsel %vm773_vm1, 1.0, %v3496_v42 }
  0xa2   : > { %v838_v14 = vsel %vm774_vm2, 1.0, %v3496_v42  ;;  %v893_v15 = vpack.c.bf16 %v836_v12, %v835_v11  ;;  %v749_v17 = vadd.s32 192, %v3826_v38  ;;  %v1027_v18 = vunpack.c.l.b16 %v909_v9 }
  0xa3   : > { %v894_v16 = vpack.c.bf16 %v838_v14, %v837_v13  ;;  %v1028_v19 = vunpack.c.h.b16 %v909_v9  ;;  %v1029_v20 = vunpack.c.l.b16 %v910_v10  ;;  %v1030_v21 = vunpack.c.h.b16 %v910_v10 }
  0xa4   : > { %v750_v22 = vadd.s32 200, %v3826_v38  ;;  %v995_v23 = vunpack.c.l.b16 %v893_v15  ;;  %v996_v24 = vunpack.c.h.b16 %v893_v15  ;;  %vm807_vm3 = vcmp.eq.s32.totalorder %v749_v17, %v3822_v36 }
  0xa5   : > { %v997_v25 = vunpack.c.l.b16 %v894_v16  ;;  %v998_v26 = vunpack.c.h.b16 %v894_v16  ;;  %v3932_v27 = vpack.c.b16 %v1029_v20, %v1027_v18  ;;  %v1070_v28 = vpack.c.b16 %v1030_v21, %v1028_v19 }
  0xa6   : > { %vm808_vm4 = vcmp.eq.s32.totalorder %v749_v17, %v3824_v37  ;;  %vm809_vm5 = vcmp.eq.s32.totalorder %v750_v22, %v3822_v36  ;;  %vm810_vm6 = vcmp.eq.s32.totalorder %v750_v22, %v3824_v37  ;;  %v733_v30 = vadd.s32 64, %v3826_v38 }
  0xa7   : > { %v734_v31 = vadd.s32 72, %v3826_v38  ;;  %v3940_v32 = vpack.c.b16 %v997_v25, %v995_v23  ;;  %v1054_v34 = vpack.c.b16 %v998_v26, %v996_v24  ;;  %v871_v35 = vsel %vm807_vm3, 1.0, %v3496_v42 }
  0xa8   : > { %v872_v39 = vsel %vm808_vm4, 1.0, %v3496_v42  ;;  %v873_v40 = vsel %vm809_vm5, 1.0, %v3496_v42  ;;  %v874_v41 = vsel %vm810_vm6, 1.0, %v3496_v42  ;;  %vm775_vm7 = vcmp.eq.s32.totalorder %v733_v30, %v3822_v36 }
  0xa9   : > { %vm776_vm8 = vcmp.eq.s32.totalorder %v733_v30, %v3824_v37  ;;  %vm777_vm9 = vcmp.eq.s32.totalorder %v734_v31, %v3822_v36  ;;  %vm778_vm10 = vcmp.eq.s32.totalorder %v734_v31, %v3824_v37  ;;  %v911_v43 = vpack.c.bf16 %v872_v39, %v871_v35 }
  0xaa   : > { %v912_v44 = vpack.c.bf16 %v874_v41, %v873_v40  ;;  %v839_v45 = vsel %vm775_vm7, 1.0, %v3496_v42  ;;  %v840_v46 = vsel %vm776_vm8, 1.0, %v3496_v42  ;;  %v841_v47 = vsel %vm777_vm9, 1.0, %v3496_v42 }
  0xab   : > { %v842_v48 = vsel %vm778_vm10, 1.0, %v3496_v42  ;;  %v1031_v49 = vunpack.c.l.b16 %v911_v43  ;;  %v895_v50 = vpack.c.bf16 %v840_v46, %v839_v45  ;;  %v1032_v52 = vunpack.c.h.b16 %v911_v43 }
  0xac   : > { %1137 = vxpose.binary.xlu1.c.b16.cont [3/16] %v1068_v63, %v3906_v62, 128  ;;  %v896_v51 = vpack.c.bf16 %v842_v48, %v841_v47  ;;  %v1033_v53 = vunpack.c.l.b16 %v912_v44  ;;  %v1034_v54 = vunpack.c.h.b16 %v912_v44  ;;  %v751_v55 = vadd.s32 208, %v3826_v38 }
  0xad   : > { %v752_v56 = vadd.s32 216, %v3826_v38  ;;  %v999_v57 = vunpack.c.l.b16 %v895_v50  ;;  %v1000_v58 = vunpack.c.h.b16 %v895_v50  ;;  %v735_v1 = vadd.s32 80, %v3826_v38  ;;  %v3372_v50 = vld [vmem:[#allocation3 + $0x78] sm:$0xff] }
  0xae   : > { %v1001_v59 = vunpack.c.l.b16 %v896_v51  ;;  %v1002_v60 = vunpack.c.h.b16 %v896_v51  ;;  %v3958_v63 = vpack.c.b16 %v1033_v53, %v1031_v49  ;;  %v1072_v0 = vpack.c.b16 %v1034_v54, %v1032_v52  ;;  %v3364_v49 = vld [vmem:[#allocation3 + $0x38] sm:$0xff]  ;;  %1344 = vmatpush.bf16.msra.mxu1 %v3372_v50 }
  0xaf   : > { %1113 = vxpose.binary.xlu0.c.b16.cont [3/16] %v1052_v3, %v3914_v2, 128  ;;  %vm811_vm11 = vcmp.eq.s32.totalorder %v751_v55, %v3822_v36  ;;  %vm812_vm12 = vcmp.eq.s32.totalorder %v751_v55, %v3824_v37  ;;  %vm813_vm13 = vcmp.eq.s32.totalorder %v752_v56, %v3822_v36  ;;  %v736_v3 = vadd.s32 88, %v3826_v38  ;;  %v3363_v55 = vld [vmem:[#allocation3 + $0x30] sm:$0xff] }
  0xb0   : > { %vm814_vm14 = vcmp.eq.s32.totalorder %v752_v56, %v3824_v37  ;;  %v3966_v4 = vpack.c.b16 %v1001_v59, %v999_v57  ;;  %v1056_v5 = vpack.c.b16 %v1002_v60, %v1000_v58  ;;  %v875_v6 = vsel %vm811_vm11, 1.0, %v3496_v42  ;;  %1255 = vmatpush.bf16.msra.mxu0 %v3364_v49  ;;  %v3371_v56 = vld [vmem:[#allocation3 + $0x70] sm:$0xff]  ;;  %v3366_v49 = vld [vmem:[#allocation3 + $0x48] sm:$0xff] }
  0xb1   : > { %v876_v7 = vsel %vm812_vm12, 1.0, %v3496_v42  ;;  %v877_v9 = vsel %vm813_vm13, 1.0, %v3496_v42  ;;  %v878_v10 = vsel %vm814_vm14, 1.0, %v3496_v42  ;;  %vm779_vm15 = vcmp.eq.s32.totalorder %v735_v1, %v3822_v36 }
  0xb2   : > { %vm780_vm0 = vcmp.eq.s32.totalorder %v735_v1, %v3824_v37  ;;  %vm781_vm1 = vcmp.eq.s32.totalorder %v736_v3, %v3822_v36  ;;  %vm782_vm2 = vcmp.eq.s32.totalorder %v736_v3, %v3824_v37  ;;  %v913_v11 = vpack.c.bf16 %v876_v7, %v875_v6  ;;  %1345 = vmatpush.bf16.msra.mxu1 %v3371_v56  ;;  %v3362_v6 = vld [vmem:[#allocation3 + $0x28] sm:$0xff]  ;;  %v3365_v56 = vld [vmem:[#allocation3 + $0x40] sm:$0xff] }
  0xb3   : > { %v914_v12 = vpack.c.bf16 %v878_v10, %v877_v9  ;;  %v843_v13 = vsel %vm779_vm15, 1.0, %v3496_v42  ;;  %v844_v14 = vsel %vm780_vm0, 1.0, %v3496_v42  ;;  %v845_v15 = vsel %vm781_vm1, 1.0, %v3496_v42  ;;  %v3370_v7 = vld [vmem:[#allocation3 + $0x68] sm:$0xff] }
  0xb4   : > { %v846_v16 = vsel %vm782_vm2, 1.0, %v3496_v42  ;;  %v1035_v17 = vunpack.c.l.b16 %v913_v11  ;;  %v897_v18 = vpack.c.bf16 %v844_v14, %v843_v13  ;;  %v1036_v20 = vunpack.c.h.b16 %v913_v11  ;;  %1256 = vmatpush.bf16.msra.mxu0 %v3363_v55  ;;  %v3357_v55 = vld [vmem:[#allocation3] sm:$0xff] }
  0xb5   : > { %v898_v19 = vpack.c.bf16 %v846_v16, %v845_v15  ;;  %v1037_v21 = vunpack.c.l.b16 %v914_v12  ;;  %v1038_v22 = vunpack.c.h.b16 %v914_v12  ;;  %v753_v23 = vadd.s32 224, %v3826_v38 }
  0xb6   : > { %v754_v24 = vadd.s32 232, %v3826_v38  ;;  %v1003_v25 = vunpack.c.l.b16 %v897_v18  ;;  %v1004_v26 = vunpack.c.h.b16 %v897_v18  ;;  %v737_v35 = vadd.s32 96, %v3826_v38  ;;  %1346 = vmatpush.bf16.msra.mxu1 %v3370_v7  ;;  %v3369_v18 = vld [vmem:[#allocation3 + $0x60] sm:$0xff] }
  0xb7   : > { %v1006_v30 = vunpack.c.h.b16 %v898_v19  ;;  %v3984_v31 = vpack.c.b16 %v1037_v21, %v1035_v17  ;;  %vm815_vm3 = vcmp.eq.s32.totalorder %v753_v23, %v3822_v36  ;;  %vm816_vm4 = vcmp.eq.s32.totalorder %v753_v23, %v3824_v37  ;;  %v3361_v17 = vld [vmem:[#allocation3 + $0x20] sm:$0xff] }
  0xb8   : > { %vm817_vm5 = vcmp.eq.s32.totalorder %v754_v24, %v3822_v36  ;;  %vm818_vm6 = vcmp.eq.s32.totalorder %v754_v24, %v3824_v37  ;;  %v738_v39 = vadd.s32 104, %v3826_v38  ;;  %v879_v43 = vsel %vm815_vm3, 1.0, %v3496_v42  ;;  %1257 = vmatpush.bf16.msra.mxu0 %v3362_v6 }
  0xb9   : > { %v1058_v41 = vpack.c.b16 %v1006_v30, %v1004_v26  ;;  %v880_v44 = vsel %vm816_vm4, 1.0, %v3496_v42  ;;  %v881_v45 = vsel %vm817_vm5, 1.0, %v3496_v42  ;;  %v882_v46 = vsel %vm818_vm6, 1.0, %v3496_v42 }
  0xba   : > { %vm783_vm7 = vcmp.eq.s32.totalorder %v737_v35, %v3822_v36  ;;  %vm784_vm8 = vcmp.eq.s32.totalorder %v737_v35, %v3824_v37  ;;  %vm785_vm9 = vcmp.eq.s32.totalorder %v738_v39, %v3822_v36  ;;  %vm786_vm10 = vcmp.eq.s32.totalorder %v738_v39, %v3824_v37  ;;  %1347 = vmatpush.bf16.msra.mxu1 %v3369_v18 }
  0xbb   : > { %v915_v47 = vpack.c.bf16 %v880_v44, %v879_v43  ;;  %v916_v48 = vpack.c.bf16 %v882_v46, %v881_v45  ;;  %v847_v51 = vsel %vm783_vm7, 1.0, %v3496_v42  ;;  %v848_v52 = vsel %vm784_vm8, 1.0, %v3496_v42 }
  0xbc   : > { %1138 = vxpose.binary.xlu1.c.b16.cont [4/16] %v1070_v28, %v3932_v27, 128  ;;  %v1005_v28 = vunpack.c.l.b16 %v898_v19  ;;  %v849_v53 = vsel %vm785_vm9, 1.0, %v3496_v42  ;;  %v850_v54 = vsel %vm786_vm10, 1.0, %v3496_v42  ;;  %v899_v58 = vpack.c.bf16 %v848_v52, %v847_v51 }
  0xbd   : > { %v1039_v57 = vunpack.c.l.b16 %v915_v47  ;;  %v900_v59 = vpack.c.bf16 %v850_v54, %v849_v53  ;;  %v1040_v60 = vunpack.c.h.b16 %v915_v47  ;;  %v1042_v1 = vunpack.c.h.b16 %v916_v48  ;;  %1258 = vmatpush.bf16.msra.mxu0 %v3361_v17 }
  0xbe   : > { %v3992_v40 = vpack.c.b16 %v1005_v28, %v1003_v25  ;;  %v755_v3 = vadd.s32 240, %v3826_v38  ;;  %v1007_v9 = vunpack.c.l.b16 %v899_v58  ;;  %v1008_v10 = vunpack.c.h.b16 %v899_v58  ;;  %v3368_v25 = vld [vmem:[#allocation3 + $0x58] sm:$0xff] }
  0xbf   : > { %1114 = vxpose.binary.xlu0.c.b16.cont [4/16] %v1054_v34, %v3940_v32, 128  ;;  %v1074_v34 = vpack.c.b16 %v1038_v22, %v1036_v20  ;;  %v1009_v11 = vunpack.c.l.b16 %v900_v59  ;;  %v1010_v12 = vunpack.c.h.b16 %v900_v59  ;;  %v1076_v14 = vpack.c.b16 %v1042_v1, %v1040_v60 }
  0xc0   : > { %vm819_vm11 = vcmp.eq.s32.totalorder %v755_v3, %v3822_v36  ;;  %v739_v15 = vadd.s32 112, %v3826_v38  ;;  %vm820_vm12 = vcmp.eq.s32.totalorder %v755_v3, %v3824_v37  ;;  %v740_v16 = vadd.s32 120, %v3826_v38  ;;  %1348 = vmatpush.bf16.msra.mxu1 %v3368_v25 }
  0xc1   : > { %v4018_v19 = vpack.c.b16 %v1009_v11, %v1007_v9  ;;  %v1060_v20 = vpack.c.b16 %v1010_v12, %v1008_v10  ;;  %v883_v21 = vsel %vm819_vm11, 1.0, %v3496_v42  ;;  %v884_v22 = vsel %vm820_vm12, 1.0, %v3496_v42 }
  0xc2   : > { %vm787_vm15 = vcmp.eq.s32.totalorder %v739_v15, %v3822_v36  ;;  %vm788_vm0 = vcmp.eq.s32.totalorder %v739_v15, %v3824_v37  ;;  %vm789_vm1 = vcmp.eq.s32.totalorder %v740_v16, %v3822_v36  ;;  %vm790_vm2 = vcmp.eq.s32.totalorder %v740_v16, %v3824_v37 }
  0xc3   : > { %v917_v26 = vpack.c.bf16 %v884_v22, %v883_v21  ;;  %v851_v30 = vsel %vm787_vm15, 1.0, %v3496_v42  ;;  %v853_v35 = vsel %vm789_vm1, 1.0, %v3496_v42  ;;  %v854_v39 = vsel %vm790_vm2, 1.0, %v3496_v42 }
  0xc4   : > { %v902_v43 = vpack.c.bf16 %v854_v39, %v853_v35  ;;  %vm1493_vm3 = vcmask 523264  }
  0xc5   : > { %v1043_v44 = vunpack.c.l.b16 %v917_v26  ;;  %v1044_v45 = vunpack.c.h.b16 %v917_v26 }
  0xc6   : > { %v1013_v52 = vunpack.c.l.b16 %v902_v43  ;;  %v1014_v53 = vunpack.c.h.b16 %v902_v43 }
  0xcc   : > { %1139 = vxpose.binary.xlu1.c.b16.cont [5/16] %v1072_v0, %v3958_v63, 128  ;;  %v1041_v0 = vunpack.c.l.b16 %v916_v48  ;;  %v3358_v48 = vld [vmem:[#allocation3 + $0x8] sm:$0xff] }
  0xce   : > { %v4010_v13 = vpack.c.b16 %v1041_v0, %v1039_v57 }
  0xcf   : > { %1115 = vxpose.binary.xlu0.c.b16.cont [5/16] %v1056_v5, %v3966_v4, 128  ;;  %v756_v5 = vadd.s32 248, %v3826_v38  ;;  %v3360_v38 = vld [vmem:[#allocation3 + $0x18] sm:$0xff] }
  0xd0   : > { %1259 = vmatpush.bf16.msra.mxu0 %v3360_v38 }
  0xd1   : > { %vm821_vm13 = vcmp.eq.s32.totalorder %v756_v5, %v3822_v36  ;;  %vm822_vm14 = vcmp.eq.s32.totalorder %v756_v5, %v3824_v37  ;;  %v3359_v36 = vld [vmem:[#allocation3 + $0x10] sm:$0xff] }
  0xd2   : > { %v885_v23 = vsel %vm821_vm13, 1.0, %v3496_v42  ;;  %v886_v24 = vsel %vm822_vm14, 1.0, %v3496_v42  ;;  %v3367_v37 = vld [vmem:[#allocation3 + $0x50] sm:$0xff] }
  0xd3   : > { %v918_v28 = vpack.c.bf16 %v886_v24, %v885_v23  ;;  %1349 = vmatpush.bf16.msra.mxu1 %v3367_v37 }
  0xd4   : > { %1260 = vmatpush.bf16.msra.mxu0 %v3359_v36 }
  0xd5   : > { %v1045_v46 = vunpack.c.l.b16 %v918_v28  ;;  %v1046_v47 = vunpack.c.h.b16 %v918_v28 }
  0xd7   : > { %v4034_v54 = vpack.c.b16 %v1045_v46, %v1043_v44  ;;  %1350 = vmatpush.bf16.msra.mxu1 %v3366_v49 }
  0xd8   : > { %1261 = vmatpush.bf16.msra.mxu0 %v3358_v48 }
  0xdb   : > { %1351 = vmatpush.bf16.msra.mxu1 %v3365_v56 }
  0xdc   : > { %1140 = vxpose.binary.xlu1.c.b16.cont [6/16] %v1074_v34, %v3984_v31, 128  ;;  %v852_v34 = vsel %vm788_vm0, 1.0, %v3496_v42  ;;  %v1078_v42 = vpack.c.b16 %v1046_v47, %v1044_v45 }
  0xdd   : > { %1262 = vmatpush.bf16.msra.mxu0 %v3357_v55 }
  0xdf   : > { %1116 = vxpose.binary.xlu0.c.b16.cont [6/16] %v1058_v41, %v3992_v40, 128  ;;  %v901_v41 = vpack.c.bf16 %v852_v34, %v851_v30 }
  0xe1   : > { %v1011_v50 = vunpack.c.l.b16 %v901_v41  ;;  %v1012_v51 = vunpack.c.h.b16 %v901_v41 }
  0xe3   : > { %v4036_v57 = vpack.c.b16 %v1013_v52, %v1011_v50  ;;  %v1062_v58 = vpack.c.b16 %v1014_v53, %v1012_v51 }
  0xec   : > { %1141 = vxpose.binary.xlu1.c.b16.cont [7/16] %v1076_v14, %v4010_v13, 128 }
  0xef   : > { %1117 = vxpose.binary.xlu0.c.b16.cont [7/16] %v1060_v20, %v4018_v19, 128 }
  0xfc   : > { %1142 = vxpose.binary.xlu1.c.b16.end [8/16] %v1078_v42, %v4034_v54, 128 }
  0xff   : > { %1118 = vxpose.binary.xlu0.c.b16.end [8/16] %v1062_v58, %v4036_v57, 128 }
 0x138   : > { %v1143_v59 = vpop.trf.xlu1 }
 0x139   : > { %1352 = vmatmul.bf16.vlgmr.msra.gmra.mxu1 %v1143_v59 }
 0x13b   : > { %v1119_v60 = vpop.trf.xlu0 }
 0x13c   : > { %1263 = vmatmul.bf16.vlgmr.msra.gmra.mxu0 %v1119_v60 }
 0x140   : > { %v1144_v0 = vpop.trf.xlu1 }
 0x143   : > { %v1120_v1 = vpop.trf.xlu0 }
 0x148   : > { %v1145_v3 = vpop.trf.xlu1 }
 0x149   : > { %1357 = vmatmul.bf16.gmra.mxu1 %v1145_v3 }
 0x14b   : > { %v1121_v5 = vpop.trf.xlu0 }
 0x14c   : > { %1268 = vmatmul.bf16.gmra.mxu0 %v1121_v5 }
 0x150   : > { %v1146_v6 = vpop.trf.xlu1 }
 0x153   : > { %v1122_v7 = vpop.trf.xlu0 }
 0x158   : > { %v1147_v9 = vpop.trf.xlu1 }
 0x159   : > { %1362 = vmatmul.bf16.gmra.mxu1 %v1147_v9 }
 0x15b   : > { %v1123_v10 = vpop.trf.xlu0 }
 0x15c   : > { %1273 = vmatmul.bf16.gmra.mxu0 %v1123_v10 }
 0x160   : > { %v1148_v11 = vpop.trf.xlu1 }
 0x163   : > { %v1124_v12 = vpop.trf.xlu0 }
 0x168   : > { %v1149_v14 = vpop.trf.xlu1 }
 0x169   : > { %1367 = vmatmul.bf16.gmra.mxu1 %v1149_v14 }
 0x16b   : > { %v1125_v15 = vpop.trf.xlu0 }
 0x16c   : > { %1278 = vmatmul.bf16.gmra.mxu0 %v1125_v15 }
 0x170   : > { %v1150_v16 = vpop.trf.xlu1 }
 0x173   : > { %v1126_v17 = vpop.trf.xlu0 }
 0x178   : > { %v1151_v18 = vpop.trf.xlu1 }
 0x179   : > { %1372 = vmatmul.bf16.gmra.mxu1 %v1151_v18 }
 0x17b   : > { %v1127_v20 = vpop.trf.xlu0 }
 0x17c   : > { %1283 = vmatmul.bf16.gmra.mxu0 %v1127_v20 }
 0x180   : > { %v1152_v21 = vpop.trf.xlu1 }
 0x183   : > { %v1128_v22 = vpop.trf.xlu0 }
 0x188   : > { %v1153_v23 = vpop.trf.xlu1 }
 0x189   : > { %1377 = vmatmul.bf16.gmra.mxu1 %v1153_v23 }
 0x18b   : > { %v1129_v24 = vpop.trf.xlu0 }
 0x18c   : > { %1288 = vmatmul.bf16.gmra.mxu0 %v1129_v24 }
 0x190   : > { %v1154_v38 = vpop.trf.xlu1 }
 0x193   : > { %v1130_v25 = vpop.trf.xlu0 }
 0x198   : > { %v1155_v26 = vpop.trf.xlu1 }
 0x199   : > { %1382 = vmatmul.bf16.gmra.mxu1 %v1155_v26  ;;  %v3374_v26 = vld [vmem:[%s4752_s3 + $0x8] sm:$0xff] }
 0x19b   : > { %v1131_v28 = vpop.trf.xlu0 }
 0x19c   : > { %1293 = vmatmul.bf16.gmra.mxu0 %v1131_v28 }
 0x1a0   : > { %v1156_v30 = vpop.trf.xlu1 }
 0x1a3   : > { %v1132_v34 = vpop.trf.xlu0 }
 0x1a8   : > { %v1157_v35 = vpop.trf.xlu1 }
 0x1a9   : > { %1387 = vmatmul.bf16.gmra.mxu1 %v1157_v35 }
 0x1ab   : > { %v1133_v39 = vpop.trf.xlu0 }
 0x1ac   : > { %1298 = vmatmul.bf16.gmra.mxu0 %v1133_v39 }
 0x1b6   : > { %v1353_v36 = vpop.f32.mrf.mxu1 }
 0x1b9   : > { %v1264_v37 = vpop.f32.mrf.mxu0  ;;  %1392 = vmatmul.bf16.gmra.mxu1 %v1144_v0 }
 0x1ba   : > { %v4040_v41 = vadd.f32 %v1353_v36, %v1264_v37  ;;  %v1158_v36 = vpop.trf.xlu1 }
 0x1bc   : > { %1303 = vmatmul.bf16.gmra.mxu0 %v1120_v1 }
 0x1be   : > { %v1355_v43 = vpop.f32.mrf.mxu1 }
 0x1c1   : > { %v1266_v44 = vpop.f32.mrf.mxu0 }
 0x1c2   : > { %v4042_v45 = vadd.f32 %v1355_v43, %v1266_v44  ;;  %v1134_v43 = vpop.trf.xlu0 }
 0x1c6   : > { %v1358_v46 = vpop.f32.mrf.mxu1 }
 0x1c9   : > { %v1269_v47 = vpop.f32.mrf.mxu0  ;;  %1397 = vmatmul.bf16.gmra.mxu1 %v1146_v6 }
 0x1ca   : > { %v4044_v48 = vadd.f32 %v1358_v46, %v1269_v47 }
 0x1cc   : > { %1308 = vmatmul.bf16.gmra.mxu0 %v1122_v7 }
 0x1ce   : > { %v1360_v49 = vpop.f32.mrf.mxu1 }
 0x1d1   : > { %v1271_v50 = vpop.f32.mrf.mxu0 }
 0x1d2   : > { %v4046_v51 = vadd.f32 %v1360_v49, %v1271_v50 }
 0x1d6   : > { %v1363_v52 = vpop.f32.mrf.mxu1 }
 0x1d9   : > { %v1274_v53 = vpop.f32.mrf.mxu0  ;;  %1402 = vmatmul.bf16.gmra.mxu1 %v1148_v11 }
 0x1da   : > { %v4048_v42 = vadd.f32 %v1363_v52, %v1274_v53  ;;  %v3380_v52 = vld [vmem:[%s4754_s5 + $0x18] sm:$0xff] }
 0x1dc   : > { %1313 = vmatmul.bf16.gmra.mxu0 %v1124_v12 }
 0x1de   : > { %v1365_v55 = vpop.f32.mrf.mxu1 }
 0x1e1   : > { %v1276_v56 = vpop.f32.mrf.mxu0 }
 0x1e2   : > { %v4050_v58 = vadd.f32 %v1365_v55, %v1276_v56 }
 0x1e6   : > { %v1368_v59 = vpop.f32.mrf.mxu1 }
 0x1e9   : > { %v1279_v60 = vpop.f32.mrf.mxu0  ;;  %1407 = vmatmul.bf16.gmra.mxu1 %v1150_v16 }
 0x1ea   : > { %v4052_v0 = vadd.f32 %v1368_v59, %v1279_v60 }
 0x1ec   : > { %1318 = vmatmul.bf16.gmra.mxu0 %v1126_v17 }
 0x1ee   : > { %v1370_v1 = vpop.f32.mrf.mxu1 }
 0x1f1   : > { %v1281_v3 = vpop.f32.mrf.mxu0 }
 0x1f2   : > { %v4054_v5 = vadd.f32 %v1370_v1, %v1281_v3 }
 0x1f6   : > { %v1373_v6 = vpop.f32.mrf.mxu1 }
 0x1f9   : > { %v1284_v7 = vpop.f32.mrf.mxu0  ;;  %1412 = vmatmul.bf16.gmra.mxu1 %v1152_v21  ;;  %v3376_v21 = vld [vmem:[%s4752_s3 + $0x18] sm:$0xff] }
 0x1fa   : > { %v4056_v9 = vadd.f32 %v1373_v6, %v1284_v7  ;;  %1522 = vmatpush.bf16.msra.mxu3 %v3376_v21 }
 0x1fc   : > { %1323 = vmatmul.bf16.gmra.mxu0 %v1128_v22 }
 0x1fe   : > { %v1375_v10 = vpop.f32.mrf.mxu1 }
 0x201   : > { %v1286_v11 = vpop.f32.mrf.mxu0 }
 0x202   : > { %v4058_v12 = vadd.f32 %v1375_v10, %v1286_v11 }
 0x206   : > { %v1378_v14 = vpop.f32.mrf.mxu1 }
 0x209   : > { %v1289_v15 = vpop.f32.mrf.mxu0  ;;  %1417 = vmatmul.bf16.gmra.mxu1 %v1154_v38  ;;  %v3375_v38 = vld [vmem:[%s4752_s3 + $0x10] sm:$0xff] }
 0x20a   : > { %v4060_v16 = vadd.f32 %v1378_v14, %v1289_v15  ;;  %1523 = vmatpush.bf16.msra.mxu3 %v3375_v38 }
 0x20c   : > { %1328 = vmatmul.bf16.gmra.mxu0 %v1130_v25 }
 0x20e   : > { %v1380_v17 = vpop.f32.mrf.mxu1  ;;  %1524 = vmatpush.bf16.msra.mxu3 %v3374_v26 }
 0x211   : > { %v1291_v18 = vpop.f32.mrf.mxu0 }
 0x212   : > { %v4062_v20 = vadd.f32 %v1380_v17, %v1291_v18 }
 0x216   : > { %v1383_v23 = vpop.f32.mrf.mxu1 }
 0x219   : > { %v1294_v22 = vpop.f32.mrf.mxu0  ;;  %1422 = vmatmul.bf16.gmra.mxu1 %v1156_v30  ;;  %v3373_v30 = vld [vmem:[%s4752_s3] sm:$0xff] }
 0x21a   : > { %v4067_v24 = vadd.f32 %v1383_v23, %v1294_v22  ;;  %1525 = vmatpush.bf16.msra.mxu3 %v3373_v30 }
 0x21c   : > { %1333 = vmatmul.bf16.gmra.mxu0 %v1132_v34 }
 0x21e   : > { %v1385_v25 = vpop.f32.mrf.mxu1  ;;  %1655 = vmatpush.bf16.msrb.mxu3 %v3380_v52 }
 0x221   : > { %v1296_v28 = vpop.f32.mrf.mxu0 }
 0x222   : > { %v4075_v35 = vadd.f32 %v1385_v25, %v1296_v28 }
 0x226   : > { %v1388_v39 = vpop.f32.mrf.mxu1 }
 0x229   : > { %v1299_v37 = vpop.f32.mrf.mxu0  ;;  %1427 = vmatmul.bf16.gmra.mxu1 %v1158_v36 }
 0x22a   : > { %v4080_v34 = vadd.f32 %v1388_v39, %v1299_v37 }
 0x22c   : > { %1338 = vmatmul.bf16.gmra.mxu0 %v1134_v43 }
 0x22e   : > { %v1390_v44 = vpop.f32.mrf.mxu1 }
 0x231   : > { %v1301_v46 = vpop.f32.mrf.mxu0 }
 0x232   : > { %v4082_v47 = vadd.f32 %v1390_v44, %v1301_v46 }
 0x236   : > { %v1393_v49 = vpop.f32.mrf.mxu1 }
 0x239   : > { %v1304_v50 = vpop.f32.mrf.mxu0 }
 0x23a   : > { %v1394_v55 = vadd.f32 %v1393_v49, %v1304_v50 }
 0x23c   : > { %v1433_v60 = vmul.f32 %v1394_v55, %v4040_v41 }
 0x23e   : > { %v1395_v53 = vpop.f32.mrf.mxu1 }
 0x241   : > { %v1306_v56 = vpop.f32.mrf.mxu0 }
 0x242   : > { %v1396_v59 = vadd.f32 %v1395_v53, %v1306_v56 }
 0x244   : > { %v1434_v1 = vmul.f32 %v1396_v59, %v4042_v45  ;;  %v3379_v45 = vld [vmem:[%s4754_s5 + $0x10] sm:$0xff] }
 0x245   : > { %1656 = vmatpush.bf16.msrb.mxu3 %v3379_v45 }
 0x246   : > { %v1449_v3 = vpack.c.bf16 %v1434_v1, %v1433_v60  ;;  %v1398_v6 = vpop.f32.mrf.mxu1 }
 0x248   : > { %3210 = vmatmul.msk.bf16.vlgmr.msra.gmra.mxu3 %vm1493_vm3, %v1449_v3 }
 0x249   : > { %v1309_v7 = vpop.f32.mrf.mxu0 }
 0x24a   : > { %v1399_v11 = vadd.f32 %v1398_v6, %v1309_v7 }
 0x24c   : > { %v1435_v17 = vmul.f32 %v1399_v11, %v4044_v48 }
 0x24e   : > { %v1400_v10 = vpop.f32.mrf.mxu1 }
 0x251   : > { %v1311_v14 = vpop.f32.mrf.mxu0 }
 0x252   : > { %v1401_v15 = vadd.f32 %v1400_v10, %v1311_v14 }
 0x254   : > { %v1436_v18 = vmul.f32 %v1401_v15, %v4046_v51 }
 0x256   : > { %v1450_v23 = vpack.c.bf16 %v1436_v18, %v1435_v17  ;;  %v1403_v21 = vpop.f32.mrf.mxu1 }
 0x258   : > { %3211 = vmatmul.msk.bf16.gmra.mxu3 %vm1493_vm3, %v1450_v23 }
 0x259   : > { %v1314_v41 = vpop.f32.mrf.mxu0 }
 0x25a   : > { %v1404_v38 = vadd.f32 %v1403_v21, %v1314_v41 }
 0x25c   : > { %v1437_v28 = vmul.f32 %v1404_v38, %v4048_v42 }
 0x25e   : > { %v1405_v22 = vpop.f32.mrf.mxu1 }
 0x261   : > { %v1316_v25 = vpop.f32.mrf.mxu0 }
 0x262   : > { %v1406_v26 = vadd.f32 %v1405_v22, %v1316_v25 }
 0x264   : > { %v1438_v48 = vmul.f32 %v1406_v26, %v4050_v58  ;;  %v3378_v58 = vld [vmem:[%s4754_s5 + $0x8] sm:$0xff] }
 0x265   : > { %1657 = vmatpush.bf16.msrb.mxu3 %v3378_v58 }
 0x266   : > { %v1451_v30 = vpack.c.bf16 %v1438_v48, %v1437_v28  ;;  %v1408_v51 = vpop.f32.mrf.mxu1 }
 0x268   : > { %3212 = vmatmul.msk.bf16.gmra.mxu3 %vm1493_vm3, %v1451_v30 }
 0x269   : > { %v1319_v39 = vpop.f32.mrf.mxu0 }
 0x26a   : > { %v1409_v37 = vadd.f32 %v1408_v51, %v1319_v39 }
 0x26c   : > { %v1439_v46 = vmul.f32 %v1409_v37, %v4052_v0 }
 0x26e   : > { %v1410_v36 = vpop.f32.mrf.mxu1 }
 0x271   : > { %v1321_v43 = vpop.f32.mrf.mxu0 }
 0x272   : > { %v1411_v44 = vadd.f32 %v1410_v36, %v1321_v43 }
 0x274   : > { %v1440_v49 = vmul.f32 %v1411_v44, %v4054_v5 }
 0x276   : > { %v1452_v50 = vpack.c.bf16 %v1440_v49, %v1439_v46  ;;  %v1413_v52 = vpop.f32.mrf.mxu1 }
 0x278   : > { %3213 = vmatmul.msk.bf16.gmra.mxu3 %vm1493_vm3, %v1452_v50 }
 0x279   : > { %v1324_v42 = vpop.f32.mrf.mxu0 }
 0x27a   : > { %v1414_v55 = vadd.f32 %v1413_v52, %v1324_v42 }
 0x27c   : > { %v1441_v60 = vmul.f32 %v1414_v55, %v4056_v9  ;;  %v3377_v9 = vld [vmem:[%s4754_s5] sm:$0xff] }
 0x27d   : > { %1658 = vmatpush.bf16.msrb.mxu3 %v3377_v9 }
 0x27e   : > { %v1415_v53 = vpop.f32.mrf.mxu1 }
 0x281   : > { %v1326_v56 = vpop.f32.mrf.mxu0 }
 0x282   : > { %v1416_v59 = vadd.f32 %v1415_v53, %v1326_v56 }
 0x284   : > { %v1442_v0 = vmul.f32 %v1416_v59, %v4058_v12 }
 0x286   : > { %v1453_v1 = vpack.c.bf16 %v1442_v0, %v1441_v60  ;;  %v1418_v5 = vpop.f32.mrf.mxu1 }
 0x288   : > { %3214 = vmatmul.msk.bf16.gmra.mxu3 %vm1493_vm3, %v1453_v1 }
 0x289   : > { %v1329_v3 = vpop.f32.mrf.mxu0 }
 0x28a   : > { %v1419_v7 = vadd.f32 %v1418_v5, %v1329_v3 }
 0x28c   : > { %v1443_v14 = vmul.f32 %v1419_v7, %v4060_v16 }
 0x28e   : > { %v1420_v6 = vpop.f32.mrf.mxu1 }
 0x291   : > { %v1331_v10 = vpop.f32.mrf.mxu0 }
 0x292   : > { %v1421_v11 = vadd.f32 %v1420_v6, %v1331_v10 }
 0x294   : > { %v1444_v15 = vmul.f32 %v1421_v11, %v4062_v20 }
 0x296   : > { %v1454_v17 = vpack.c.bf16 %v1444_v15, %v1443_v14  ;;  %v1423_v18 = vpop.f32.mrf.mxu1 }
 0x298   : > { %3215 = vmatmul.msk.bf16.gmra.mxu3 %vm1493_vm3, %v1454_v17 }
 0x299   : > { %v1334_v12 = vpop.f32.mrf.mxu0 }
 0x29a   : > { %v1424_v21 = vadd.f32 %v1423_v18, %v1334_v12 }
 0x29c   : > { %v1445_v22 = vmul.f32 %v1424_v21, %v4067_v24  ;;  %v3448_v24 = vld [vmem:[%s4753_s4] ss:$0 sm:$0xff] }
 0x29e   : > { %v1425_v23 = vpop.f32.mrf.mxu1 }
 0x2a1   : > { %v1336_v41 = vpop.f32.mrf.mxu0 }
 0x2a2   : > { %v1426_v45 = vadd.f32 %v1425_v23, %v1336_v41 }
 0x2a4   : > { %v1446_v16 = vmul.f32 %v1426_v45, %v4075_v35 }
 0x2a6   : > { %v1455_v38 = vpack.c.bf16 %v1446_v16, %v1445_v22  ;;  %v1428_v20 = vpop.f32.mrf.mxu1 }
 0x2a8   : > { %3216 = vmatmul.msk.bf16.gmra.mxu3 %vm1493_vm3, %v1455_v38 }
 0x2a9   : > { %v1339_v25 = vpop.f32.mrf.mxu0 }
 0x2aa   : > { %v1429_v28 = vadd.f32 %v1428_v20, %v1339_v25 }
 0x2ac   : > { %v1447_v51 = vmul.f32 %v1429_v28, %v4080_v34 }
 0x2ae   : > { %v1430_v26 = vpop.f32.mrf.mxu1 }
 0x2b1   : > { %v1341_v48 = vpop.f32.mrf.mxu0 }
 0x2b2   : > { %v1431_v30 = vadd.f32 %v1430_v26, %v1341_v48 }
 0x2b4   : > { %v1448_v39 = vmul.f32 %v1431_v30, %v4082_v47 }
 0x2b6   : > { %v1456_v36 = vpack.c.bf16 %v1448_v39, %v1447_v51 }
 0x2b8   : > { %3217 = vmatmul.msk.bf16.gmra.mxu3 %vm1493_vm3, %v1456_v36 }
 0x2cb   : > { %v1527_v37 = vpop.f32.mrf.mxu3 }
 0x2cc   : > { %v1528_v35 = vadd.f32 %v3448_v24, %v1527_v37 }
 0x2ce   : > { %v1567_v46 = vmax.f32 %v1528_v35, 0.0 }
 0x2d3   : > { %v1529_v43 = vpop.f32.mrf.mxu3 }
 0x2d4   : > { %v1530_v44 = vadd.f32 %v3448_v24, %v1529_v43 }
 0x2d6   : > { %v1568_v49 = vmax.f32 %v1530_v44, 0.0 }
 0x2d8   : > { %v1583_v50 = vpack.c.bf16 %v1568_v49, %v1567_v46 }
 0x2da   : > { %3234 = vmatmul.msk.bf16.vlgmr.msrb.gmra.mxu3 %vm1493_vm3, %v1583_v50 }
 0x2db   : > { %v1532_v52 = vpop.f32.mrf.mxu3 }
 0x2dc   : > { %v1533_v34 = vadd.f32 %v3448_v24, %v1532_v52 }
 0x2de   : > { %v1569_v58 = vmax.f32 %v1533_v34, 0.0 }
 0x2e3   : > { %v1534_v42 = vpop.f32.mrf.mxu3 }
 0x2e4   : > { %v1535_v47 = vadd.f32 %v3448_v24, %v1534_v42 }
 0x2e6   : > { %v1570_v53 = vmax.f32 %v1535_v47, 0.0  ;;  %v3449_v47 = vld [vmem:[%s4755_s6] ss:$0 sm:$0xff] }
 0x2e8   : > { %v1584_v55 = vpack.c.bf16 %v1570_v53, %v1569_v58 }
 0x2ea   : > { %3235 = vmatmul.msk.bf16.gmra.mxu3 %vm1493_vm3, %v1584_v55 }
 0x2eb   : > { %v1537_v56 = vpop.f32.mrf.mxu3 }
 0x2ec   : > { %v1538_v59 = vadd.f32 %v3448_v24, %v1537_v56 }
 0x2ee   : > { %v1571_v1 = vmax.f32 %v1538_v59, 0.0 }
 0x2f3   : > { %v1539_v60 = vpop.f32.mrf.mxu3 }
 0x2f4   : > { %v1540_v0 = vadd.f32 %v3448_v24, %v1539_v60 }
 0x2f6   : > { %v1572_v5 = vmax.f32 %v1540_v0, 0.0 }
 0x2f8   : > { %v1585_v3 = vpack.c.bf16 %v1572_v5, %v1571_v1 }
 0x2fa   : > { %3236 = vmatmul.msk.bf16.gmra.mxu3 %vm1493_vm3, %v1585_v3 }
 0x2fb   : > { %v1542_v6 = vpop.f32.mrf.mxu3 }
 0x2fc   : > { %v1543_v7 = vadd.f32 %v3448_v24, %v1542_v6 }
 0x2fe   : > { %v1573_v14 = vmax.f32 %v1543_v7, 0.0 }
 0x303   : > { %v1544_v10 = vpop.f32.mrf.mxu3 }
 0x304   : > { %v1545_v11 = vadd.f32 %v3448_v24, %v1544_v10 }
 0x306   : > { %v1574_v15 = vmax.f32 %v1545_v11, 0.0 }
 0x308   : > { %v1586_v17 = vpack.c.bf16 %v1574_v15, %v1573_v14 }
 0x30a   : > { %3237 = vmatmul.msk.bf16.gmra.mxu3 %vm1493_vm3, %v1586_v17 }
 0x30b   : > { %v1547_v18 = vpop.f32.mrf.mxu3 }
 0x30c   : > { %v1548_v9 = vadd.f32 %v3448_v24, %v1547_v18 }
 0x30e   : > { %v1575_v21 = vmax.f32 %v1548_v9, 0.0 }
 0x313   : > { %v1549_v12 = vpop.f32.mrf.mxu3 }
 0x314   : > { %v1550_v23 = vadd.f32 %v3448_v24, %v1549_v12 }
 0x316   : > { %v1576_v41 = vmax.f32 %v1550_v23, 0.0 }
 0x318   : > { %v1587_v45 = vpack.c.bf16 %v1576_v41, %v1575_v21 }
 0x31a   : > { %3238 = vmatmul.msk.bf16.gmra.mxu3 %vm1493_vm3, %v1587_v45 }
 0x31b   : > { %v1552_v22 = vpop.f32.mrf.mxu3 }
 0x31c   : > { %v1553_v16 = vadd.f32 %v3448_v24, %v1552_v22 }
 0x31e   : > { %v1577_v25 = vmax.f32 %v1553_v16, 0.0 }
 0x323   : > { %v1554_v38 = vpop.f32.mrf.mxu3 }
 0x324   : > { %v1555_v20 = vadd.f32 %v3448_v24, %v1554_v38 }
 0x326   : > { %v1578_v26 = vmax.f32 %v1555_v20, 0.0 }
 0x328   : > { %v1588_v28 = vpack.c.bf16 %v1578_v26, %v1577_v25 }
 0x32a   : > { %3239 = vmatmul.msk.bf16.gmra.mxu3 %vm1493_vm3, %v1588_v28 }
 0x32b   : > { %v1557_v48 = vpop.f32.mrf.mxu3 }
 0x32c   : > { %v1558_v30 = vadd.f32 %v3448_v24, %v1557_v48 }
 0x32e   : > { %v1579_v36 = vmax.f32 %v1558_v30, 0.0 }
 0x333   : > { %v1559_v51 = vpop.f32.mrf.mxu3 }
 0x334   : > { %v1560_v39 = vadd.f32 %v3448_v24, %v1559_v51 }
 0x336   : > { %v1580_v37 = vmax.f32 %v1560_v39, 0.0 }
 0x338   : > { %v1589_v35 = vpack.c.bf16 %v1580_v37, %v1579_v36 }
 0x33a   : > { %3240 = vmatmul.msk.bf16.gmra.mxu3 %vm1493_vm3, %v1589_v35 }
 0x33b   : > { %v1562_v43 = vpop.f32.mrf.mxu3 }
 0x33c   : > { %v1563_v44 = vadd.f32 %v3448_v24, %v1562_v43  ;;  %v1700_v43 = vld [vmem:[#allocation4] sm:$0xff] }
 0x33e   : > { %v1581_v50 = vmax.f32 %v1563_v44, 0.0 }
 0x343   : > { %v1564_v46 = vpop.f32.mrf.mxu3 }
 0x344   : > { %v1565_v49 = vadd.f32 %v3448_v24, %v1564_v46 }
 0x346   : > { %v1582_v52 = vmax.f32 %v1565_v49, 0.0  ;;  %v1704_v49 = vld [vmem:[#allocation4 + $0x20] sm:$0xff] }
 0x348   : > { %v1590_v34 = vpack.c.bf16 %v1582_v52, %v1581_v50 }
 0x34a   : > { %3241 = vmatmul.msk.bf16.gmra.mxu3 %vm1493_vm3, %v1590_v34  ;;  %v1705_v34 = vld [vmem:[#allocation4 + $0x28] sm:$0xff] }
 0x35d   : > { %v1660_v42 = vpop.f32.mrf.mxu3 }
 0x35e   : > { %v1661_v53 = vadd.f32 %v3449_v47, %v1660_v42 }
 0x365   : > { %v1662_v58 = vpop.f32.mrf.mxu3 }
 0x366   : > { %v1663_v55 = vadd.f32 %v3449_v47, %v1662_v58 }
 0x368   : > { %v1732_v56 = vpack.c.bf16 %v1663_v55, %v1661_v53  ;;  %v1707_v55 = vld [vmem:[#allocation4 + $0x38] sm:$0xff] }
 0x36d   : > { %v1665_v59 = vpop.f32.mrf.mxu3 }
 0x36e   : > { %v1666_v0 = vadd.f32 %v3449_v47, %v1665_v59  ;;  %v1708_v59 = vld [vmem:[#allocation4 + $0x40] sm:$0xff] }
 0x375   : > { %v1667_v60 = vpop.f32.mrf.mxu3 }
 0x376   : > { %v1668_v1 = vadd.f32 %v3449_v47, %v1667_v60 }
 0x378   : > { %v1733_v5 = vpack.c.bf16 %v1668_v1, %v1666_v0  ;;  %v1709_v1 = vld [vmem:[#allocation4 + $0x48] sm:$0xff] }
 0x37d   : > { %v1670_v24 = vpop.f32.mrf.mxu3 }
 0x37e   : > { %v1671_v6 = vadd.f32 %v3449_v47, %v1670_v24  ;;  %v1710_v24 = vld [vmem:[#allocation4 + $0x50] sm:$0xff] }
 0x385   : > { %v1672_v3 = vpop.f32.mrf.mxu3 }
 0x386   : > { %v1673_v7 = vadd.f32 %v3449_v47, %v1672_v3 }
 0x388   : > { %v1734_v10 = vpack.c.bf16 %v1673_v7, %v1671_v6  ;;  %v1711_v7 = vld [vmem:[#allocation4 + $0x58] sm:$0xff] }
 0x38d   : > { %v1675_v11 = vpop.f32.mrf.mxu3 }
 0x38e   : > { %v1676_v15 = vadd.f32 %v3449_v47, %v1675_v11  ;;  %v1712_v11 = vld [vmem:[#allocation4 + $0x60] sm:$0xff] }
 0x395   : > { %v1677_v14 = vpop.f32.mrf.mxu3 }
 0x396   : > { %v1678_v17 = vadd.f32 %v3449_v47, %v1677_v14 }
 0x398   : > { %v1735_v18 = vpack.c.bf16 %v1678_v17, %v1676_v15  ;;  %v1713_v17 = vld [vmem:[#allocation4 + $0x68] sm:$0xff] }
 0x39d   : > { %v1680_v9 = vpop.f32.mrf.mxu3 }
 0x39e   : > { %v1681_v37 = vadd.f32 %v3449_v47, %v1680_v9  ;;  %v1714_v9 = vld [vmem:[#allocation4 + $0x70] sm:$0xff] }
 0x3a5   : > { %v1682_v12 = vpop.f32.mrf.mxu3 }
 0x3a6   : > { %v1683_v39 = vadd.f32 %v3449_v47, %v1682_v12 }
 0x3a8   : > { %v1736_v35 = vpack.c.bf16 %v1683_v39, %v1681_v37  ;;  %v1720_v39 = vld [vmem:[#allocation4 + $0xa0] sm:$0xff] }
 0x3ad   : > { %v1685_v23 = vpop.f32.mrf.mxu3 }
 0x3ae   : > { %v1686_v51 = vadd.f32 %v3449_v47, %v1685_v23 }
 0x3b5   : > { %v1687_v21 = vpop.f32.mrf.mxu3 }
 0x3b6   : > { %v1688_v48 = vadd.f32 %v3449_v47, %v1687_v21  ;;  %v1715_v21 = vld [vmem:[#allocation4 + $0x78] sm:$0xff] }
 0x3b8   : > { %v1737_v36 = vpack.c.bf16 %v1688_v48, %v1686_v51  ;;  %v1719_v48 = vld [vmem:[#allocation4 + $0x98] sm:$0xff] }
 0x3bd   : > { %v1690_v41 = vpop.f32.mrf.mxu3 }
 0x3be   : > { %v1691_v28 = vadd.f32 %v3449_v47, %v1690_v41 }
 0x3c5   : > { %v1692_v45 = vpop.f32.mrf.mxu3 }
 0x3c6   : > { %v1693_v25 = vadd.f32 %v3449_v47, %v1692_v45  ;;  %v1716_v45 = vld [vmem:[#allocation4 + $0x80] sm:$0xff] }
 0x3c8   : > { %v1738_v30 = vpack.c.bf16 %v1693_v25, %v1691_v28 }
 0x3cd   : > { %v1695_v22 = vpop.f32.mrf.mxu3 }
 0x3ce   : > { %v1696_v38 = vadd.f32 %v3449_v47, %v1695_v22 }
 0x3d5   : > { %v1697_v16 = vpop.f32.mrf.mxu3 }
 0x3d6   : > { %v1698_v20 = vadd.f32 %v3449_v47, %v1697_v16  ;;  %v1706_v47 = vld [vmem:[#allocation4 + $0x30] sm:$0xff] }
 0x3d8   : > { %v1739_v26 = vpack.c.bf16 %v1698_v20, %v1696_v38  ;;  %v1717_v38 = vld [vmem:[#allocation4 + $0x88] sm:$0xff] }
 0x3da   : > { %1740 = vmatpush.bf16.msra.mxu2 %v1739_v26 }
 0x3de   : > { %1741 = vmatpush.bf16.msra.mxu2 %v1738_v30 }
 0x3e2   : > { %1742 = vmatpush.bf16.msra.mxu2 %v1737_v36 }
 0x3e6   : > { %1743 = vmatpush.bf16.msra.mxu2 %v1736_v35  ;;  %v1721_v35 = vld [vmem:[#allocation4 + $0xa8] sm:$0xff] }
 0x3ea   : > { %1744 = vmatpush.bf16.msra.mxu2 %v1735_v18 }
 0x3ee   : > { %1745 = vmatpush.bf16.msra.mxu2 %v1734_v10 }
 0x3f2   : > { %1746 = vmatpush.bf16.msra.mxu2 %v1733_v5 }
 0x3f6   : > { %1747 = vmatpush.bf16.msra.mxu2 %v1732_v56 }
 0x3f9   : > { %1748 = vmatmul.bf16.vlgmr.msra.gmra.mxu2 %v3866_v8  ;;  %v1701_v8 = vld [vmem:[#allocation4 + $0x8] sm:$0xff] }
 0x409   : > { %1753 = vmatmul.bf16.gmra.mxu2 %v3888_v33 }
 0x419   : > { %1758 = vmatmul.bf16.gmra.mxu2 %v3914_v2 }
 0x429   : > { %1763 = vmatmul.bf16.gmra.mxu2 %v3940_v32  ;;  %v1702_v32 = vld [vmem:[#allocation4 + $0x10] sm:$0xff] }
 0x439   : > { %1768 = vmatmul.bf16.gmra.mxu2 %v3966_v4 }
 0x449   : > { %1773 = vmatmul.bf16.gmra.mxu2 %v3992_v40 }
 0x459   : > { %1778 = vmatmul.bf16.gmra.mxu2 %v4018_v19  ;;  %v1703_v19 = vld [vmem:[#allocation4 + $0x18] sm:$0xff] }
 0x469   : > { %1783 = vmatmul.bf16.gmra.mxu2 %v4036_v57 }
 0x479   : > { %1788 = vmatmul.bf16.gmra.mxu2 %v3857_v61 }
 0x47c   : > { %v1749_v44 = vpop.f32.mrf.mxu2 }
 0x47d   : > { %v1829_v46 = vadd.f32 %v1749_v44, %v1700_v43 }
 0x47f   : > { %1861 = vst.msk [vmem:[#allocation4] sm:$0xff] %vm1493_vm3, %v1829_v46  ;;  %v1722_v46 = vld [vmem:[#allocation4 + $0xb0] sm:$0xff] }
 0x484   : > { %v1751_v33 = vpop.f32.mrf.mxu2 }
 0x485   : > { %v1830_v2 = vadd.f32 %v1751_v33, %v1701_v8 }
 0x487   : > { %1862 = vst.msk [vmem:[#allocation4 + $0x8] sm:$0xff] %vm1493_vm3, %v1830_v2  ;;  %v1723_v2 = vld [vmem:[#allocation4 + $0xb8] sm:$0xff] }
 0x489   : > { %1793 = vmatmul.bf16.gmra.mxu2 %v3880_v29 }
 0x48c   : > { %v1754_v4 = vpop.f32.mrf.mxu2 }
 0x48d   : > { %v1831_v40 = vadd.f32 %v1754_v4, %v1702_v32 }
 0x48f   : > { %1863 = vst.msk [vmem:[#allocation4 + $0x10] sm:$0xff] %vm1493_vm3, %v1831_v40  ;;  %v1724_v40 = vld [vmem:[#allocation4 + $0xc0] sm:$0xff] }
 0x494   : > { %v1756_v57 = vpop.f32.mrf.mxu2 }
 0x495   : > { %v1832_v61 = vadd.f32 %v1756_v57, %v1703_v19 }
 0x497   : > { %1864 = vst.msk [vmem:[#allocation4 + $0x18] sm:$0xff] %vm1493_vm3, %v1832_v61  ;;  %v1725_v61 = vld [vmem:[#allocation4 + $0xc8] sm:$0xff] }
 0x499   : > { %1798 = vmatmul.bf16.gmra.mxu2 %v3906_v62 }
 0x49c   : > { %v1759_v50 = vpop.f32.mrf.mxu2 }
 0x49d   : > { %v1833_v52 = vadd.f32 %v1759_v50, %v1704_v49 }
 0x49f   : > { %1865 = vst.msk [vmem:[#allocation4 + $0x20] sm:$0xff] %vm1493_vm3, %v1833_v52  ;;  %v1726_v52 = vld [vmem:[#allocation4 + $0xd0] sm:$0xff] }
 0x4a4   : > { %v1761_v42 = vpop.f32.mrf.mxu2 }
 0x4a5   : > { %v1834_v29 = vadd.f32 %v1761_v42, %v1705_v34 }
 0x4a7   : > { %1866 = vst.msk [vmem:[#allocation4 + $0x28] sm:$0xff] %vm1493_vm3, %v1834_v29  ;;  %v1727_v29 = vld [vmem:[#allocation4 + $0xd8] sm:$0xff] }
 0x4a9   : > { %1803 = vmatmul.bf16.gmra.mxu2 %v3932_v27 }
 0x4ac   : > { %v1764_v58 = vpop.f32.mrf.mxu2 }
 0x4ad   : > { %v1835_v53 = vadd.f32 %v1764_v58, %v1706_v47 }
 0x4af   : > { %1867 = vst.msk [vmem:[#allocation4 + $0x30] sm:$0xff] %vm1493_vm3, %v1835_v53  ;;  %v1728_v53 = vld [vmem:[#allocation4 + $0xe0] sm:$0xff] }
 0x4b4   : > { %v1766_v56 = vpop.f32.mrf.mxu2 }
 0x4b5   : > { %v1836_v62 = vadd.f32 %v1766_v56, %v1707_v55 }
 0x4b7   : > { %1868 = vst.msk [vmem:[#allocation4 + $0x38] sm:$0xff] %vm1493_vm3, %v1836_v62  ;;  %v1729_v62 = vld [vmem:[#allocation4 + $0xe8] sm:$0xff] }
 0x4b9   : > { %1808 = vmatmul.bf16.gmra.mxu2 %v3958_v63 }
 0x4bc   : > { %v1769_v60 = vpop.f32.mrf.mxu2 }
 0x4bd   : > { %v1837_v0 = vadd.f32 %v1769_v60, %v1708_v59 }
 0x4bf   : > { %1869 = vst.msk [vmem:[#allocation4 + $0x40] sm:$0xff] %vm1493_vm3, %v1837_v0  ;;  %v1730_v0 = vld [vmem:[#allocation4 + $0xf0] sm:$0xff] }
 0x4c4   : > { %v1771_v5 = vpop.f32.mrf.mxu2 }
 0x4c5   : > { %v1838_v27 = vadd.f32 %v1771_v5, %v1709_v1 }
 0x4c7   : > { %1870 = vst.msk [vmem:[#allocation4 + $0x48] sm:$0xff] %vm1493_vm3, %v1838_v27  ;;  %v1731_v27 = vld [vmem:[#allocation4 + $0xf8] sm:$0xff] }
 0x4c9   : > { %1813 = vmatmul.bf16.gmra.mxu2 %v3984_v31 }
 0x4cc   : > { %v1774_v3 = vpop.f32.mrf.mxu2 }
 0x4cd   : > { %v1839_v6 = vadd.f32 %v1774_v3, %v1710_v24 }
 0x4cf   : > { %1871 = vst.msk [vmem:[#allocation4 + $0x50] sm:$0xff] %vm1493_vm3, %v1839_v6 }
 0x4d4   : > { %v1776_v10 = vpop.f32.mrf.mxu2 }
 0x4d5   : > { %v1840_v63 = vadd.f32 %v1776_v10, %v1711_v7 }
 0x4d7   : > { %1872 = vst.msk [vmem:[#allocation4 + $0x58] sm:$0xff] %vm1493_vm3, %v1840_v63 }
 0x4d9   : > { %1818 = vmatmul.bf16.gmra.mxu2 %v4010_v13 }
 0x4dc   : > { %v1779_v14 = vpop.f32.mrf.mxu2 }
 0x4dd   : > { %v1841_v15 = vadd.f32 %v1779_v14, %v1712_v11 }
 0x4df   : > { %1873 = vst.msk [vmem:[#allocation4 + $0x60] sm:$0xff] %vm1493_vm3, %v1841_v15 }
 0x4e4   : > { %v1781_v31 = vpop.f32.mrf.mxu2 }
 0x4e5   : > { %v1842_v18 = vadd.f32 %v1781_v31, %v1713_v17 }
 0x4e7   : > { %1874 = vst.msk [vmem:[#allocation4 + $0x68] sm:$0xff] %vm1493_vm3, %v1842_v18 }
 0x4e9   : > { %1823 = vmatmul.bf16.gmra.mxu2 %v4034_v54  ;;  %v1718_v54 = vld [vmem:[#allocation4 + $0x90] sm:$0xff] }
 0x4ec   : > { %v1784_v12 = vpop.f32.mrf.mxu2 }
 0x4ed   : > { %v1843_v23 = vadd.f32 %v1784_v12, %v1714_v9 }
 0x4ef   : > { %1875 = vst.msk [vmem:[#allocation4 + $0x70] sm:$0xff] %vm1493_vm3, %v1843_v23 }
 0x4f4   : > { %v1786_v13 = vpop.f32.mrf.mxu2 }
 0x4f5   : > { %v1844_v41 = vadd.f32 %v1786_v13, %v1715_v21 }
 0x4f7   : > { %1876 = vst.msk [vmem:[#allocation4 + $0x78] sm:$0xff] %vm1493_vm3, %v1844_v41 }
 0x4fc   : > { %v1789_v22 = vpop.f32.mrf.mxu2 }
 0x4fd   : > { %v1845_v16 = vadd.f32 %v1789_v22, %v1716_v45 }
 0x4ff   : > { %1877 = vst.msk [vmem:[#allocation4 + $0x80] sm:$0xff] %vm1493_vm3, %v1845_v16 }
 0x504   : > { %v1791_v20 = vpop.f32.mrf.mxu2 }
 0x505   : > { %v1846_v25 = vadd.f32 %v1791_v20, %v1717_v38 }
 0x507   : > { %1878 = vst.msk [vmem:[#allocation4 + $0x88] sm:$0xff] %vm1493_vm3, %v1846_v25 }
 0x50c   : > { %v1794_v26 = vpop.f32.mrf.mxu2 }
 0x50d   : > { %v1847_v28 = vadd.f32 %v1794_v26, %v1718_v54 }
 0x50f   : > { %1879 = vst.msk [vmem:[#allocation4 + $0x90] sm:$0xff] %vm1493_vm3, %v1847_v28 }
 0x514   : > { %v1796_v30 = vpop.f32.mrf.mxu2 }
 0x515   : > { %v1848_v51 = vadd.f32 %v1796_v30, %v1719_v48 }
 0x517   : > { %1880 = vst.msk [vmem:[#allocation4 + $0x98] sm:$0xff] %vm1493_vm3, %v1848_v51 }
 0x51c   : > { %v1799_v36 = vpop.f32.mrf.mxu2 }
 0x51d   : > { %v1849_v37 = vadd.f32 %v1799_v36, %v1720_v39 }
 0x51f   : > { %1881 = vst.msk [vmem:[#allocation4 + $0xa0] sm:$0xff] %vm1493_vm3, %v1849_v37 }
 0x524   : > { %v1801_v43 = vpop.f32.mrf.mxu2 }
 0x525   : > { %v1850_v44 = vadd.f32 %v1801_v43, %v1721_v35 }
 0x527   : > { %1882 = vst.msk [vmem:[#allocation4 + $0xa8] sm:$0xff] %vm1493_vm3, %v1850_v44 }
 0x52c   : > { %v1804_v8 = vpop.f32.mrf.mxu2 }
 0x52d   : > { %v1851_v33 = vadd.f32 %v1804_v8, %v1722_v46 }
 0x52f   : > { %1883 = vst.msk [vmem:[#allocation4 + $0xb0] sm:$0xff] %vm1493_vm3, %v1851_v33 }
 0x534   : > { %v1806_v32 = vpop.f32.mrf.mxu2 }
 0x535   : > { %v1852_v4 = vadd.f32 %v1806_v32, %v1723_v2 }
 0x537   : > { %1884 = vst.msk [vmem:[#allocation4 + $0xb8] sm:$0xff] %vm1493_vm3, %v1852_v4 }
 0x53c   : > { %v1809_v19 = vpop.f32.mrf.mxu2 }
 0x53d   : > { %v1853_v57 = vadd.f32 %v1809_v19, %v1724_v40 }
 0x53f   : > { %1885 = vst.msk [vmem:[#allocation4 + $0xc0] sm:$0xff] %vm1493_vm3, %v1853_v57 }
 0x544   : > { %v1811_v49 = vpop.f32.mrf.mxu2 }
 0x545   : > { %v1854_v50 = vadd.f32 %v1811_v49, %v1725_v61 }
 0x547   : > { %1886 = vst.msk [vmem:[#allocation4 + $0xc8] sm:$0xff] %vm1493_vm3, %v1854_v50 }
 0x54c   : > { %v1814_v34 = vpop.f32.mrf.mxu2 }
 0x54d   : > { %v1855_v42 = vadd.f32 %v1814_v34, %v1726_v52 }
 0x54f   : > { %1887 = vst.msk [vmem:[#allocation4 + $0xd0] sm:$0xff] %vm1493_vm3, %v1855_v42 }
 0x554   : > { %v1816_v47 = vpop.f32.mrf.mxu2 }
 0x555   : > { %v1856_v58 = vadd.f32 %v1816_v47, %v1727_v29 }
 0x557   : > { %1888 = vst.msk [vmem:[#allocation4 + $0xd8] sm:$0xff] %vm1493_vm3, %v1856_v58 }
 0x55c   : > { %v1819_v55 = vpop.f32.mrf.mxu2 }
 0x55d   : > { %v1857_v56 = vadd.f32 %v1819_v55, %v1728_v53 }
 0x55f   : > { %1889 = vst.msk [vmem:[#allocation4 + $0xe0] sm:$0xff] %vm1493_vm3, %v1857_v56 }
 0x564   : > { %v1821_v59 = vpop.f32.mrf.mxu2 }
 0x565   : > { %v1858_v60 = vadd.f32 %v1821_v59, %v1729_v62 }
 0x567   : > { %1890 = vst.msk [vmem:[#allocation4 + $0xe8] sm:$0xff] %vm1493_vm3, %v1858_v60 }
 0x56c   : > { %v1824_v1 = vpop.f32.mrf.mxu2 }
 0x56d   : > { %v1859_v5 = vadd.f32 %v1824_v1, %v1730_v0 }
 0x56f   : > { %1891 = vst.msk [vmem:[#allocation4 + $0xf0] sm:$0xff] %vm1493_vm3, %v1859_v5 }
 0x573   : > { %1896 = sbr.rel (%p3242_p11) target bundleno = 1819 (0x71b), region = 96 }
 0x574   : > { %v1826_v24 = vpop.f32.mrf.mxu2 }
 0x575   : > { %v1860_v3 = vadd.f32 %v1826_v24, %v1731_v27 }
 0x577   : > { %1892 = vst.msk [vmem:[#allocation4 + $0xf8] sm:$0xff] %vm1493_vm3, %v1860_v3 }
 0x578   : > { %v3384_v6 = vld [vmem:[%s4756_s7 + $0x18] sm:$0xff]  ;;  %v3383_v7 = vld [vmem:[%s4756_s7 + $0x10] sm:$0xff]  ;;  %v3382_v10 = vld [vmem:[%s4756_s7 + $0x8] sm:$0xff] }
 0x579   : > { %2033 = vmatpush.bf16.msra.mxu0 %v3384_v6  ;;  %3393 = vmatpush.bf16.msra.mxu2 %v3384_v6  ;;  %v3381_v63 = vld [vmem:[%s4756_s7] sm:$0xff]  ;;  %v1898_v14 = vld [vmem:[#allocation4 + $0x8] sm:$0xff]  ;;  %v1899_v9 = vld [vmem:[#allocation4 + $0x10] sm:$0xff] }
 0x57a   : > { %v1897_v11 = vld [vmem:[#allocation4] sm:$0xff]  ;;  %v1914_v17 = vld [vmem:[#allocation4 + $0x88] sm:$0xff]  ;;  %v1900_v12 = vld [vmem:[#allocation4 + $0x18] sm:$0xff] }
 0x57b   : > { %v1913_v15 = vld [vmem:[#allocation4 + $0x80] sm:$0xff]  ;;  %v1929_v31 = vpack.c.bf16 %v1898_v14, %v1897_v11  ;;  %v1915_v23 = vld [vmem:[#allocation4 + $0x90] sm:$0xff]  ;;  %v1916_v21 = vld [vmem:[#allocation4 + $0x98] sm:$0xff]  ;;  %v1930_v13 = vpack.c.bf16 %v1900_v12, %v1899_v9 }
 0x57c   : > { %v1937_v18 = vpack.c.bf16 %v1914_v17, %v1913_v15  ;;  %v1938_v41 = vpack.c.bf16 %v1916_v21, %v1915_v23  ;;  %v1901_v45 = vld [vmem:[#allocation4 + $0x20] sm:$0xff]  ;;  %v1902_v22 = vld [vmem:[#allocation4 + $0x28] sm:$0xff]  ;;  %v1903_v54 = vld [vmem:[#allocation4 + $0x30] sm:$0xff] }
 0x57d   : > { %2034 = vmatpush.bf16.msra.mxu0 %v3383_v7  ;;  %3394 = vmatpush.bf16.msra.mxu2 %v3383_v7  ;;  %v1917_v16 = vld [vmem:[#allocation4 + $0xa0] sm:$0xff]  ;;  %v1918_v38 = vld [vmem:[#allocation4 + $0xa8] sm:$0xff]  ;;  %v1931_v20 = vpack.c.bf16 %v1902_v22, %v1901_v45  ;;  %v1904_v26 = vld [vmem:[#allocation4 + $0x38] sm:$0xff] }
 0x57e   : > { %v1939_v25 = vpack.c.bf16 %v1918_v38, %v1917_v16  ;;  %v1919_v28 = vld [vmem:[#allocation4 + $0xb0] sm:$0xff]  ;;  %v1920_v48 = vld [vmem:[#allocation4 + $0xb8] sm:$0xff]  ;;  %v1932_v30 = vpack.c.bf16 %v1904_v26, %v1903_v54  ;;  %v1905_v39 = vld [vmem:[#allocation4 + $0x40] sm:$0xff] }
 0x57f   : > { %v1940_v51 = vpack.c.bf16 %v1920_v48, %v1919_v28  ;;  %v1906_v36 = vld [vmem:[#allocation4 + $0x48] sm:$0xff]  ;;  %v1921_v37 = vld [vmem:[#allocation4 + $0xc0] sm:$0xff]  ;;  %v1907_v46 = vld [vmem:[#allocation4 + $0x50] sm:$0xff] }
 0x580   : > { %v1922_v35 = vld [vmem:[#allocation4 + $0xc8] sm:$0xff]  ;;  %v1933_v43 = vpack.c.bf16 %v1906_v36, %v1905_v39  ;;  %v1908_v8 = vld [vmem:[#allocation4 + $0x58] sm:$0xff]  ;;  %v1923_v33 = vld [vmem:[#allocation4 + $0xd0] sm:$0xff] }
 0x581   : > { %2035 = vmatpush.bf16.msra.mxu0 %v3382_v10  ;;  %3395 = vmatpush.bf16.msra.mxu2 %v3382_v10  ;;  %v1941_v44 = vpack.c.bf16 %v1922_v35, %v1921_v37  ;;  %v1924_v2 = vld [vmem:[#allocation4 + $0xd8] sm:$0xff]  ;;  %v1934_v32 = vpack.c.bf16 %v1908_v8, %v1907_v46  ;;  %v1909_v40 = vld [vmem:[#allocation4 + $0x60] sm:$0xff]  ;;  %v1910_v19 = vld [vmem:[#allocation4 + $0x68] sm:$0xff] }
 0x582   : > { %v1942_v4 = vpack.c.bf16 %v1924_v2, %v1923_v33  ;;  %v1925_v57 = vld [vmem:[#allocation4 + $0xe0] sm:$0xff]  ;;  %v1926_v61 = vld [vmem:[#allocation4 + $0xe8] sm:$0xff]  ;;  %v3388_v49 = vld [vmem:[%s4758_s9 + $0x18] sm:$0xff]  ;;  %v1935_v50 = vpack.c.bf16 %v1910_v19, %v1909_v40 }
 0x583   : > { %v1943_v52 = vpack.c.bf16 %v1926_v61, %v1925_v57  ;;  %2254 = vmatpush.bf16.msra.mxu1 %v3388_v49  ;;  %3397 = vmatpush.bf16.msra.mxu3 %v3388_v49  ;;  %v3387_v34 = vld [vmem:[%s4758_s9 + $0x10] sm:$0xff]  ;;  %v3386_v42 = vld [vmem:[%s4758_s9 + $0x8] sm:$0xff]  ;;  %v3385_v29 = vld [vmem:[%s4758_s9] sm:$0xff] }
 0x584   : > { %v1911_v47 = vld [vmem:[#allocation4 + $0x70] sm:$0xff]  ;;  %v1912_v58 = vld [vmem:[#allocation4 + $0x78] sm:$0xff]  ;;  %v4227_v60 = vld [vmem:[%s4757_s8] ss:$0 sm:$0xff] }
 0x585   : > { %2036 = vmatpush.bf16.msra.mxu0 %v3381_v63  ;;  %3396 = vmatpush.bf16.msra.mxu2 %v3381_v63  ;;  %v1927_v53 = vld [vmem:[#allocation4 + $0xf0] sm:$0xff]  ;;  %v1928_v55 = vld [vmem:[#allocation4 + $0xf8] sm:$0xff]  ;;  %v1936_v56 = vpack.c.bf16 %v1912_v58, %v1911_v47 }
 0x586   : > { %v1944_v62 = vpack.c.bf16 %v1928_v55, %v1927_v53 }
 0x587   : > { %2255 = vmatpush.bf16.msra.mxu1 %v3387_v34  ;;  %3398 = vmatpush.bf16.msra.mxu3 %v3387_v34 }
 0x588   : > { %3259 = vmatmul.msk.bf16.vlgmr.msra.gmra.mxu0 %vm1493_vm3, %v1929_v31  ;;  %3267 = vmatmul.msk.bf16.vlgmr.msra.gmra.mxu2 %vm1493_vm3, %v1937_v18 }
 0x58b   : > { %2256 = vmatpush.bf16.msra.mxu1 %v3386_v42  ;;  %3399 = vmatpush.bf16.msra.mxu3 %v3386_v42 }
 0x58f   : > { %2257 = vmatpush.bf16.msra.mxu1 %v3385_v29  ;;  %3400 = vmatpush.bf16.msra.mxu3 %v3385_v29 }
 0x598   : > { %3260 = vmatmul.msk.bf16.gmra.mxu0 %vm1493_vm3, %v1930_v13  ;;  %3268 = vmatmul.msk.bf16.gmra.mxu2 %vm1493_vm3, %v1938_v41 }
 0x5a8   : > { %3261 = vmatmul.msk.bf16.gmra.mxu0 %vm1493_vm3, %v1931_v20  ;;  %3269 = vmatmul.msk.bf16.gmra.mxu2 %vm1493_vm3, %v1939_v25 }
 0x5b8   : > { %3262 = vmatmul.msk.bf16.gmra.mxu0 %vm1493_vm3, %v1932_v30  ;;  %3270 = vmatmul.msk.bf16.gmra.mxu2 %vm1493_vm3, %v1940_v51 }
 0x5c8   : > { %3263 = vmatmul.msk.bf16.gmra.mxu0 %vm1493_vm3, %v1933_v43  ;;  %3271 = vmatmul.msk.bf16.gmra.mxu2 %vm1493_vm3, %v1941_v44 }
 0x5d8   : > { %3264 = vmatmul.msk.bf16.gmra.mxu0 %vm1493_vm3, %v1934_v32  ;;  %3272 = vmatmul.msk.bf16.gmra.mxu2 %vm1493_vm3, %v1942_v4 }
 0x5e8   : > { %3265 = vmatmul.msk.bf16.gmra.mxu0 %vm1493_vm3, %v1935_v50  ;;  %3273 = vmatmul.msk.bf16.gmra.mxu2 %vm1493_vm3, %v1943_v52 }
 0x5f8   : > { %3266 = vmatmul.msk.bf16.gmra.mxu0 %vm1493_vm3, %v1936_v56  ;;  %3274 = vmatmul.msk.bf16.gmra.mxu2 %vm1493_vm3, %v1944_v62 }
 0x605   : > { %v2038_v59 = vpop.f32.mrf.mxu0 }
 0x606   : > { %v2039_v0 = vadd.f32 %v4227_v60, %v2038_v59 }
 0x608   : > { %v2118_v27 = vmax.f32 %v2039_v0, 0.0 }
 0x60b   : > { %v2078_v1 = vpop.f32.mrf.mxu2 }
 0x60c   : > { %v2079_v6 = vadd.f32 %v4227_v60, %v2078_v1 }
 0x60d   : > { %v2040_v5 = vpop.f32.mrf.mxu0 }
 0x60e   : > { %v2041_v24 = vadd.f32 %v4227_v60, %v2040_v5  ;;  %v2134_v14 = vmax.f32 %v2079_v6, 0.0 }
 0x610   : > { %v2119_v3 = vmax.f32 %v2041_v24, 0.0 }
 0x612   : > { %v2150_v7 = vpack.c.bf16 %v2119_v3, %v2118_v27 }
 0x613   : > { %v2080_v10 = vpop.f32.mrf.mxu2 }
 0x614   : > { %v2081_v63 = vadd.f32 %v4227_v60, %v2080_v10  ;;  %3291 = vmatmul.msk.bf16.vlgmr.msra.gmra.mxu1 %vm1493_vm3, %v2150_v7 }
 0x615   : > { %v2043_v11 = vpop.f32.mrf.mxu0 }
 0x616   : > { %v2135_v15 = vmax.f32 %v2081_v63, 0.0  ;;  %v2044_v31 = vadd.f32 %v4227_v60, %v2043_v11 }
 0x618   : > { %v2158_v17 = vpack.c.bf16 %v2135_v15, %v2134_v14  ;;  %v2120_v12 = vmax.f32 %v2044_v31, 0.0 }
 0x61a   : > { %3299 = vmatmul.msk.bf16.vlgmr.msra.gmra.mxu3 %vm1493_vm3, %v2158_v17 }
 0x61b   : > { %v2083_v18 = vpop.f32.mrf.mxu2 }
 0x61c   : > { %v2084_v13 = vadd.f32 %v4227_v60, %v2083_v18 }
 0x61d   : > { %v2045_v9 = vpop.f32.mrf.mxu0 }
 0x61e   : > { %v2046_v23 = vadd.f32 %v4227_v60, %v2045_v9  ;;  %v2136_v38 = vmax.f32 %v2084_v13, 0.0 }
 0x620   : > { %v2121_v21 = vmax.f32 %v2046_v23, 0.0 }
 0x622   : > { %v2151_v41 = vpack.c.bf16 %v2121_v21, %v2120_v12 }
 0x623   : > { %v2085_v45 = vpop.f32.mrf.mxu2 }
 0x624   : > { %v2086_v22 = vadd.f32 %v4227_v60, %v2085_v45  ;;  %3292 = vmatmul.msk.bf16.gmra.mxu1 %vm1493_vm3, %v2151_v41 }
 0x625   : > { %v2048_v16 = vpop.f32.mrf.mxu0 }
 0x626   : > { %v2137_v20 = vmax.f32 %v2086_v22, 0.0  ;;  %v2049_v54 = vadd.f32 %v4227_v60, %v2048_v16 }
 0x628   : > { %v2159_v25 = vpack.c.bf16 %v2137_v20, %v2136_v38  ;;  %v2122_v48 = vmax.f32 %v2049_v54, 0.0 }
 0x62a   : > { %3300 = vmatmul.msk.bf16.gmra.mxu3 %vm1493_vm3, %v2159_v25 }
 0x62b   : > { %v2088_v26 = vpop.f32.mrf.mxu2 }
 0x62c   : > { %v2089_v39 = vadd.f32 %v4227_v60, %v2088_v26 }
 0x62d   : > { %v2050_v28 = vpop.f32.mrf.mxu0 }
 0x62e   : > { %v2051_v30 = vadd.f32 %v4227_v60, %v2050_v28  ;;  %v2138_v44 = vmax.f32 %v2089_v39, 0.0 }
 0x630   : > { %v2123_v51 = vmax.f32 %v2051_v30, 0.0 }
 0x632   : > { %v2152_v36 = vpack.c.bf16 %v2123_v51, %v2122_v48 }
 0x633   : > { %v2090_v37 = vpop.f32.mrf.mxu2 }
 0x634   : > { %v2091_v35 = vadd.f32 %v4227_v60, %v2090_v37  ;;  %3293 = vmatmul.msk.bf16.gmra.mxu1 %vm1493_vm3, %v2152_v36 }
 0x635   : > { %v2053_v43 = vpop.f32.mrf.mxu0 }
 0x636   : > { %v2139_v46 = vmax.f32 %v2091_v35, 0.0  ;;  %v2054_v33 = vadd.f32 %v4227_v60, %v2053_v43 }
 0x638   : > { %v2160_v8 = vpack.c.bf16 %v2139_v46, %v2138_v44  ;;  %v2124_v4 = vmax.f32 %v2054_v33, 0.0 }
 0x63a   : > { %3301 = vmatmul.msk.bf16.gmra.mxu3 %vm1493_vm3, %v2160_v8 }
 0x63b   : > { %v2093_v2 = vpop.f32.mrf.mxu2 }
 0x63c   : > { %v2094_v57 = vadd.f32 %v4227_v60, %v2093_v2 }
 0x63d   : > { %v2055_v32 = vpop.f32.mrf.mxu0 }
 0x63e   : > { %v2056_v40 = vadd.f32 %v4227_v60, %v2055_v32  ;;  %v2140_v34 = vmax.f32 %v2094_v57, 0.0  ;;  %v4280_v57 = vld [vmem:[%s4759_s10] ss:$0 sm:$0xff] }
 0x640   : > { %v2125_v19 = vmax.f32 %v2056_v40, 0.0 }
 0x642   : > { %v2153_v61 = vpack.c.bf16 %v2125_v19, %v2124_v4 }
 0x643   : > { %v2095_v49 = vpop.f32.mrf.mxu2 }
 0x644   : > { %v2096_v50 = vadd.f32 %v4227_v60, %v2095_v49  ;;  %3294 = vmatmul.msk.bf16.gmra.mxu1 %vm1493_vm3, %v2153_v61  ;;  %v2339_v49 = vld [vmem:[#allocation2] sm:$0xff] }
 0x645   : > { %v2058_v52 = vpop.f32.mrf.mxu0 }
 0x646   : > { %v2141_v42 = vmax.f32 %v2096_v50, 0.0  ;;  %v2059_v47 = vadd.f32 %v4227_v60, %v2058_v52 }
 0x648   : > { %v2161_v29 = vpack.c.bf16 %v2141_v42, %v2140_v34  ;;  %v2126_v55 = vmax.f32 %v2059_v47, 0.0  ;;  %v2340_v34 = vld [vmem:[#allocation2 + $0x8] sm:$0xff] }
 0x64a   : > { %3302 = vmatmul.msk.bf16.gmra.mxu3 %vm1493_vm3, %v2161_v29 }
 0x64b   : > { %v2098_v58 = vpop.f32.mrf.mxu2 }
 0x64c   : > { %v2099_v59 = vadd.f32 %v4227_v60, %v2098_v58  ;;  %v2355_v58 = vld [vmem:[#allocation2 + $0x80] sm:$0xff] }
 0x64d   : > { %v2060_v53 = vpop.f32.mrf.mxu0 }
 0x64e   : > { %v2061_v56 = vadd.f32 %v4227_v60, %v2060_v53  ;;  %v2142_v24 = vmax.f32 %v2099_v59, 0.0 }
 0x650   : > { %v2127_v62 = vmax.f32 %v2061_v56, 0.0 }
 0x652   : > { %v2154_v0 = vpack.c.bf16 %v2127_v62, %v2126_v55  ;;  %v2341_v62 = vld [vmem:[#allocation2 + $0x10] sm:$0xff] }
 0x653   : > { %v2100_v1 = vpop.f32.mrf.mxu2 }
 0x654   : > { %v2101_v5 = vadd.f32 %v4227_v60, %v2100_v1  ;;  %3295 = vmatmul.msk.bf16.gmra.mxu1 %vm1493_vm3, %v2154_v0 }
 0x655   : > { %v2063_v27 = vpop.f32.mrf.mxu0 }
 0x656   : > { %v2143_v3 = vmax.f32 %v2101_v5, 0.0  ;;  %v2064_v7 = vadd.f32 %v4227_v60, %v2063_v27  ;;  %v2356_v5 = vld [vmem:[#allocation2 + $0x88] sm:$0xff] }
 0x658   : > { %v2162_v6 = vpack.c.bf16 %v2143_v3, %v2142_v24  ;;  %v2128_v11 = vmax.f32 %v2064_v7, 0.0 }
 0x65a   : > { %3303 = vmatmul.msk.bf16.gmra.mxu3 %vm1493_vm3, %v2162_v6  ;;  %v2342_v6 = vld [vmem:[#allocation2 + $0x18] sm:$0xff] }
 0x65b   : > { %v2103_v10 = vpop.f32.mrf.mxu2 }
 0x65c   : > { %v2104_v17 = vadd.f32 %v4227_v60, %v2103_v10 }
 0x65d   : > { %v2065_v63 = vpop.f32.mrf.mxu0 }
 0x65e   : > { %v2066_v14 = vadd.f32 %v4227_v60, %v2065_v63  ;;  %v2144_v23 = vmax.f32 %v2104_v17, 0.0 }
 0x660   : > { %v2129_v15 = vmax.f32 %v2066_v14, 0.0 }
 0x662   : > { %v2155_v31 = vpack.c.bf16 %v2129_v15, %v2128_v11  ;;  %v2357_v11 = vld [vmem:[#allocation2 + $0x90] sm:$0xff] }
 0x663   : > { %v2105_v18 = vpop.f32.mrf.mxu2 }
 0x664   : > { %v2106_v9 = vadd.f32 %v4227_v60, %v2105_v18  ;;  %3296 = vmatmul.msk.bf16.gmra.mxu1 %vm1493_vm3, %v2155_v31  ;;  %v2343_v31 = vld [vmem:[#allocation2 + $0x20] sm:$0xff] }
 0x665   : > { %v2068_v12 = vpop.f32.mrf.mxu0 }
 0x666   : > { %v2145_v21 = vmax.f32 %v2106_v9, 0.0  ;;  %v2069_v41 = vadd.f32 %v4227_v60, %v2068_v12 }
 0x668   : > { %v2163_v13 = vpack.c.bf16 %v2145_v21, %v2144_v23  ;;  %v2130_v16 = vmax.f32 %v2069_v41, 0.0  ;;  %v2358_v23 = vld [vmem:[#allocation2 + $0x98] sm:$0xff] }
 0x66a   : > { %3304 = vmatmul.msk.bf16.gmra.mxu3 %vm1493_vm3, %v2163_v13 }
 0x66b   : > { %v2108_v45 = vpop.f32.mrf.mxu2 }
 0x66c   : > { %v2109_v25 = vadd.f32 %v4227_v60, %v2108_v45  ;;  %v2344_v45 = vld [vmem:[#allocation2 + $0x28] sm:$0xff] }
 0x66d   : > { %v2070_v22 = vpop.f32.mrf.mxu0 }
 0x66e   : > { %v2071_v38 = vadd.f32 %v4227_v60, %v2070_v22  ;;  %v2146_v30 = vmax.f32 %v2109_v25, 0.0 }
 0x670   : > { %v2131_v20 = vmax.f32 %v2071_v38, 0.0 }
 0x672   : > { %v2156_v54 = vpack.c.bf16 %v2131_v20, %v2130_v16  ;;  %v2359_v20 = vld [vmem:[#allocation2 + $0xa0] sm:$0xff] }
 0x673   : > { %v2110_v26 = vpop.f32.mrf.mxu2 }
 0x674   : > { %v2111_v28 = vadd.f32 %v4227_v60, %v2110_v26  ;;  %3297 = vmatmul.msk.bf16.gmra.mxu1 %vm1493_vm3, %v2156_v54 }
 0x675   : > { %v2073_v48 = vpop.f32.mrf.mxu0 }
 0x676   : > { %v2147_v51 = vmax.f32 %v2111_v28, 0.0  ;;  %v2074_v36 = vadd.f32 %v4227_v60, %v2073_v48  ;;  %v2345_v28 = vld [vmem:[#allocation2 + $0x30] sm:$0xff] }
 0x678   : > { %v2164_v39 = vpack.c.bf16 %v2147_v51, %v2146_v30  ;;  %v2132_v43 = vmax.f32 %v2074_v36, 0.0 }
 0x67a   : > { %3305 = vmatmul.msk.bf16.gmra.mxu3 %vm1493_vm3, %v2164_v39  ;;  %v2360_v39 = vld [vmem:[#allocation2 + $0xa8] sm:$0xff] }
 0x67b   : > { %v2113_v37 = vpop.f32.mrf.mxu2 }
 0x67c   : > { %v2114_v8 = vadd.f32 %v4227_v60, %v2113_v37 }
 0x67d   : > { %v2075_v35 = vpop.f32.mrf.mxu0 }
 0x67e   : > { %v2076_v44 = vadd.f32 %v4227_v60, %v2075_v35  ;;  %v2148_v4 = vmax.f32 %v2114_v8, 0.0 }
 0x680   : > { %v2133_v46 = vmax.f32 %v2076_v44, 0.0 }
 0x682   : > { %v2157_v33 = vpack.c.bf16 %v2133_v46, %v2132_v43  ;;  %v2346_v43 = vld [vmem:[#allocation2 + $0x38] sm:$0xff] }
 0x683   : > { %v2115_v2 = vpop.f32.mrf.mxu2 }
 0x684   : > { %v2116_v32 = vadd.f32 %v4227_v60, %v2115_v2  ;;  %3298 = vmatmul.msk.bf16.gmra.mxu1 %vm1493_vm3, %v2157_v33  ;;  %v2361_v33 = vld [vmem:[#allocation2 + $0xb0] sm:$0xff] }
 0x686   : > { %v2149_v40 = vmax.f32 %v2116_v32, 0.0 }
 0x688   : > { %v2165_v19 = vpack.c.bf16 %v2149_v40, %v2148_v4  ;;  %v2347_v40 = vld [vmem:[#allocation2 + $0x40] sm:$0xff] }
 0x68a   : > { %3306 = vmatmul.msk.bf16.gmra.mxu3 %vm1493_vm3, %v2165_v19 }
 0x691   : > { %v2259_v61 = vpop.f32.mrf.mxu1 }
 0x692   : > { %v2260_v50 = vadd.f32 %v4280_v57, %v2259_v61 }
 0x694   : > { %v2371_v52 = vadd.f32 %v2339_v49, %v2260_v50  ;;  %v2362_v50 = vld [vmem:[#allocation2 + $0xb8] sm:$0xff] }
 0x696   : > { %2403 = vst.msk [vmem:[#allocation2] sm:$0xff] %vm1493_vm3, %v2371_v52 }
 0x699   : > { %v2261_v60 = vpop.f32.mrf.mxu1 }
 0x69a   : > { %v2262_v42 = vadd.f32 %v4280_v57, %v2261_v60 }
 0x69c   : > { %v2372_v29 = vadd.f32 %v2340_v34, %v2262_v42  ;;  %v2348_v42 = vld [vmem:[#allocation2 + $0x48] sm:$0xff] }
 0x69d   : > { %v2299_v47 = vpop.f32.mrf.mxu3 }
 0x69e   : > { %2404 = vst.msk [vmem:[#allocation2 + $0x8] sm:$0xff] %vm1493_vm3, %v2372_v29  ;;  %v2300_v53 = vadd.f32 %v4280_v57, %v2299_v47 }
 0x6a0   : > { %v2387_v55 = vadd.f32 %v2355_v58, %v2300_v53  ;;  %v2363_v53 = vld [vmem:[#allocation2 + $0xc0] sm:$0xff] }
 0x6a1   : > { %v2264_v56 = vpop.f32.mrf.mxu1 }
 0x6a2   : > { %2419 = vst.msk [vmem:[#allocation2 + $0x80] sm:$0xff] %vm1493_vm3, %v2387_v55  ;;  %v2265_v59 = vadd.f32 %v4280_v57, %v2264_v56 }
 0x6a4   : > { %v2373_v0 = vadd.f32 %v2341_v62, %v2265_v59  ;;  %v2349_v59 = vld [vmem:[#allocation2 + $0x50] sm:$0xff] }
 0x6a5   : > { %v2301_v1 = vpop.f32.mrf.mxu3 }
 0x6a6   : > { %2405 = vst.msk [vmem:[#allocation2 + $0x10] sm:$0xff] %vm1493_vm3, %v2373_v0  ;;  %v2302_v27 = vadd.f32 %v4280_v57, %v2301_v1 }
 0x6a8   : > { %v2388_v24 = vadd.f32 %v2356_v5, %v2302_v27  ;;  %v2364_v27 = vld [vmem:[#allocation2 + $0xc8] sm:$0xff] }
 0x6a9   : > { %v2266_v3 = vpop.f32.mrf.mxu1 }
 0x6aa   : > { %2420 = vst.msk [vmem:[#allocation2 + $0x88] sm:$0xff] %vm1493_vm3, %v2388_v24  ;;  %v2267_v7 = vadd.f32 %v4280_v57, %v2266_v3 }
 0x6ac   : > { %v2374_v10 = vadd.f32 %v2342_v6, %v2267_v7  ;;  %v2350_v7 = vld [vmem:[#allocation2 + $0x58] sm:$0xff] }
 0x6ad   : > { %v2304_v63 = vpop.f32.mrf.mxu3 }
 0x6ae   : > { %2406 = vst.msk [vmem:[#allocation2 + $0x18] sm:$0xff] %vm1493_vm3, %v2374_v10  ;;  %v2305_v14 = vadd.f32 %v4280_v57, %v2304_v63 }
 0x6b0   : > { %v2389_v15 = vadd.f32 %v2357_v11, %v2305_v14  ;;  %v2365_v14 = vld [vmem:[#allocation2 + $0xd0] sm:$0xff] }
 0x6b1   : > { %v2269_v17 = vpop.f32.mrf.mxu1 }
 0x6b2   : > { %2421 = vst.msk [vmem:[#allocation2 + $0x90] sm:$0xff] %vm1493_vm3, %v2389_v15  ;;  %v2270_v18 = vadd.f32 %v4280_v57, %v2269_v17 }
 0x6b4   : > { %v2375_v9 = vadd.f32 %v2343_v31, %v2270_v18  ;;  %v2351_v18 = vld [vmem:[#allocation2 + $0x60] sm:$0xff] }
 0x6b5   : > { %v2306_v12 = vpop.f32.mrf.mxu3 }
 0x6b6   : > { %2407 = vst.msk [vmem:[#allocation2 + $0x20] sm:$0xff] %vm1493_vm3, %v2375_v9  ;;  %v2307_v21 = vadd.f32 %v4280_v57, %v2306_v12 }
 0x6b8   : > { %v2390_v13 = vadd.f32 %v2358_v23, %v2307_v21  ;;  %v2366_v21 = vld [vmem:[#allocation2 + $0xd8] sm:$0xff] }
 0x6b9   : > { %v2271_v41 = vpop.f32.mrf.mxu1 }
 0x6ba   : > { %2422 = vst.msk [vmem:[#allocation2 + $0x98] sm:$0xff] %vm1493_vm3, %v2390_v13  ;;  %v2272_v22 = vadd.f32 %v4280_v57, %v2271_v41 }
 0x6bc   : > { %v2376_v16 = vadd.f32 %v2344_v45, %v2272_v22  ;;  %v2352_v22 = vld [vmem:[#allocation2 + $0x68] sm:$0xff] }
 0x6bd   : > { %v2309_v38 = vpop.f32.mrf.mxu3 }
 0x6be   : > { %2408 = vst.msk [vmem:[#allocation2 + $0x28] sm:$0xff] %vm1493_vm3, %v2376_v16  ;;  %v2310_v25 = vadd.f32 %v4280_v57, %v2309_v38 }
 0x6c0   : > { %v2391_v54 = vadd.f32 %v2359_v20, %v2310_v25  ;;  %v2367_v25 = vld [vmem:[#allocation2 + $0xe0] sm:$0xff] }
 0x6c1   : > { %v2274_v26 = vpop.f32.mrf.mxu1 }
 0x6c2   : > { %2423 = vst.msk [vmem:[#allocation2 + $0xa0] sm:$0xff] %vm1493_vm3, %v2391_v54  ;;  %v2275_v48 = vadd.f32 %v4280_v57, %v2274_v26 }
 0x6c4   : > { %v2377_v30 = vadd.f32 %v2345_v28, %v2275_v48  ;;  %v2353_v48 = vld [vmem:[#allocation2 + $0x70] sm:$0xff] }
 0x6c5   : > { %v2311_v51 = vpop.f32.mrf.mxu3 }
 0x6c6   : > { %2409 = vst.msk [vmem:[#allocation2 + $0x30] sm:$0xff] %vm1493_vm3, %v2377_v30  ;;  %v2312_v36 = vadd.f32 %v4280_v57, %v2311_v51 }
 0x6c8   : > { %v2392_v37 = vadd.f32 %v2360_v39, %v2312_v36  ;;  %v2368_v36 = vld [vmem:[#allocation2 + $0xe8] sm:$0xff] }
 0x6c9   : > { %v2276_v35 = vpop.f32.mrf.mxu1 }
 0x6ca   : > { %2424 = vst.msk [vmem:[#allocation2 + $0xa8] sm:$0xff] %vm1493_vm3, %v2392_v37  ;;  %v2277_v44 = vadd.f32 %v4280_v57, %v2276_v35 }
 0x6cc   : > { %v2378_v46 = vadd.f32 %v2346_v43, %v2277_v44  ;;  %v2354_v44 = vld [vmem:[#allocation2 + $0x78] sm:$0xff] }
 0x6cd   : > { %v2314_v8 = vpop.f32.mrf.mxu3 }
 0x6ce   : > { %2410 = vst.msk [vmem:[#allocation2 + $0x38] sm:$0xff] %vm1493_vm3, %v2378_v46  ;;  %v2315_v2 = vadd.f32 %v4280_v57, %v2314_v8 }
 0x6d0   : > { %v2393_v32 = vadd.f32 %v2361_v33, %v2315_v2  ;;  %v2369_v2 = vld [vmem:[#allocation2 + $0xf0] sm:$0xff] }
 0x6d1   : > { %v2279_v4 = vpop.f32.mrf.mxu1 }
 0x6d2   : > { %2425 = vst.msk [vmem:[#allocation2 + $0xb0] sm:$0xff] %vm1493_vm3, %v2393_v32  ;;  %v2280_v19 = vadd.f32 %v4280_v57, %v2279_v4 }
 0x6d4   : > { %v2379_v61 = vadd.f32 %v2347_v40, %v2280_v19  ;;  %v2370_v19 = vld [vmem:[#allocation2 + $0xf8] sm:$0xff] }
 0x6d5   : > { %v2316_v49 = vpop.f32.mrf.mxu3 }
 0x6d6   : > { %2411 = vst.msk [vmem:[#allocation2 + $0x40] sm:$0xff] %vm1493_vm3, %v2379_v61  ;;  %v2317_v52 = vadd.f32 %v4280_v57, %v2316_v49 }
 0x6d8   : > { %v2394_v60 = vadd.f32 %v2362_v50, %v2317_v52 }
 0x6d9   : > { %v2281_v34 = vpop.f32.mrf.mxu1 }
 0x6da   : > { %2426 = vst.msk [vmem:[#allocation2 + $0xb8] sm:$0xff] %vm1493_vm3, %v2394_v60  ;;  %v2282_v29 = vadd.f32 %v4280_v57, %v2281_v34 }
 0x6dc   : > { %v2380_v47 = vadd.f32 %v2348_v42, %v2282_v29 }
 0x6dd   : > { %v2319_v58 = vpop.f32.mrf.mxu3 }
 0x6de   : > { %2412 = vst.msk [vmem:[#allocation2 + $0x48] sm:$0xff] %vm1493_vm3, %v2380_v47  ;;  %v2320_v55 = vadd.f32 %v4280_v57, %v2319_v58 }
 0x6e0   : > { %v2395_v56 = vadd.f32 %v2363_v53, %v2320_v55 }
 0x6e1   : > { %v2284_v62 = vpop.f32.mrf.mxu1 }
 0x6e2   : > { %2427 = vst.msk [vmem:[#allocation2 + $0xc0] sm:$0xff] %vm1493_vm3, %v2395_v56  ;;  %v2285_v0 = vadd.f32 %v4280_v57, %v2284_v62 }
 0x6e4   : > { %v2381_v1 = vadd.f32 %v2349_v59, %v2285_v0 }
 0x6e5   : > { %v2321_v5 = vpop.f32.mrf.mxu3 }
 0x6e6   : > { %2413 = vst.msk [vmem:[#allocation2 + $0x50] sm:$0xff] %vm1493_vm3, %v2381_v1  ;;  %v2322_v24 = vadd.f32 %v4280_v57, %v2321_v5 }
 0x6e8   : > { %v2396_v3 = vadd.f32 %v2364_v27, %v2322_v24 }
 0x6e9   : > { %v2286_v6 = vpop.f32.mrf.mxu1 }
 0x6ea   : > { %2428 = vst.msk [vmem:[#allocation2 + $0xc8] sm:$0xff] %vm1493_vm3, %v2396_v3  ;;  %v2287_v10 = vadd.f32 %v4280_v57, %v2286_v6 }
 0x6ec   : > { %v2382_v63 = vadd.f32 %v2350_v7, %v2287_v10 }
 0x6ed   : > { %v2324_v11 = vpop.f32.mrf.mxu3 }
 0x6ee   : > { %2414 = vst.msk [vmem:[#allocation2 + $0x58] sm:$0xff] %vm1493_vm3, %v2382_v63  ;;  %v2325_v15 = vadd.f32 %v4280_v57, %v2324_v11 }
 0x6f0   : > { %v2397_v17 = vadd.f32 %v2365_v14, %v2325_v15 }
 0x6f1   : > { %v2289_v31 = vpop.f32.mrf.mxu1 }
 0x6f2   : > { %2429 = vst.msk [vmem:[#allocation2 + $0xd0] sm:$0xff] %vm1493_vm3, %v2397_v17  ;;  %v2290_v9 = vadd.f32 %v4280_v57, %v2289_v31 }
 0x6f4   : > { %v2383_v12 = vadd.f32 %v2351_v18, %v2290_v9 }
 0x6f5   : > { %v2326_v23 = vpop.f32.mrf.mxu3 }
 0x6f6   : > { %2415 = vst.msk [vmem:[#allocation2 + $0x60] sm:$0xff] %vm1493_vm3, %v2383_v12  ;;  %v2327_v13 = vadd.f32 %v4280_v57, %v2326_v23 }
 0x6f8   : > { %v2398_v41 = vadd.f32 %v2366_v21, %v2327_v13 }
 0x6f9   : > { %v2291_v45 = vpop.f32.mrf.mxu1 }
 0x6fa   : > { %2430 = vst.msk [vmem:[#allocation2 + $0xd8] sm:$0xff] %vm1493_vm3, %v2398_v41  ;;  %v2292_v16 = vadd.f32 %v4280_v57, %v2291_v45 }
 0x6fc   : > { %v2384_v38 = vadd.f32 %v2352_v22, %v2292_v16 }
 0x6fd   : > { %v2329_v20 = vpop.f32.mrf.mxu3 }
 0x6fe   : > { %2416 = vst.msk [vmem:[#allocation2 + $0x68] sm:$0xff] %vm1493_vm3, %v2384_v38  ;;  %v2330_v54 = vadd.f32 %v4280_v57, %v2329_v20 }
 0x700   : > { %v2399_v26 = vadd.f32 %v2367_v25, %v2330_v54 }
 0x701   : > { %v2294_v28 = vpop.f32.mrf.mxu1 }
 0x702   : > { %2431 = vst.msk [vmem:[#allocation2 + $0xe0] sm:$0xff] %vm1493_vm3, %v2399_v26  ;;  %v2295_v30 = vadd.f32 %v4280_v57, %v2294_v28 }
 0x704   : > { %v2385_v51 = vadd.f32 %v2353_v48, %v2295_v30 }
 0x705   : > { %v2331_v39 = vpop.f32.mrf.mxu3 }
 0x706   : > { %2417 = vst.msk [vmem:[#allocation2 + $0x70] sm:$0xff] %vm1493_vm3, %v2385_v51  ;;  %v2332_v37 = vadd.f32 %v4280_v57, %v2331_v39 }
 0x708   : > { %v2400_v35 = vadd.f32 %v2368_v36, %v2332_v37 }
 0x709   : > { %v2296_v43 = vpop.f32.mrf.mxu1 }
 0x70a   : > { %2432 = vst.msk [vmem:[#allocation2 + $0xe8] sm:$0xff] %vm1493_vm3, %v2400_v35  ;;  %v2297_v46 = vadd.f32 %v4280_v57, %v2296_v43 }
 0x70c   : > { %v2386_v8 = vadd.f32 %v2354_v44, %v2297_v46 }
 0x70d   : > { %v2334_v33 = vpop.f32.mrf.mxu3 }
 0x70e   : > { %2418 = vst.msk [vmem:[#allocation2 + $0x78] sm:$0xff] %vm1493_vm3, %v2386_v8  ;;  %v2335_v32 = vadd.f32 %v4280_v57, %v2334_v33 }
 0x710   : > { %v2401_v4 = vadd.f32 %v2369_v2, %v2335_v32 }
 0x712   : > { %2433 = vst.msk [vmem:[#allocation2 + $0xf0] sm:$0xff] %vm1493_vm3, %v2401_v4 }
 0x715   : > { %v2336_v40 = vpop.f32.mrf.mxu3 }
 0x716   : > { %v2337_v61 = vadd.f32 %v4280_v57, %v2336_v40 }
 0x718   : > { %v2402_v49 = vadd.f32 %v2370_v19, %v2337_v61 }
 0x71a   : > { %2434 = vst.msk [vmem:[#allocation2 + $0xf8] sm:$0xff] %vm1493_vm3, %v2402_v49 }
 0x71b PF: > { %p2435_p12 = scmp.eq.s32.totalorder %s3481_s24, 2 }
 0x71d   : > { %p2436_p13 = pnand %p2435_p12, %p1893_p10 }
 0x71f   : > { %2439 = sbr.rel (%p2436_p13) target bundleno = 2230 (0x8b6), region = 100 }
 0x724   : > { %v2544_v50 = vld [vmem:[%s4761_s12] sm:$0x3]  ;;  %vm2594_vm4 = vcmask 1041408   ;;  %v3392_v52 = vld [vmem:[%s4760_s11 + $0x18] sm:$0xff]  ;;  %v2497_v34 = vld [vmem:[%s4751_s2 + $0x8] sm:$0xff]  ;;  %vm2545_vm5 = vcmask 31744  }
 0x725   : > { %v2496_v57 = vld [vmem:[%s4751_s2] sm:$0xff]  ;;  %v2596_v60 = vsel %vm2594_vm4, %v2544_v50, 0  ;;  %2763 = vmatpush.bf16.msra.mxu1 %v3392_v52  ;;  %v3391_v29 = vld [vmem:[%s4760_s11 + $0x10] sm:$0xff]  ;;  %3402 = vmatpush.bf16.msra.mxu2 %v3392_v52  ;;  %v2515_v58 = vld [vmem:[%s4751_s2 + $0x98] sm:$0xff]  ;;  %vm3052_vm6 = vcmask 7168  }
 0x726   : > { %2605 = vmatpush.bf16.msra.mxu0 %v2596_v60  ;;  %v2528_v42 = vpack.c.bf16 %v2497_v34, %v2496_v57  ;;  %3401 = vmatpush.bf16.msra.mxu3 %v2596_v60  ;;  %v2514_v47 = vld [vmem:[%s4751_s2 + $0x90] sm:$0xff]  ;;  %v3390_v55 = vld [vmem:[%s4760_s11 + $0x8] sm:$0xff]  ;;  %v3389_v56 = vld [vmem:[%s4760_s11] sm:$0xff] }
 0x727   : > { %v2537_v53 = vpack.c.bf16 %v2515_v58, %v2514_v47  ;;  %v2440_v62 = vld [vmem:[#allocation2] sm:$0xff]  ;;  %v2441_v59 = vld [vmem:[#allocation2 + $0x8] sm:$0xff]  ;;  %v2498_v24 = vld [vmem:[%s4751_s2 + $0x10] sm:$0xff] }
 0x728   : > { %v2456_v0 = vld [vmem:[#allocation2 + $0x80] sm:$0xff]  ;;  %v2457_v1 = vld [vmem:[#allocation2 + $0x88] sm:$0xff]  ;;  %v2472_v5 = vpack.c.bf16 %v2441_v59, %v2440_v62  ;;  %v2499_v3 = vld [vmem:[%s4751_s2 + $0x18] sm:$0xff] }
 0x729   : > { %3307 = vmatmul.msk.bf16.vlgmr.msra.gmra.mxu0 %vm2545_vm5, %v2528_v42  ;;  %2764 = vmatpush.bf16.msra.mxu1 %v3391_v29  ;;  %v2480_v27 = vpack.c.bf16 %v2457_v1, %v2456_v0  ;;  %v2516_v6 = vld [vmem:[%s4751_s2 + $0xa0] sm:$0xff]  ;;  %v2517_v7 = vld [vmem:[%s4751_s2 + $0xa8] sm:$0xff]  ;;  %v2529_v10 = vpack.c.bf16 %v2499_v3, %v2498_v24  ;;  %v2442_v11 = vld [vmem:[#allocation2 + $0x10] sm:$0xff] }
 0x72a   : > { %3403 = vmatpush.bf16.msra.mxu2 %v3391_v29  ;;  %3316 = vmatmul.msk.bf16.vlgmr.msra.gmra.mxu3 %vm2545_vm5, %v2537_v53  ;;  %v2538_v63 = vpack.c.bf16 %v2517_v7, %v2516_v6  ;;  %v2443_v14 = vld [vmem:[#allocation2 + $0x18] sm:$0xff]  ;;  %v2458_v15 = vld [vmem:[#allocation2 + $0x90] sm:$0xff]  ;;  %v2500_v9 = vld [vmem:[%s4751_s2 + $0x20] sm:$0xff] }
 0x72b   : > { %v2459_v17 = vld [vmem:[#allocation2 + $0x98] sm:$0xff]  ;;  %v2473_v31 = vpack.c.bf16 %v2443_v14, %v2442_v11  ;;  %v2501_v12 = vld [vmem:[%s4751_s2 + $0x28] sm:$0xff]  ;;  %v2518_v23 = vld [vmem:[%s4751_s2 + $0xb0] sm:$0xff] }
 0x72c   : > { %v2481_v18 = vpack.c.bf16 %v2459_v17, %v2458_v15  ;;  %v2519_v21 = vld [vmem:[%s4751_s2 + $0xb8] sm:$0xff]  ;;  %v2530_v13 = vpack.c.bf16 %v2501_v12, %v2500_v9  ;;  %v2444_v45 = vld [vmem:[#allocation2 + $0x20] sm:$0xff]  ;;  %v2445_v22 = vld [vmem:[#allocation2 + $0x28] sm:$0xff] }
 0x72d   : > { %2765 = vmatpush.bf16.msra.mxu1 %v3390_v55  ;;  %v2539_v41 = vpack.c.bf16 %v2519_v21, %v2518_v23  ;;  %v2460_v16 = vld [vmem:[#allocation2 + $0xa0] sm:$0xff]  ;;  %v2461_v38 = vld [vmem:[#allocation2 + $0xa8] sm:$0xff]  ;;  %v2474_v20 = vpack.c.bf16 %v2445_v22, %v2444_v45  ;;  %v2502_v54 = vld [vmem:[%s4751_s2 + $0x30] sm:$0xff] }
 0x72e   : > { %3404 = vmatpush.bf16.msra.mxu2 %v3390_v55  ;;  %v2482_v25 = vpack.c.bf16 %v2461_v38, %v2460_v16  ;;  %v2503_v26 = vld [vmem:[%s4751_s2 + $0x38] sm:$0xff]  ;;  %v2520_v28 = vld [vmem:[%s4751_s2 + $0xc0] sm:$0xff]  ;;  %v2521_v48 = vld [vmem:[%s4751_s2 + $0xc8] sm:$0xff] }
 0x72f   : > { %v2531_v30 = vpack.c.bf16 %v2503_v26, %v2502_v54  ;;  %v2540_v51 = vpack.c.bf16 %v2521_v48, %v2520_v28  ;;  %v2446_v39 = vld [vmem:[#allocation2 + $0x30] sm:$0xff]  ;;  %v2447_v36 = vld [vmem:[#allocation2 + $0x38] sm:$0xff]  ;;  %v2504_v46 = vld [vmem:[%s4751_s2 + $0x40] sm:$0xff] }
 0x730   : > { %v2462_v37 = vld [vmem:[#allocation2 + $0xb0] sm:$0xff]  ;;  %v2463_v35 = vld [vmem:[#allocation2 + $0xb8] sm:$0xff]  ;;  %v2475_v43 = vpack.c.bf16 %v2447_v36, %v2446_v39  ;;  %v2505_v8 = vld [vmem:[%s4751_s2 + $0x48] sm:$0xff] }
 0x731   : > { %2766 = vmatpush.bf16.msra.mxu1 %v3389_v56  ;;  %v2483_v44 = vpack.c.bf16 %v2463_v35, %v2462_v37  ;;  %v2522_v33 = vld [vmem:[%s4751_s2 + $0xd0] sm:$0xff]  ;;  %v2523_v2 = vld [vmem:[%s4751_s2 + $0xd8] sm:$0xff]  ;;  %v2532_v32 = vpack.c.bf16 %v2505_v8, %v2504_v46  ;;  %v2448_v40 = vld [vmem:[#allocation2 + $0x40] sm:$0xff] }
 0x732   : > { %3405 = vmatpush.bf16.msra.mxu2 %v3389_v56  ;;  %v2541_v4 = vpack.c.bf16 %v2523_v2, %v2522_v33  ;;  %v2449_v19 = vld [vmem:[#allocation2 + $0x48] sm:$0xff]  ;;  %v2464_v61 = vld [vmem:[#allocation2 + $0xc0] sm:$0xff]  ;;  %v2506_v57 = vld [vmem:[%s4751_s2 + $0x50] sm:$0xff] }
 0x733   : > { %v2465_v49 = vld [vmem:[#allocation2 + $0xc8] sm:$0xff]  ;;  %v2476_v50 = vpack.c.bf16 %v2449_v19, %v2448_v40  ;;  %v2507_v60 = vld [vmem:[%s4751_s2 + $0x58] sm:$0xff]  ;;  %v2524_v34 = vld [vmem:[%s4751_s2 + $0xe0] sm:$0xff] }
 0x734   : > { %3339 = vmatmul.msk.bf16.vlgmr.msra.gmra.mxu1 %vm1493_vm3, %v2472_v5  ;;  %v2484_v52 = vpack.c.bf16 %v2465_v49, %v2464_v61  ;;  %v2525_v42 = vld [vmem:[%s4751_s2 + $0xe8] sm:$0xff]  ;;  %v2533_v29 = vpack.c.bf16 %v2507_v60, %v2506_v57  ;;  %v2450_v58 = vld [vmem:[#allocation2 + $0x50] sm:$0xff]  ;;  %v2451_v53 = vld [vmem:[#allocation2 + $0x58] sm:$0xff] }
 0x735   : > { %3347 = vmatmul.msk.bf16.vlgmr.msra.gmra.mxu2 %vm1493_vm3, %v2480_v27  ;;  %v2542_v47 = vpack.c.bf16 %v2525_v42, %v2524_v34  ;;  %v2466_v55 = vld [vmem:[#allocation2 + $0xd0] sm:$0xff]  ;;  %v2467_v56 = vld [vmem:[#allocation2 + $0xd8] sm:$0xff]  ;;  %v2477_v62 = vpack.c.bf16 %v2451_v53, %v2450_v58  ;;  %v2508_v0 = vld [vmem:[%s4751_s2 + $0x60] sm:$0xff] }
 0x736   : > { %v2485_v59 = vpack.c.bf16 %v2467_v56, %v2466_v55  ;;  %v2509_v1 = vld [vmem:[%s4751_s2 + $0x68] sm:$0xff]  ;;  %v2526_v5 = vld [vmem:[%s4751_s2 + $0xf0] sm:$0xff]  ;;  %v2527_v27 = vld [vmem:[%s4751_s2 + $0xf8] sm:$0xff] }
 0x737   : > { %v2534_v24 = vpack.c.bf16 %v2509_v1, %v2508_v0  ;;  %v2543_v3 = vpack.c.bf16 %v2527_v27, %v2526_v5  ;;  %v2452_v6 = vld [vmem:[#allocation2 + $0x60] sm:$0xff]  ;;  %v2453_v7 = vld [vmem:[#allocation2 + $0x68] sm:$0xff]  ;;  %v2510_v15 = vld [vmem:[%s4751_s2 + $0x70] sm:$0xff] }
 0x738   : > { %v2478_v11 = vpack.c.bf16 %v2453_v7, %v2452_v6  ;;  %v2511_v17 = vld [vmem:[%s4751_s2 + $0x78] sm:$0xff]  ;;  %v2470_v12 = vld [vmem:[#allocation2 + $0xf0] sm:$0xff]  ;;  %v2513_v45 = vld [vmem:[%s4751_s2 + $0x88] sm:$0xff] }
 0x739   : > { %3308 = vmatmul.msk.bf16.gmra.mxu0 %vm2545_vm5, %v2529_v10  ;;  %v2468_v10 = vld [vmem:[#allocation2 + $0xe0] sm:$0xff]  ;;  %v2455_v9 = vld [vmem:[#allocation2 + $0x78] sm:$0xff] }
 0x73a   : > { %3317 = vmatmul.msk.bf16.gmra.mxu3 %vm2545_vm5, %v2538_v63  ;;  %v2469_v63 = vld [vmem:[#allocation2 + $0xe8] sm:$0xff]  ;;  %v2471_v23 = vld [vmem:[#allocation2 + $0xf8] sm:$0xff]  ;;  %v4501_v48 = vld [vmem:[%s4763_s14] ss:$0 sm:$0xff] }
 0x73b   : > { %v2486_v14 = vpack.c.bf16 %v2469_v63, %v2468_v10 }
 0x744   : > { %3340 = vmatmul.msk.bf16.gmra.mxu1 %vm1493_vm3, %v2473_v31  ;;  %v2535_v31 = vpack.c.bf16 %v2511_v17, %v2510_v15 }
 0x745   : > { %3348 = vmatmul.msk.bf16.gmra.mxu2 %vm1493_vm3, %v2481_v18  ;;  %v2454_v18 = vld [vmem:[#allocation2 + $0x70] sm:$0xff] }
 0x746   : > { %v2479_v21 = vpack.c.bf16 %v2455_v9, %v2454_v18 }
 0x749   : > { %3309 = vmatmul.msk.bf16.gmra.mxu0 %vm2545_vm5, %v2530_v13  ;;  %v2487_v13 = vpack.c.bf16 %v2471_v23, %v2470_v12 }
 0x74a   : > { %3318 = vmatmul.msk.bf16.gmra.mxu3 %vm2545_vm5, %v2539_v41  ;;  %v2512_v41 = vld [vmem:[%s4751_s2 + $0x80] sm:$0xff] }
 0x74b   : > { %v2536_v22 = vpack.c.bf16 %v2513_v45, %v2512_v41 }
 0x754   : > { %3341 = vmatmul.msk.bf16.gmra.mxu1 %vm1493_vm3, %v2474_v20 }
 0x755   : > { %3349 = vmatmul.msk.bf16.gmra.mxu2 %vm1493_vm3, %v2482_v25  ;;  %v4495_v25 = vld [vmem:[%s4762_s13] ss:$0 sm:$0xff] }
 0x759   : > { %3310 = vmatmul.msk.bf16.gmra.mxu0 %vm2545_vm5, %v2531_v30 }
 0x75a   : > { %3319 = vmatmul.msk.bf16.gmra.mxu3 %vm2545_vm5, %v2540_v51 }
 0x764   : > { %3342 = vmatmul.msk.bf16.gmra.mxu1 %vm1493_vm3, %v2475_v43 }
 0x765   : > { %3350 = vmatmul.msk.bf16.gmra.mxu2 %vm1493_vm3, %v2483_v44 }
 0x769   : > { %3311 = vmatmul.msk.bf16.gmra.mxu0 %vm2545_vm5, %v2532_v32 }
 0x76a   : > { %3320 = vmatmul.msk.bf16.gmra.mxu3 %vm2545_vm5, %v2541_v4 }
 0x774   : > { %3343 = vmatmul.msk.bf16.gmra.mxu1 %vm1493_vm3, %v2476_v50 }
 0x775   : > { %3351 = vmatmul.msk.bf16.gmra.mxu2 %vm1493_vm3, %v2484_v52 }
 0x779   : > { %3312 = vmatmul.msk.bf16.gmra.mxu0 %vm2545_vm5, %v2533_v29 }
 0x77a   : > { %3321 = vmatmul.msk.bf16.gmra.mxu3 %vm2545_vm5, %v2542_v47 }
 0x784   : > { %3344 = vmatmul.msk.bf16.gmra.mxu1 %vm1493_vm3, %v2477_v62 }
 0x785   : > { %3352 = vmatmul.msk.bf16.gmra.mxu2 %vm1493_vm3, %v2485_v59 }
 0x789   : > { %3313 = vmatmul.msk.bf16.gmra.mxu0 %vm2545_vm5, %v2534_v24 }
 0x78a   : > { %3322 = vmatmul.msk.bf16.gmra.mxu3 %vm2545_vm5, %v2543_v3 }
 0x794   : > { %3345 = vmatmul.msk.bf16.gmra.mxu1 %vm1493_vm3, %v2478_v11 }
 0x795   : > { %3353 = vmatmul.msk.bf16.gmra.mxu2 %vm1493_vm3, %v2486_v14 }
 0x799   : > { %3314 = vmatmul.msk.bf16.gmra.mxu0 %vm2545_vm5, %v2535_v31 }
 0x7a4   : > { %3346 = vmatmul.msk.bf16.gmra.mxu1 %vm1493_vm3, %v2479_v21 }
 0x7a5   : > { %3354 = vmatmul.msk.bf16.gmra.mxu2 %vm1493_vm3, %v2487_v13 }
 0x7a6   : > { %v2607_v16 = vpop.f32.mrf.mxu0 }
 0x7a9   : > { %3315 = vmatmul.msk.bf16.gmra.mxu0 %vm2545_vm5, %v2536_v22 }
 0x7ad   : > { %v2652_v20 = vpop.f32.mrf.mxu3 }
 0x7ae   : > { %v2609_v38 = vpop.f32.mrf.mxu0 }
 0x7b1   : > { %v2768_v54 = vpop.f32.mrf.mxu1 }
 0x7b2   : > { %v2769_v26 = vadd.f32 %v2768_v54, %v2607_v16 }
 0x7b4   : > { %v2852_v28 = vadd.f32 %v4495_v25, %v2769_v26 }
 0x7b5   : > { %v2654_v37 = vpop.f32.mrf.mxu3 }
 0x7b6   : > { %v2612_v30 = vpop.f32.mrf.mxu0  ;;  %v2884_v51 = vmax.f32 %v2852_v28, 0.0 }
 0x7b8   : > { %v4503_v39 = vpop.f32.mrf.mxu2  ;;  %v2920_v36 = vmul.f32 %v4501_v48, %v2884_v51 }
 0x7b9   : > { %v2770_v35 = vpop.f32.mrf.mxu1 }
 0x7ba   : > { %v2771_v43 = vadd.f32 %v2770_v35, %v2609_v38  ;;  %2952 = vadd.xlane.f32.xlu0 %v2920_v36 }
 0x7bc   : > { %v2853_v44 = vadd.f32 %v4495_v25, %v2771_v43 }
 0x7bd   : > { %v2657_v40 = vpop.f32.mrf.mxu3 }
 0x7be   : > { %v2614_v46 = vpop.f32.mrf.mxu0  ;;  %v2885_v8 = vmax.f32 %v2853_v44, 0.0 }
 0x7c0   : > { %v4507_v33 = vpop.f32.mrf.mxu2  ;;  %v2921_v2 = vmul.f32 %v4501_v48, %v2885_v8 }
 0x7c1   : > { %v2773_v32 = vpop.f32.mrf.mxu1 }
 0x7c2   : > { %v2774_v4 = vadd.f32 %v2773_v32, %v2612_v30  ;;  %2954 = vadd.xlane.f32.xlu0 %v2921_v2 }
 0x7c4   : > { %v2854_v19 = vadd.f32 %v4495_v25, %v2774_v4 }
 0x7c5   : > { %v2659_v47 = vpop.f32.mrf.mxu3 }
 0x7c6   : > { %v2617_v61 = vpop.f32.mrf.mxu0  ;;  %v2886_v49 = vmax.f32 %v2854_v19, 0.0 }
 0x7c8   : > { %v2813_v50 = vpop.f32.mrf.mxu2  ;;  %v2922_v52 = vmul.f32 %v4501_v48, %v2886_v49 }
 0x7c9   : > { %v2814_v57 = vadd.f32 %v2813_v50, %v2652_v20  ;;  %v2775_v60 = vpop.f32.mrf.mxu1 }
 0x7ca   : > { %v2776_v34 = vadd.f32 %v2775_v60, %v2614_v46  ;;  %2956 = vadd.xlane.f32.xlu1 %v2922_v52 }
 0x7cb   : > { %v2870_v42 = vadd.f32 %v4495_v25, %v2814_v57 }
 0x7cc   : > { %v2855_v29 = vadd.f32 %v4495_v25, %v2776_v34 }
 0x7cd   : > { %v2902_v58 = vmax.f32 %v2870_v42, 0.0  ;;  %v2662_v10 = vpop.f32.mrf.mxu3 }
 0x7ce   : > { %v2619_v53 = vpop.f32.mrf.mxu0  ;;  %v2887_v55 = vmax.f32 %v2855_v29, 0.0 }
 0x7cf   : > { %v2938_v56 = vmul.f32 %v4501_v48, %v2902_v58 }
 0x7d0   : > { %v2815_v62 = vpop.f32.mrf.mxu2  ;;  %v2923_v59 = vmul.f32 %v4501_v48, %v2887_v55 }
 0x7d1   : > { %v2816_v0 = vadd.f32 %v2815_v62, %v2654_v37  ;;  %v2778_v1 = vpop.f32.mrf.mxu1  ;;  %2988 = vadd.xlane.f32.xlu0 %v2938_v56 }
 0x7d2   : > { %v2779_v5 = vadd.f32 %v2778_v1, %v2617_v61  ;;  %2958 = vadd.xlane.f32.xlu1 %v2923_v59 }
 0x7d3   : > { %v2871_v27 = vadd.f32 %v4495_v25, %v2816_v0 }
 0x7d4   : > { %v2856_v24 = vadd.f32 %v4495_v25, %v2779_v5 }
 0x7d5   : > { %v2903_v3 = vmax.f32 %v2871_v27, 0.0  ;;  %v2664_v41 = vpop.f32.mrf.mxu3 }
 0x7d6   : > { %v2622_v6 = vpop.f32.mrf.mxu0  ;;  %v2888_v7 = vmax.f32 %v2856_v24, 0.0 }
 0x7d7   : > { %v2939_v14 = vmul.f32 %v4501_v48, %v2903_v3 }
 0x7d8   : > { %v2818_v63 = vpop.f32.mrf.mxu2  ;;  %v2924_v11 = vmul.f32 %v4501_v48, %v2888_v7 }
 0x7d9   : > { %v2819_v15 = vadd.f32 %v2818_v63, %v2657_v40  ;;  %v2780_v17 = vpop.f32.mrf.mxu1 }
 0x7da   : > { %2960 = vadd.xlane.f32.xlu2 %v2924_v11  ;;  %2990 = vadd.xlane.f32.xlu1 %v2939_v14  ;;  %v2781_v18 = vadd.f32 %v2780_v17, %v2619_v53 }
 0x7db   : > { %v2872_v31 = vadd.f32 %v4495_v25, %v2819_v15 }
 0x7dc   : > { %v2857_v21 = vadd.f32 %v4495_v25, %v2781_v18 }
 0x7dd   : > { %v2904_v9 = vmax.f32 %v2872_v31, 0.0  ;;  %v2667_v43 = vpop.f32.mrf.mxu3 }
 0x7de   : > { %v2624_v12 = vpop.f32.mrf.mxu0  ;;  %v2889_v20 = vmax.f32 %v2857_v21, 0.0 }
 0x7df   : > { %v2940_v23 = vmul.f32 %v4501_v48, %v2904_v9 }
 0x7e0   : > { %v2820_v13 = vpop.f32.mrf.mxu2  ;;  %v2925_v36 = vmul.f32 %v4501_v48, %v2889_v20 }
 0x7e1   : > { %v2821_v45 = vadd.f32 %v2820_v13, %v2659_v47  ;;  %v2783_v22 = vpop.f32.mrf.mxu1 }
 0x7e2   : > { %2992 = vadd.xlane.f32.xlu2 %v2940_v23  ;;  %v2784_v38 = vadd.f32 %v2783_v22, %v2622_v6 }
 0x7e3   : > { %v2873_v16 = vadd.f32 %v4495_v25, %v2821_v45 }
 0x7e4   : > { %v2858_v28 = vadd.f32 %v4495_v25, %v2784_v38 }
 0x7e5   : > { %v2905_v54 = vmax.f32 %v2873_v16, 0.0  ;;  %v2669_v34 = vpop.f32.mrf.mxu3 }
 0x7e6   : > { %v2627_v26 = vpop.f32.mrf.mxu0  ;;  %v2890_v44 = vmax.f32 %v2858_v28, 0.0 }
 0x7e7   : > { %v2941_v30 = vmul.f32 %v4501_v48, %v2905_v54 }
 0x7e8   : > { %v2823_v51 = vpop.f32.mrf.mxu2  ;;  %v2926_v19 = vmul.f32 %v4501_v48, %v2890_v44 }
 0x7e9   : > { %v2824_v37 = vadd.f32 %v2823_v51, %v2662_v10  ;;  %2994 = vadd.xlane.f32.xlu0 %v2941_v30  ;;  %v2785_v35 = vpop.f32.mrf.mxu1 }
 0x7ea   : > { %2962 = vadd.xlane.f32.xlu2 %v2925_v36  ;;  %v2786_v8 = vadd.f32 %v2785_v35, %v2624_v12 }
 0x7eb   : > { %v2874_v46 = vadd.f32 %v4495_v25, %v2824_v37 }
 0x7ec   : > { %v2859_v4 = vadd.f32 %v4495_v25, %v2786_v8 }
 0x7ed   : > { %v2906_v2 = vmax.f32 %v2874_v46, 0.0  ;;  %v2672_v24 = vpop.f32.mrf.mxu3 }
 0x7ee   : > { %v2629_v32 = vpop.f32.mrf.mxu0  ;;  %v2891_v52 = vmax.f32 %v2859_v4, 0.0 }
 0x7ef   : > { %v2942_v40 = vmul.f32 %v4501_v48, %v2906_v2 }
 0x7f0   : > { %v2825_v61 = vpop.f32.mrf.mxu2  ;;  %v2927_v53 = vmul.f32 %v4501_v48, %v2891_v52 }
 0x7f1   : > { %v2826_v49 = vadd.f32 %v2825_v61, %v2664_v41  ;;  %2996 = vadd.xlane.f32.xlu1 %v2942_v40  ;;  %2964 = vadd.xlane.f32.xlu0 %v2926_v19  ;;  %v2788_v50 = vpop.f32.mrf.mxu1 }
 0x7f2   : > { %v2789_v60 = vadd.f32 %v2788_v50, %v2627_v26 }
 0x7f3   : > { %v2875_v57 = vadd.f32 %v4495_v25, %v2826_v49 }
 0x7f4   : > { %v2860_v47 = vadd.f32 %v4495_v25, %v2789_v60 }
 0x7f5   : > { %v2907_v42 = vmax.f32 %v2875_v57, 0.0  ;;  %v2674_v13 = vpop.f32.mrf.mxu3 }
 0x7f6   : > { %v2632_v29 = vpop.f32.mrf.mxu0  ;;  %v2892_v59 = vmax.f32 %v2860_v47, 0.0 }
 0x7f7   : > { %v2943_v58 = vmul.f32 %v4501_v48, %v2907_v42 }
 0x7f8   : > { %v2828_v55 = vpop.f32.mrf.mxu2  ;;  %v2928_v6 = vmul.f32 %v4501_v48, %v2892_v59 }
 0x7f9   : > { %v2829_v56 = vadd.f32 %v2828_v55, %v2667_v43  ;;  %2998 = vadd.xlane.f32.xlu2 %v2943_v58  ;;  %2966 = vadd.xlane.f32.xlu1 %v2927_v53  ;;  %v2790_v62 = vpop.f32.mrf.mxu1 }
 0x7fa   : > { %v2791_v1 = vadd.f32 %v2790_v62, %v2629_v32 }
 0x7fb   : > { %v2876_v0 = vadd.f32 %v4495_v25, %v2829_v56 }
 0x7fc   : > { %v2861_v3 = vadd.f32 %v4495_v25, %v2791_v1 }
 0x7fd   : > { %v2908_v5 = vmax.f32 %v2876_v0, 0.0  ;;  %v2677_v35 = vpop.f32.mrf.mxu3 }
 0x7fe   : > { %v2634_v27 = vpop.f32.mrf.mxu0  ;;  %v2893_v14 = vmax.f32 %v2861_v3, 0.0 }
 0x7ff   : > { %v2944_v7 = vmul.f32 %v4501_v48, %v2908_v5 }
 0x800   : > { %v2830_v10 = vpop.f32.mrf.mxu2  ;;  %v2929_v23 = vmul.f32 %v4501_v48, %v2893_v14 }
 0x801   : > { %v2831_v63 = vadd.f32 %v2830_v10, %v2669_v34  ;;  %2968 = vadd.xlane.f32.xlu2 %v2928_v6  ;;  %3000 = vadd.xlane.f32.xlu0 %v2944_v7  ;;  %v2793_v11 = vpop.f32.mrf.mxu1 }
 0x802   : > { %v2794_v17 = vadd.f32 %v2793_v11, %v2632_v29  ;;  %v4560_v11 = vld [vmem:[#allocation5] ss:$0 sm:$0xff] }
 0x803   : > { %v2877_v15 = vadd.f32 %v4495_v25, %v2831_v63 }
 0x804   : > { %v2862_v9 = vadd.f32 %v4495_v25, %v2794_v17 }
 0x805   : > { %v2909_v31 = vmax.f32 %v2877_v15, 0.0  ;;  %v2679_v60 = vpop.f32.mrf.mxu3 }
 0x806   : > { %v2637_v18 = vpop.f32.mrf.mxu0  ;;  %v2894_v22 = vmax.f32 %v2862_v9, 0.0 }
 0x807   : > { %v2945_v12 = vmul.f32 %v4501_v48, %v2909_v31 }
 0x808   : > { %v2833_v21 = vpop.f32.mrf.mxu2  ;;  %v2930_v30 = vmul.f32 %v4501_v48, %v2894_v22 }
 0x809   : > { %v2834_v41 = vadd.f32 %v2833_v21, %v2672_v24  ;;  %3002 = vadd.xlane.f32.xlu1 %v2945_v12  ;;  %2970 = vadd.xlane.f32.xlu0 %v2929_v23  ;;  %v2795_v45 = vpop.f32.mrf.mxu1 }
 0x80a   : > { %v2796_v38 = vadd.f32 %v2795_v45, %v2634_v27 }
 0x80b   : > { %v2878_v16 = vadd.f32 %v4495_v25, %v2834_v41 }
 0x80c   : > { %v2863_v26 = vadd.f32 %v4495_v25, %v2796_v38 }
 0x80d   : > { %v2910_v20 = vmax.f32 %v2878_v16, 0.0  ;;  %v2682_v27 = vpop.f32.mrf.mxu3 }
 0x80e   : > { %v2639_v54 = vpop.f32.mrf.mxu0  ;;  %v2895_v43 = vmax.f32 %v2863_v26, 0.0 }
 0x80f   : > { %v2946_v28 = vmul.f32 %v4501_v48, %v2910_v20 }
 0x810   : > { %v2835_v51 = vpop.f32.mrf.mxu2  ;;  %v2931_v4 = vmul.f32 %v4501_v48, %v2895_v43 }
 0x811   : > { %v2836_v36 = vadd.f32 %v2835_v51, %v2674_v13  ;;  %3004 = vadd.xlane.f32.xlu2 %v2946_v28  ;;  %2972 = vadd.xlane.f32.xlu1 %v2930_v30  ;;  %v2798_v37 = vpop.f32.mrf.mxu1 }
 0x812   : > { %v2799_v46 = vadd.f32 %v2798_v37, %v2637_v18 }
 0x813   : > { %v2879_v44 = vadd.f32 %v4495_v25, %v2836_v36 }
 0x814   : > { %v2864_v32 = vadd.f32 %v4495_v25, %v2799_v46 }
 0x815   : > { %v2911_v8 = vmax.f32 %v2879_v44, 0.0  ;;  %v2684_v45 = vpop.f32.mrf.mxu3 }
 0x816   : > { %v2642_v2 = vpop.f32.mrf.mxu0  ;;  %v2896_v50 = vmax.f32 %v2864_v32, 0.0 }
 0x817   : > { %v2947_v40 = vmul.f32 %v4501_v48, %v2911_v8 }
 0x818   : > { %v2838_v19 = vpop.f32.mrf.mxu2  ;;  %v2932_v58 = vmul.f32 %v4501_v48, %v2896_v50 }
 0x819   : > { %v2839_v61 = vadd.f32 %v2838_v19, %v2677_v35  ;;  %2974 = vadd.xlane.f32.xlu2 %v2931_v4  ;;  %3006 = vadd.xlane.f32.xlu0 %v2947_v40  ;;  %v2800_v49 = vpop.f32.mrf.mxu1 }
 0x81a   : > { %v2801_v57 = vadd.f32 %v2800_v49, %v2639_v54 }
 0x81b   : > { %v2880_v52 = vadd.f32 %v4495_v25, %v2839_v61 }
 0x81c   : > { %v2865_v29 = vadd.f32 %v4495_v25, %v2801_v57 }
 0x81d   : > { %v2912_v34 = vmax.f32 %v2880_v52, 0.0 }
 0x81e   : > { %v2644_v42 = vpop.f32.mrf.mxu0  ;;  %v2897_v62 = vmax.f32 %v2865_v29, 0.0 }
 0x81f   : > { %v2948_v47 = vmul.f32 %v4501_v48, %v2912_v34 }
 0x820   : > { %v2840_v53 = vpop.f32.mrf.mxu2  ;;  %v2933_v24 = vmul.f32 %v4501_v48, %v2897_v62 }
 0x821   : > { %3008 = vadd.xlane.f32.xlu1 %v2948_v47  ;;  %2976 = vadd.xlane.f32.xlu0 %v2932_v58  ;;  %v2803_v55 = vpop.f32.mrf.mxu1  ;;  %v2841_v21 = vadd.f32 %v2840_v53, %v2679_v60 }
 0x822   : > { %v2804_v56 = vadd.f32 %v2803_v55, %v2642_v2 }
 0x823   : > { %v2881_v54 = vadd.f32 %v4495_v25, %v2841_v21 }
 0x824   : > { %v2866_v59 = vadd.f32 %v4495_v25, %v2804_v56 }
 0x825   : > { %v2913_v35 = vmax.f32 %v2881_v54, 0.0 }
 0x826   : > { %v2647_v0 = vpop.f32.mrf.mxu0  ;;  %v2898_v1 = vmax.f32 %v2866_v59, 0.0 }
 0x827   : > { %v2809_v5 = vadd.f32 %v4503_v39, %v2647_v0 }
 0x828   : > { %v2843_v6 = vpop.f32.mrf.mxu2  ;;  %v2934_v7 = vmul.f32 %v4501_v48, %v2898_v1 }
 0x829   : > { %v2868_v3 = vadd.f32 %v4495_v25, %v2809_v5  ;;  %2978 = vadd.xlane.f32.xlu1 %v2933_v24  ;;  %v2805_v10 = vpop.f32.mrf.mxu1  ;;  %v2844_v15 = vadd.f32 %v2843_v6, %v2682_v27 }
 0x82a   : > { %v2806_v63 = vadd.f32 %v2805_v10, %v2644_v42  ;;  %2980 = vadd.xlane.f32.xlu2 %v2934_v7 }
 0x82b   : > { %v2900_v14 = vmax.f32 %v2868_v3, 0.0  ;;  %v2882_v13 = vadd.f32 %v4495_v25, %v2844_v15 }
 0x82c   : > { %v2867_v17 = vadd.f32 %v4495_v25, %v2806_v63 }
 0x82d   : > { %v2953_v39 = vpop.xlane.xlu0 %2952  ;;  %v2936_v23 = vmul.f32 %v4501_v48, %v2900_v14  ;;  %v2914_v26 = vmax.f32 %v2882_v13, 0.0 }
 0x82e   : > { %v2649_v31 = vpop.f32.mrf.mxu0  ;;  %v2899_v18 = vmax.f32 %v2867_v17, 0.0  ;;  %v3020_v12 = vadd.f32 %v4560_v11, %v2953_v39 }
 0x82f   : > { %v2811_v9 = vadd.f32 %v4507_v33, %v2649_v31  ;;  %v2950_v43 = vmul.f32 %v4501_v48, %v2914_v26 }
 0x830   : > { %3053 = vst.msk [vmem:[%s4765_s16] sm:$0xff] %vm3052_vm6, %v3020_v12  ;;  %v2845_v22 = vpop.f32.mrf.mxu2  ;;  %v2935_v16 = vmul.f32 %v4501_v48, %v2899_v18 }
 0x831   : > { %v2869_v41 = vadd.f32 %v4495_v25, %v2811_v9  ;;  %v2846_v38 = vadd.f32 %v2845_v22, %v2684_v45  ;;  %2984 = vadd.xlane.f32.xlu1 %v2936_v23 }
 0x832   : > { %2982 = vadd.xlane.f32.xlu0 %v2935_v16 }
 0x833   : > { %v2901_v33 = vmax.f32 %v2869_v41, 0.0  ;;  %v2883_v20 = vadd.f32 %v4495_v25, %v2846_v38  ;;  %v2949_v25 = vmul.f32 %v4501_v48, %v2913_v35 }
 0x835   : > { %v2937_v28 = vmul.f32 %v4501_v48, %v2901_v33  ;;  %v2915_v30 = vmax.f32 %v2883_v20, 0.0  ;;  %v2955_v51 = vpop.xlane.xlu0 %2954 }
 0x836   : > { %v3021_v36 = vadd.f32 %v4560_v11, %v2955_v51 }
 0x837   : > { %2986 = vadd.xlane.f32.xlu2 %v2937_v28  ;;  %v2951_v37 = vmul.f32 %v4501_v48, %v2915_v30 }
 0x838   : > { %3054 = vst.msk [vmem:[%s4765_s16 + $0x8] sm:$0xff] %vm3052_vm6, %v3021_v36 }
 0x839   : > { %3014 = vadd.xlane.f32.xlu1 %v2951_v37 }
 0x83a   : > { %3012 = vadd.xlane.f32.xlu0 %v2950_v43 }
 0x83d   : > { %v2957_v44 = vpop.xlane.xlu1 %2956 }
 0x83e   : > { %v3022_v46 = vadd.f32 %v4560_v11, %v2957_v44 }
 0x83f   : > { %3010 = vadd.xlane.f32.xlu2 %v2949_v25 }
 0x840   : > { %3055 = vst.msk [vmem:[%s4765_s16 + $0x10] sm:$0xff] %vm3052_vm6, %v3022_v46 }
 0x844   : > { %v2989_v8 = vpop.xlane.xlu0 %2988 }
 0x845   : > { %v2959_v2 = vpop.xlane.xlu1 %2958  ;;  %v3038_v32 = vadd.f32 %v4560_v11, %v2989_v8 }
 0x846   : > { %v3023_v4 = vadd.f32 %v4560_v11, %v2959_v2 }
 0x847   : > { %3071 = vst.msk [vmem:[%s4765_s16 + $0x90] sm:$0xff] %vm3052_vm6, %v3038_v32 }
 0x848   : > { %3056 = vst.msk [vmem:[%s4765_s16 + $0x18] sm:$0xff] %vm3052_vm6, %v3023_v4 }
 0x84d   : > { %v2961_v48 = vpop.xlane.xlu2 %2960  ;;  %v2991_v40 = vpop.xlane.xlu1 %2990 }
 0x84e   : > { %v3024_v19 = vadd.f32 %v4560_v11, %v2961_v48  ;;  %v3039_v61 = vadd.f32 %v4560_v11, %v2991_v40 }
 0x850   : > { %3057 = vst.msk [vmem:[%s4765_s16 + $0x20] sm:$0xff] %vm3052_vm6, %v3024_v19 }
 0x851   : > { %3072 = vst.msk [vmem:[%s4765_s16 + $0x98] sm:$0xff] %vm3052_vm6, %v3039_v61 }
 0x855   : > { %v2993_v49 = vpop.xlane.xlu2 %2992 }
 0x856   : > { %v3040_v50 = vadd.f32 %v4560_v11, %v2993_v49 }
 0x858   : > { %3073 = vst.msk [vmem:[%s4765_s16 + $0xa0] sm:$0xff] %vm3052_vm6, %v3040_v50 }
 0x85c   : > { %v2995_v52 = vpop.xlane.xlu0 %2994 }
 0x85d   : > { %v3041_v57 = vadd.f32 %v4560_v11, %v2995_v52  ;;  %v2963_v60 = vpop.xlane.xlu2 %2962 }
 0x85e   : > { %v3025_v34 = vadd.f32 %v4560_v11, %v2963_v60 }
 0x85f   : > { %3074 = vst.msk [vmem:[%s4765_s16 + $0xa8] sm:$0xff] %vm3052_vm6, %v3041_v57 }
 0x860   : > { %3058 = vst.msk [vmem:[%s4765_s16 + $0x28] sm:$0xff] %vm3052_vm6, %v3025_v34 }
 0x864   : > { %v2997_v42 = vpop.xlane.xlu1 %2996  ;;  %v2965_v29 = vpop.xlane.xlu0 %2964 }
 0x865   : > { %v3042_v47 = vadd.f32 %v4560_v11, %v2997_v42  ;;  %v3026_v58 = vadd.f32 %v4560_v11, %v2965_v29 }
 0x867   : > { %3075 = vst.msk [vmem:[%s4765_s16 + $0xb0] sm:$0xff] %vm3052_vm6, %v3042_v47 }
 0x868   : > { %3059 = vst.msk [vmem:[%s4765_s16 + $0x30] sm:$0xff] %vm3052_vm6, %v3026_v58 }
 0x86c   : > { %v2999_v53 = vpop.xlane.xlu2 %2998  ;;  %v2967_v55 = vpop.xlane.xlu1 %2966 }
 0x86d   : > { %v3043_v56 = vadd.f32 %v4560_v11, %v2999_v53  ;;  %v3027_v62 = vadd.f32 %v4560_v11, %v2967_v55 }
 0x86f   : > { %3076 = vst.msk [vmem:[%s4765_s16 + $0xb8] sm:$0xff] %vm3052_vm6, %v3043_v56 }
 0x870   : > { %3060 = vst.msk [vmem:[%s4765_s16 + $0x38] sm:$0xff] %vm3052_vm6, %v3027_v62 }
 0x874   : > { %v2969_v59 = vpop.xlane.xlu2 %2968  ;;  %v3001_v0 = vpop.xlane.xlu0 %3000 }
 0x875   : > { %v3028_v1 = vadd.f32 %v4560_v11, %v2969_v59  ;;  %v3044_v5 = vadd.f32 %v4560_v11, %v3001_v0 }
 0x877   : > { %3061 = vst.msk [vmem:[%s4765_s16 + $0x40] sm:$0xff] %vm3052_vm6, %v3028_v1 }
 0x878   : > { %3077 = vst.msk [vmem:[%s4765_s16 + $0xc0] sm:$0xff] %vm3052_vm6, %v3044_v5 }
 0x87c   : > { %v3003_v27 = vpop.xlane.xlu1 %3002  ;;  %v2971_v24 = vpop.xlane.xlu0 %2970 }
 0x87d   : > { %v3045_v3 = vadd.f32 %v4560_v11, %v3003_v27  ;;  %v3029_v6 = vadd.f32 %v4560_v11, %v2971_v24 }
 0x87f   : > { %3078 = vst.msk [vmem:[%s4765_s16 + $0xc8] sm:$0xff] %vm3052_vm6, %v3045_v3 }
 0x880   : > { %3062 = vst.msk [vmem:[%s4765_s16 + $0x48] sm:$0xff] %vm3052_vm6, %v3029_v6 }
 0x884   : > { %v3005_v7 = vpop.xlane.xlu2 %3004  ;;  %v2973_v10 = vpop.xlane.xlu1 %2972 }
 0x885   : > { %v3046_v63 = vadd.f32 %v4560_v11, %v3005_v7  ;;  %v3030_v14 = vadd.f32 %v4560_v11, %v2973_v10 }
 0x887   : > { %3079 = vst.msk [vmem:[%s4765_s16 + $0xd0] sm:$0xff] %vm3052_vm6, %v3046_v63 }
 0x888   : > { %3063 = vst.msk [vmem:[%s4765_s16 + $0x50] sm:$0xff] %vm3052_vm6, %v3030_v14 }
 0x88c   : > { %v2975_v15 = vpop.xlane.xlu2 %2974  ;;  %v3007_v17 = vpop.xlane.xlu0 %3006 }
 0x88d   : > { %v3031_v31 = vadd.f32 %v4560_v11, %v2975_v15  ;;  %v3047_v39 = vadd.f32 %v4560_v11, %v3007_v17 }
 0x88f   : > { %3064 = vst.msk [vmem:[%s4765_s16 + $0x58] sm:$0xff] %vm3052_vm6, %v3031_v31 }
 0x890   : > { %3080 = vst.msk [vmem:[%s4765_s16 + $0xd8] sm:$0xff] %vm3052_vm6, %v3047_v39 }
 0x894   : > { %v3009_v18 = vpop.xlane.xlu1 %3008  ;;  %v2977_v9 = vpop.xlane.xlu0 %2976 }
 0x895   : > { %v3048_v12 = vadd.f32 %v4560_v11, %v3009_v18  ;;  %v3032_v23 = vadd.f32 %v4560_v11, %v2977_v9 }
 0x897   : > { %3081 = vst.msk [vmem:[%s4765_s16 + $0xe0] sm:$0xff] %vm3052_vm6, %v3048_v12 }
 0x898   : > { %3065 = vst.msk [vmem:[%s4765_s16 + $0x60] sm:$0xff] %vm3052_vm6, %v3032_v23 }
 0x89c   : > { %v2979_v21 = vpop.xlane.xlu1 %2978 }
 0x89d   : > { %v3033_v13 = vadd.f32 %v4560_v11, %v2979_v21  ;;  %v2981_v41 = vpop.xlane.xlu2 %2980 }
 0x89e   : > { %v3034_v45 = vadd.f32 %v4560_v11, %v2981_v41 }
 0x89f   : > { %3066 = vst.msk [vmem:[%s4765_s16 + $0x68] sm:$0xff] %vm3052_vm6, %v3033_v13 }
 0x8a0   : > { %3067 = vst.msk [vmem:[%s4765_s16 + $0x70] sm:$0xff] %vm3052_vm6, %v3034_v45 }
 0x8a4   : > { %v2985_v22 = vpop.xlane.xlu1 %2984 }
 0x8a5   : > { %v3036_v16 = vadd.f32 %v4560_v11, %v2985_v22  ;;  %v2983_v38 = vpop.xlane.xlu0 %2982 }
 0x8a6   : > { %v3035_v33 = vadd.f32 %v4560_v11, %v2983_v38 }
 0x8a7   : > { %3069 = vst.msk [vmem:[%s4765_s16 + $0x80] sm:$0xff] %vm3052_vm6, %v3036_v16 }
 0x8a8   : > { %3068 = vst.msk [vmem:[%s4765_s16 + $0x78] sm:$0xff] %vm3052_vm6, %v3035_v33 }
 0x8aa   : > { %v2987_v20 = vpop.xlane.xlu2 %2986 }
 0x8ab   : > { %v3037_v54 = vadd.f32 %v4560_v11, %v2987_v20 }
 0x8ac   : > { %v3015_v26 = vpop.xlane.xlu1 %3014 }
 0x8ad   : > { %3070 = vst.msk [vmem:[%s4765_s16 + $0x88] sm:$0xff] %vm3052_vm6, %v3037_v54  ;;  %v3051_v28 = vadd.f32 %v4560_v11, %v3015_v26  ;;  %v3013_v30 = vpop.xlane.xlu0 %3012 }
 0x8ae   : > { %v3050_v51 = vadd.f32 %v4560_v11, %v3013_v30 }
 0x8af   : > { %3084 = vst.msk [vmem:[%s4765_s16 + $0xf8] sm:$0xff] %vm3052_vm6, %v3051_v28 }
 0x8b0   : > { %3083 = vst.msk [vmem:[%s4765_s16 + $0xf0] sm:$0xff] %vm3052_vm6, %v3050_v51 }
 0x8b2   : > { %v3011_v36 = vpop.xlane.xlu2 %3010 }
 0x8b3   : > { %v3049_v37 = vadd.f32 %v4560_v11, %v3011_v36 }
 0x8b5   : > { %3082 = vst.msk [vmem:[%s4765_s16 + $0xe8] sm:$0xff] %vm3052_vm6, %v3049_v37 }
 0x8b6 PF: > { %s28_s27 = sadd.s32 1, %s3493_s27   ;;  %s4772_s24 = sld [smem:[#allocation6_spill]] }
 0x8b7   : > { %p25_p0 = scmp.ge.s32.totalorder %s28_s27, 20   ;;  %s4773_s20 = sld [smem:[#allocation7_spill]] }
 0x8b8   : > { %s4774_s26 = sld [smem:[#allocation8_spill]]  ;;  %s4775_s23 = smov %s3485_s25 }
 0x8b9   :  { %27 = sbr.rel (!%p25_p0) target bundleno = 3 (0x3), region = 126 }
 0x8bd   : > { %s4776_s25 = smov %s4773_s20 }

</bundles_post_ra>
